<compile_context>
chip_gen: v7x
topology: tpu7x:2x2x1
jax: 0.10.0
libtpu: 0.0.40
codegen_flags: <defaults>
</compile_context>

<pallas_src>
import functools

import jax
import jax.numpy as jnp
from jax.experimental import pallas as pl
from jax.experimental.pallas import tpu as pltpu

BN_EPS = 1e-5
VMEM_LIMIT_BYTES = 32 * 1024 * 1024  # safe on v5e/v6e/v7x; tiles use ~<5 MiB


def _round_up(x, m):
    return (x + m - 1) // m * m


def _pad2d(a, mp, np_, value=0.0):
    m, n = a.shape
    if m == mp and n == np_:
        return a
    return jnp.pad(a, ((0, mp - m), (0, np_ - n)), constant_values=value)


def _pick_tiles(M, K, N):
    """Generation-aware-ish tile selection (tn<=256, tm<=512, minimal K grid)."""
    # K: collapse to a single step when it fits, else choose the largest
    # 128-multiple tile that divides the padded K.
    Kp = _round_up(K, 128)
    if Kp <= 512:
        tk = Kp
    else:
        tk = 128
        for cand in (512, 384, 256, 128):
            if Kp % cand == 0:
                tk = cand
                break
    # N: lane-dense tiles, up to 256 wide (matches v6e/v7x 256-wide MXU; still
    # fine on v5e's 128-wide MXU).
    Np = _round_up(N, 128)
    if Np <= 256:
        tn = Np
    else:
        tn = 256
        Np = _round_up(Np, tn)
    # M: big tiles to amortize per-grid-step overhead, but keep >=2 blocks on
    # larger problems so megacore chips can shard the parallel axis.
    Mp = _round_up(M, 8)
    if Mp <= 512:
        tm = Mp
    elif Mp <= 1024:
        tm = 256
        Mp = _round_up(Mp, tm)
    else:
        tm = 512
        Mp = _round_up(Mp, tm)
    return tm, tk, tn, Mp, Kp, Np


# ---------------------------------------------------------------------------
# Pallas kernels
# ---------------------------------------------------------------------------
def _mm_bias_kernel(a_ref, w_ref, b_ref, o_ref, acc_ref, *, relu):
    k = pl.program_id(2)

    @pl.when(k == 0)
    def _():
        acc_ref[...] = jnp.zeros_like(acc_ref)

    acc_ref[...] += jnp.dot(a_ref[...], w_ref[...],
                            preferred_element_type=jnp.float32)

    @pl.when(k == pl.num_programs(2) - 1)
    def _():
        y = acc_ref[...] + b_ref[...]
        if relu:
            y = jnp.maximum(y, 0.0)
        o_ref[...] = y.astype(o_ref.dtype)


def _mm_bias_res_kernel(a_ref, w_ref, b_ref, r_ref, o_ref, acc_ref, *, relu):
    k = pl.program_id(2)

    @pl.when(k == 0)
    def _():
        acc_ref[...] = jnp.zeros_like(acc_ref)

    acc_ref[...] += jnp.dot(a_ref[...], w_ref[...],
                            preferred_element_type=jnp.float32)

    @pl.when(k == pl.num_programs(2) - 1)
    def _():
        y = acc_ref[...] + b_ref[...] + r_ref[...].astype(jnp.float32)
        if relu:
            y = jnp.maximum(y, 0.0)
        o_ref[...] = y.astype(o_ref.dtype)


def matmul_bias_act(a, w, bias, relu, residual=None, out_dtype=jnp.bfloat16):
    """out = act(a @ w + bias [+ residual]); bias broadcast over rows."""
    M, K = a.shape
    K2, N = w.shape
    assert K == K2
    tm, tk, tn, Mp, Kp, Np = _pick_tiles(M, K, N)

    a_p = _pad2d(a.astype(jnp.bfloat16), Mp, Kp)
    w_p = _pad2d(w.astype(jnp.bfloat16), Kp, Np)
    b_p = _pad2d(bias.astype(jnp.float32).reshape(1, N), 1, Np)

    in_specs = [
        pl.BlockSpec((tm, tk), lambda i, j, k: (i, k)),
        pl.BlockSpec((tk, tn), lambda i, j, k: (k, j)),
        pl.BlockSpec((1, tn), lambda i, j, k: (0, j)),
    ]
    args = [a_p, w_p, b_p]
    if residual is not None:
        r_p = _pad2d(residual.astype(jnp.bfloat16), Mp, Np)
        in_specs.append(pl.BlockSpec((tm, tn), lambda i, j, k: (i, j)))
        args.append(r_p)
        kernel = functools.partial(_mm_bias_res_kernel, relu=relu)
    else:
        kernel = functools.partial(_mm_bias_kernel, relu=relu)

    out = pl.pallas_call(
        kernel,
        out_shape=jax.ShapeDtypeStruct((Mp, Np), out_dtype),
        grid_spec=pltpu.PrefetchScalarGridSpec(
            num_scalar_prefetch=0,
            grid=(Mp // tm, Np // tn, Kp // tk),
            in_specs=in_specs,
            out_specs=pl.BlockSpec((tm, tn), lambda i, j, k: (i, j)),
            scratch_shapes=[pltpu.VMEM((tm, tn), jnp.float32)],
        ),
        compiler_params=pltpu.CompilerParams(
            dimension_semantics=("parallel", "parallel", "arbitrary"),
            vmem_limit_bytes=VMEM_LIMIT_BYTES),
    )(*args)
    return out[:M, :N]


def _max_reduce_kernel(x_ref, o_ref):
    o_ref[...] = jnp.max(x_ref[...].astype(jnp.float32),
                         axis=0).astype(o_ref.dtype)


def max_over_windows(stacked):
    # stacked: (KWIN, M, C) -> elementwise max over axis 0 -> (M, C), tiled over M.
    kwin, M, C = stacked.shape
    Cp = _round_up(C, 128)
    Mp = _round_up(M, 8)
    tm = Mp if Mp <= 512 else 512
    Mp = _round_up(Mp, tm)
    s_p = jnp.pad(stacked, ((0, 0), (0, Mp - M), (0, Cp - C)))
    out = pl.pallas_call(
        _max_reduce_kernel,
        out_shape=jax.ShapeDtypeStruct((Mp, Cp), stacked.dtype),
        grid=(Mp // tm,),
        in_specs=[pl.BlockSpec((kwin, tm, Cp), lambda i: (0, i, 0))],
        out_specs=pl.BlockSpec((tm, Cp), lambda i: (i, 0)),
        compiler_params=pltpu.CompilerParams(
            dimension_semantics=("parallel",),
            vmem_limit_bytes=VMEM_LIMIT_BYTES),
    )(s_p)
    return out[:M, :C]


def _avg_pool_kernel(x_ref, o_ref, acc_ref, *, denom):
    k = pl.program_id(0)

    @pl.when(k == 0)
    def _():
        acc_ref[...] = jnp.zeros_like(acc_ref)

    acc_ref[...] += jnp.sum(x_ref[...].astype(jnp.float32), axis=0)

    @pl.when(k == pl.num_programs(0) - 1)
    def _():
        o_ref[...] = acc_ref[...] * (1.0 / denom)


def global_avg_pool(x):
    # x: (N, H, W, C) -> (N, C)   (AdaptiveAvgPool2d(1) + flatten)
    n, h, w, c = x.shape
    hw = h * w
    Np, Cp = _round_up(n, 8), _round_up(c, 128)
    xt = jnp.transpose(x.reshape(n, hw, c), (1, 0, 2))  # (hw, n, c)
    if hw <= 1024:
        thw, hwp = hw, hw
    else:
        thw = 512
        hwp = _round_up(hw, thw)
    xt = jnp.pad(xt, ((0, hwp - hw), (0, Np - n), (0, Cp - c)))
    out = pl.pallas_call(
        functools.partial(_avg_pool_kernel, denom=float(hw)),
        out_shape=jax.ShapeDtypeStruct((Np, Cp), jnp.float32),
        grid_spec=pltpu.PrefetchScalarGridSpec(
            num_scalar_prefetch=0,
            grid=(hwp // thw,),
            in_specs=[pl.BlockSpec((thw, Np, Cp), lambda k: (k, 0, 0))],
            out_specs=pl.BlockSpec((Np, Cp), lambda k: (0, 0)),
            scratch_shapes=[pltpu.VMEM((Np, Cp), jnp.float32)],
        ),
        compiler_params=pltpu.CompilerParams(
            dimension_semantics=("arbitrary",),
            vmem_limit_bytes=VMEM_LIMIT_BYTES),
    )(xt)
    return out[:n, :c]


# ---------------------------------------------------------------------------
# Conv / pooling glue (patch extraction is layout plumbing; compute is Pallas)
# ---------------------------------------------------------------------------
def _extract_windows(x, kh, kw, stride, pad, pad_value=0.0):
    xp = jnp.pad(x, ((0, 0), (pad, pad), (pad, pad), (0, 0)),
                 constant_values=pad_value)
    Hp, Wp = xp.shape[1], xp.shape[2]
    oh = (Hp - kh) // stride + 1
    ow = (Wp - kw) // stride + 1
    wins = []
    for i in range(kh):
        for j in range(kw):
            wins.append(xp[:, i:i + stride * (oh - 1) + 1:stride,
                           j:j + stride * (ow - 1) + 1:stride, :])
    return wins, oh, ow


def conv_bn_act(x, w, scale, bias, stride, pad, relu, residual=None):
    # x: (N, H, W, Cin); w: (KH, KW, Cin, Cout); BN scale folded into weights.
    kh, kw, cin, cout = w.shape
    n = x.shape[0]
    x = x.astype(jnp.bfloat16)
    if kh == 1 and kw == 1 and pad == 0:
        xs = x[:, ::stride, ::stride, :]
        oh, ow = xs.shape[1], xs.shape[2]
        patches = xs.reshape(n * oh * ow, cin)
    else:
        wins, oh, ow = _extract_windows(x, kh, kw, stride, pad, 0.0)
        patches = jnp.stack(wins, axis=3)              # (N, OH, OW, KH*KW, Cin)
        patches = patches.reshape(n * oh * ow, kh * kw * cin)
    wmat = (w * scale).reshape(kh * kw * cin, cout)    # fold BN scale
    res2d = None if residual is None else residual.reshape(n * oh * ow, cout)
    y = matmul_bias_act(patches, wmat, bias, relu, residual=res2d)
    return y.reshape(n, oh, ow, cout)


def maxpool_3x3_s2p1(x):
    n, h, w, c = x.shape
    wins, oh, ow = _extract_windows(x, 3, 3, 2, 1, pad_value=-jnp.inf)
    stacked = jnp.stack([v.reshape(n * oh * ow, c) for v in wins], axis=0)
    y = max_over_windows(stacked)
    return y.reshape(n, oh, ow, c)


# ---------------------------------------------------------------------------
# Parameters (deterministic synthetic init)
# ---------------------------------------------------------------------------
def _fold_bn(gamma, beta, mean, var):
    scale = gamma / jnp.sqrt(var + BN_EPS)
    bias = beta - mean * scale
    return scale, bias


def make_conv_bn(key, kh, kw, cin, cout):
    kw_, kg, kb, km = jax.random.split(key, 4)
    w = jax.random.normal(kw_, (kh, kw, cin, cout), jnp.float32) * 0.05
    gamma = 1.0 + 0.1 * jax.random.normal(kg, (cout,), jnp.float32)
    beta = 0.1 * jax.random.normal(kb, (cout,), jnp.float32)
    mean = 0.1 * jax.random.normal(km, (cout,), jnp.float32)
    var = jnp.ones((cout,), jnp.float32)
    scale, bias = _fold_bn(gamma, beta, mean, var)
    return {'w': w, 'scale': scale, 'bias': bias}


def make_block_params(key, in_c, mid_c, expansion, stride):
    out_c = mid_c * expansion
    keys = jax.random.split(key, 4)
    p = {
        'stride': stride,
        'identity': in_c == out_c,
        'conv1': make_conv_bn(keys[0], 1, 1, in_c, mid_c),
        'conv2': make_conv_bn(keys[1], 3, 3, mid_c, mid_c),
        'conv3': make_conv_bn(keys[2], 1, 1, mid_c, out_c),
    }
    if not p['identity']:
        p['proj'] = make_conv_bn(keys[3], 1, 1, in_c, out_c)
    return p


def init_resnet_params(key, channels_list, repetition_list, expansion,
                       in_channels, num_classes):
    keys = jax.random.split(key, 2 + sum(repetition_list))
    params = {'stem': make_conv_bn(keys[0], 7, 7, in_channels, 64)}
    blocks = []
    in_c = 64
    ki = 1
    for stage, (mid_c, rep) in enumerate(zip(channels_list, repetition_list)):
        stage_stride = 1 if stage == 0 else 2
        for r in range(rep):
            s = stage_stride if r == 0 else 1
            blocks.append(make_block_params(keys[ki], in_c, mid_c, expansion, s))
            in_c = mid_c * expansion
            ki += 1
    params['blocks'] = blocks
    kfw, kfb = jax.random.split(keys[ki])
    params['fc_w'] = jax.random.normal(kfw, (in_c, num_classes), jnp.float32) * 0.05
    params['fc_b'] = 0.1 * jax.random.normal(kfb, (num_classes,), jnp.float32)
    return params


# ---------------------------------------------------------------------------
# Forward pass
# ---------------------------------------------------------------------------
def block_forward(x, p):
    inp = x
    c1, c2, c3 = p['conv1'], p['conv2'], p['conv3']
    y = conv_bn_act(x, c1['w'], c1['scale'], c1['bias'], 1, 0, relu=True)
    y = conv_bn_act(y, c2['w'], c2['scale'], c2['bias'], p['stride'], 1,
                    relu=True)
    if p['identity']:
        res = inp
    else:
        q = p['proj']
        res = conv_bn_act(inp, q['w'], q['scale'], q['bias'], p['stride'], 0,
                          relu=False)
    # conv3 + BN + residual add + ReLU fused into one matmul epilogue.
    y = conv_bn_act(y, c3['w'], c3['scale'], c3['bias'], 1, 0, relu=True,
                    residual=res)
    return y


def resnet_forward(x_nchw, params):
    x = jnp.transpose(x_nchw, (0, 2, 3, 1)).astype(jnp.float32)  # NCHW -> NHWC
    st = params['stem']
    x = conv_bn_act(x, st['w'], st['scale'], st['bias'], 2, 3, relu=True)
    x = maxpool_3x3_s2p1(x)
    for p in params['blocks']:
        x = block_forward(x, p)
    x = global_avg_pool(x)                                       # (N, C) f32
    y = matmul_bias_act(x, params['fc_w'], params['fc_b'], relu=False,
                        out_dtype=jnp.float32)
    return {'y_hat': y}


if __name__ == "__main__":
    # Small ResNet variant (same structure as the PyTorch module, scaled down):
    channels_list = [8, 16, 32, 64]
    repetition_list = [1, 1, 1, 1]
    expansion = 4
    is_bottleneck = True  # only path implemented
    in_channels = 1
    num_classes = 10

    key = jax.random.PRNGKey(0)
    kx, kp = jax.random.split(key)
    x = jax.random.normal(kx, (2, in_channels, 32, 32), jnp.float32)
    params = init_resnet_params(kp, channels_list, repetition_list, expansion,
                                in_channels, num_classes)

    fwd = jax.jit(lambda inp: resnet_forward(inp, params))
    out = fwd(x)
    jax.block_until_ready(out)
    assert out['y_hat'].shape == (2, num_classes)
    assert bool(jnp.all(jnp.isfinite(out['y_hat'])))
    print("KERNEL_OK")
</pallas_src>

<mosaic_0001>
module attributes {stable_mosaic.version = 11 : i64} {
  func.func @_mm_bias_kernel(%arg0: i32, %arg1: i32, %arg2: i32, %arg3: memref<512x128xbf16, #tpu.memory_space<vmem>>, %arg4: memref<128x128xbf16, #tpu.memory_space<vmem>>, %arg5: memref<1x128xf32, #tpu.memory_space<vmem>>, %arg6: memref<512x128xbf16, #tpu.memory_space<vmem>>, %arg7: memref<512x128xf32, #tpu.memory_space<vmem>>) attributes {dimension_semantics = [#tpu.dimension_semantics<parallel>, #tpu.dimension_semantics<parallel>, #tpu.dimension_semantics<arbitrary>], iteration_bounds = array<i64: 1, 1, 1>, scalar_prefetch = 0 : i64, scratch_operands = 1 : i64, tpu.core_type = #tpu.core_type<tc>, window_params = [{transform_indices = @transform_0, window_bounds = array<i64: 512, 128>}, {transform_indices = @transform_1, window_bounds = array<i64: 128, 128>}, {transform_indices = @transform_2, window_bounds = array<i64: 1, 128>}, {transform_indices = @transform_3, window_bounds = array<i64: 512, 128>}]} {
    %c0_i32 = arith.constant 0 : i32
    %0 = arith.cmpi eq, %arg2, %c0_i32 : i32
    %1 = arith.extui %0 : i1 to i32
    %c0_i32_0 = arith.constant 0 : i32
    %2 = arith.cmpi ne, %1, %c0_i32_0 : i32
    scf.if %2 {
      %cst_10 = arith.constant 0.000000e+00 : f32
      %12 = vector.broadcast %cst_10 : f32 to vector<512x128xf32>
      %c0_11 = arith.constant 0 : index
      %c0_12 = arith.constant 0 : index
      %13 = vector.load %arg7[%c0_11, %c0_12] : memref<512x128xf32, #tpu.memory_space<vmem>>, vector<512x128xf32>
      tpu.vector_store %arg7[%c0_11, %c0_12], %12 {strides = array<i32>} : memref<512x128xf32, #tpu.memory_space<vmem>>, vector<512x128xf32>,
    } else {
    }
    %c0 = arith.constant 0 : index
    %c0_1 = arith.constant 0 : index
    %3 = vector.load %arg7[%c0, %c0_1] : memref<512x128xf32, #tpu.memory_space<vmem>>, vector<512x128xf32>
    %c0_2 = arith.constant 0 : index
    %c0_3 = arith.constant 0 : index
    %4 = vector.load %arg3[%c0_2, %c0_3] : memref<512x128xbf16, #tpu.memory_space<vmem>>, vector<512x128xbf16>
    %c0_4 = arith.constant 0 : index
    %c0_5 = arith.constant 0 : index
    %5 = vector.load %arg4[%c0_4, %c0_5] : memref<128x128xbf16, #tpu.memory_space<vmem>>, vector<128x128xbf16>
    %cst = arith.constant dense<0.000000e+00> : vector<512x128xf32>
    %6 = tpu.matmul %4, %5, %cst {dimension_numbers = #tpu.dot_dimension_numbers<[1], [0], [0], [1], [0, 0, 1, 1], [], []>} : vector<512x128xbf16>, vector<128x128xbf16>, vector<512x128xf32> -> vector<512x128xf32>
    %7 = arith.addf %3, %6 : vector<512x128xf32>
    %c0_6 = arith.constant 0 : index
    %c0_7 = arith.constant 0 : index
    %8 = vector.load %arg7[%c0_6, %c0_7] : memref<512x128xf32, #tpu.memory_space<vmem>>, vector<512x128xf32>
    tpu.vector_store %arg7[%c0_6, %c0_7], %7 {strides = array<i32>} : memref<512x128xf32, #tpu.memory_space<vmem>>, vector<512x128xf32>,
    %c0_i32_8 = arith.constant 0 : i32
    %9 = arith.cmpi eq, %arg2, %c0_i32_8 : i32
    %10 = arith.extui %9 : i1 to i32
    %c0_i32_9 = arith.constant 0 : i32
    %11 = arith.cmpi ne, %10, %c0_i32_9 : i32
    scf.if %11 {
      %c0_10 = arith.constant 0 : index
      %c0_11 = arith.constant 0 : index
      %12 = vector.load %arg7[%c0_10, %c0_11] : memref<512x128xf32, #tpu.memory_space<vmem>>, vector<512x128xf32>
      %c0_12 = arith.constant 0 : index
      %c0_13 = arith.constant 0 : index
      %13 = vector.load %arg5[%c0_12, %c0_13] : memref<1x128xf32, #tpu.memory_space<vmem>>, vector<1x128xf32>
      %14 = vector.broadcast %13 : vector<1x128xf32> to vector<512x128xf32>
      %15 = arith.addf %12, %14 : vector<512x128xf32>
      %cst_14 = arith.constant 0.000000e+00 : f32
      %16 = vector.broadcast %cst_14 : f32 to vector<512x128xf32>
      %17 = arith.maximumf %15, %16 : vector<512x128xf32>
      %18 = arith.truncf %17 : vector<512x128xf32> to vector<512x128xbf16>
      %c0_15 = arith.constant 0 : index
      %c0_16 = arith.constant 0 : index
      %19 = vector.load %arg6[%c0_15, %c0_16] : memref<512x128xbf16, #tpu.memory_space<vmem>>, vector<512x128xbf16>
      tpu.vector_store %arg6[%c0_15, %c0_16], %18 {strides = array<i32>} : memref<512x128xbf16, #tpu.memory_space<vmem>>, vector<512x128xbf16>,
    } else {
    }
    return
  }
  func.func @transform_0(%arg0: i32, %arg1: i32, %arg2: i32) -> (i32, i32) {
    %c0_i32 = arith.constant 0 : i32
    return %arg0, %arg2 : i32, i32
  }
  func.func @transform_1(%arg0: i32, %arg1: i32, %arg2: i32) -> (i32, i32) {
    %c0_i32 = arith.constant 0 : i32
    return %arg2, %arg1 : i32, i32
  }
  func.func @transform_2(%arg0: i32, %arg1: i32, %arg2: i32) -> (i32, i32) {
    %c0_i32 = arith.constant 0 : i32
    %c0_i32_0 = arith.constant 0 : i32
    return %c0_i32, %arg1 : i32, i32
  }
  func.func @transform_3(%arg0: i32, %arg1: i32, %arg2: i32) -> (i32, i32) {
    %c0_i32 = arith.constant 0 : i32
    return %arg0, %arg1 : i32, i32
  }
}

module attributes {stable_mosaic.version = 11 : i64} {
  func.func @_max_reduce_kernel(%arg0: i32, %arg1: memref<9x128x128xbf16, #tpu.memory_space<vmem>>, %arg2: memref<128x128xbf16, #tpu.memory_space<vmem>>) attributes {dimension_semantics = [#tpu.dimension_semantics<parallel>], iteration_bounds = array<i64: 1>, scalar_prefetch = 0 : i64, scratch_operands = 0 : i64, tpu.core_type = #tpu.core_type<tc>, window_params = [{transform_indices = @transform_0, window_bounds = array<i64: 9, 128, 128>}, {transform_indices = @transform_1, window_bounds = array<i64: 128, 128>}]} {
    %c0 = arith.constant 0 : index
    %c0_0 = arith.constant 0 : index
    %c0_1 = arith.constant 0 : index
    %0 = vector.load %arg1[%c0, %c0_0, %c0_1] : memref<9x128x128xbf16, #tpu.memory_space<vmem>>, vector<9x128x128xbf16>
    %1 = arith.extf %0 : vector<9x128x128xbf16> to vector<9x128x128xf32>
    %cst = arith.constant dense<0xFF800000> : vector<128x128xf32>
    %2 = vector.multi_reduction <maximumf>, %1, %cst [0] : vector<9x128x128xf32> to vector<128x128xf32>
    %3 = arith.truncf %2 : vector<128x128xf32> to vector<128x128xbf16>
    %c0_2 = arith.constant 0 : index
    %c0_3 = arith.constant 0 : index
    %4 = vector.load %arg2[%c0_2, %c0_3] : memref<128x128xbf16, #tpu.memory_space<vmem>>, vector<128x128xbf16>
    tpu.vector_store %arg2[%c0_2, %c0_3], %3 {strides = array<i32>} : memref<128x128xbf16, #tpu.memory_space<vmem>>, vector<128x128xbf16>,
    return
  }
  func.func @transform_0(%arg0: i32) -> (i32, i32, i32) {
    %c0_i32 = arith.constant 0 : i32
    %c0_i32_0 = arith.constant 0 : i32
    %c0_i32_1 = arith.constant 0 : i32
    return %c0_i32, %arg0, %c0_i32_0 : i32, i32, i32
  }
  func.func @transform_1(%arg0: i32) -> (i32, i32) {
    %c0_i32 = arith.constant 0 : i32
    %c0_i32_0 = arith.constant 0 : i32
    return %arg0, %c0_i32 : i32, i32
  }
}

module attributes {stable_mosaic.version = 11 : i64} {
  func.func @_mm_bias_kernel(%arg0: i32, %arg1: i32, %arg2: i32, %arg3: memref<128x128xbf16, #tpu.memory_space<vmem>>, %arg4: memref<128x128xbf16, #tpu.memory_space<vmem>>, %arg5: memref<1x128xf32, #tpu.memory_space<vmem>>, %arg6: memref<128x128xbf16, #tpu.memory_space<vmem>>, %arg7: memref<128x128xf32, #tpu.memory_space<vmem>>) attributes {dimension_semantics = [#tpu.dimension_semantics<parallel>, #tpu.dimension_semantics<parallel>, #tpu.dimension_semantics<arbitrary>], iteration_bounds = array<i64: 1, 1, 1>, scalar_prefetch = 0 : i64, scratch_operands = 1 : i64, tpu.core_type = #tpu.core_type<tc>, window_params = [{transform_indices = @transform_0, window_bounds = array<i64: 128, 128>}, {transform_indices = @transform_1, window_bounds = array<i64: 128, 128>}, {transform_indices = @transform_2, window_bounds = array<i64: 1, 128>}, {transform_indices = @transform_3, window_bounds = array<i64: 128, 128>}]} {
    %c0_i32 = arith.constant 0 : i32
    %0 = arith.cmpi eq, %arg2, %c0_i32 : i32
    %1 = arith.extui %0 : i1 to i32
    %c0_i32_0 = arith.constant 0 : i32
    %2 = arith.cmpi ne, %1, %c0_i32_0 : i32
    scf.if %2 {
      %cst_10 = arith.constant 0.000000e+00 : f32
      %12 = vector.broadcast %cst_10 : f32 to vector<128x128xf32>
      %c0_11 = arith.constant 0 : index
      %c0_12 = arith.constant 0 : index
      %13 = vector.load %arg7[%c0_11, %c0_12] : memref<128x128xf32, #tpu.memory_space<vmem>>, vector<128x128xf32>
      tpu.vector_store %arg7[%c0_11, %c0_12], %12 {strides = array<i32>} : memref<128x128xf32, #tpu.memory_space<vmem>>, vector<128x128xf32>,
    } else {
    }
    %c0 = arith.constant 0 : index
    %c0_1 = arith.constant 0 : index
    %3 = vector.load %arg7[%c0, %c0_1] : memref<128x128xf32, #tpu.memory_space<vmem>>, vector<128x128xf32>
    %c0_2 = arith.constant 0 : index
    %c0_3 = arith.constant 0 : index
    %4 = vector.load %arg3[%c0_2, %c0_3] : memref<128x128xbf16, #tpu.memory_space<vmem>>, vector<128x128xbf16>
    %c0_4 = arith.constant 0 : index
    %c0_5 = arith.constant 0 : index
    %5 = vector.load %arg4[%c0_4, %c0_5] : memref<128x128xbf16, #tpu.memory_space<vmem>>, vector<128x128xbf16>
    %cst = arith.constant dense<0.000000e+00> : vector<128x128xf32>
    %6 = tpu.matmul %4, %5, %cst {dimension_numbers = #tpu.dot_dimension_numbers<[1], [0], [0], [1], [0, 0, 1, 1], [], []>} : vector<128x128xbf16>, vector<128x128xbf16>, vector<128x128xf32> -> vector<128x128xf32>
    %7 = arith.addf %3, %6 : vector<128x128xf32>
    %c0_6 = arith.constant 0 : index
    %c0_7 = arith.constant 0 : index
    %8 = vector.load %arg7[%c0_6, %c0_7] : memref<128x128xf32, #tpu.memory_space<vmem>>, vector<128x128xf32>
    tpu.vector_store %arg7[%c0_6, %c0_7], %7 {strides = array<i32>} : memref<128x128xf32, #tpu.memory_space<vmem>>, vector<128x128xf32>,
    %c0_i32_8 = arith.constant 0 : i32
    %9 = arith.cmpi eq, %arg2, %c0_i32_8 : i32
    %10 = arith.extui %9 : i1 to i32
    %c0_i32_9 = arith.constant 0 : i32
    %11 = arith.cmpi ne, %10, %c0_i32_9 : i32
    scf.if %11 {
      %c0_10 = arith.constant 0 : index
      %c0_11 = arith.constant 0 : index
      %12 = vector.load %arg7[%c0_10, %c0_11] : memref<128x128xf32, #tpu.memory_space<vmem>>, vector<128x128xf32>
      %c0_12 = arith.constant 0 : index
      %c0_13 = arith.constant 0 : index
      %13 = vector.load %arg5[%c0_12, %c0_13] : memref<1x128xf32, #tpu.memory_space<vmem>>, vector<1x128xf32>
      %14 = vector.broadcast %13 : vector<1x128xf32> to vector<128x128xf32>
      %15 = arith.addf %12, %14 : vector<128x128xf32>
      %cst_14 = arith.constant 0.000000e+00 : f32
      %16 = vector.broadcast %cst_14 : f32 to vector<128x128xf32>
      %17 = arith.maximumf %15, %16 : vector<128x128xf32>
      %18 = arith.truncf %17 : vector<128x128xf32> to vector<128x128xbf16>
      %c0_15 = arith.constant 0 : index
      %c0_16 = arith.constant 0 : index
      %19 = vector.load %arg6[%c0_15, %c0_16] : memref<128x128xbf16, #tpu.memory_space<vmem>>, vector<128x128xbf16>
      tpu.vector_store %arg6[%c0_15, %c0_16], %18 {strides = array<i32>} : memref<128x128xbf16, #tpu.memory_space<vmem>>, vector<128x128xbf16>,
    } else {
    }
    return
  }
  func.func @transform_0(%arg0: i32, %arg1: i32, %arg2: i32) -> (i32, i32) {
    %c0_i32 = arith.constant 0 : i32
    return %arg0, %arg2 : i32, i32
  }
  func.func @transform_1(%arg0: i32, %arg1: i32, %arg2: i32) -> (i32, i32) {
    %c0_i32 = arith.constant 0 : i32
    return %arg2, %arg1 : i32, i32
  }
  func.func @transform_2(%arg0: i32, %arg1: i32, %arg2: i32) -> (i32, i32) {
    %c0_i32 = arith.constant 0 : i32
    %c0_i32_0 = arith.constant 0 : i32
    return %c0_i32, %arg1 : i32, i32
  }
  func.func @transform_3(%arg0: i32, %arg1: i32, %arg2: i32) -> (i32, i32) {
    %c0_i32 = arith.constant 0 : i32
    return %arg0, %arg1 : i32, i32
  }
}

module attributes {stable_mosaic.version = 11 : i64} {
  func.func @_mm_bias_res_kernel(%arg0: i32, %arg1: i32, %arg2: i32, %arg3: memref<128x128xbf16, #tpu.memory_space<vmem>>, %arg4: memref<128x128xbf16, #tpu.memory_space<vmem>>, %arg5: memref<1x128xf32, #tpu.memory_space<vmem>>, %arg6: memref<128x128xbf16, #tpu.memory_space<vmem>>, %arg7: memref<128x128xbf16, #tpu.memory_space<vmem>>, %arg8: memref<128x128xf32, #tpu.memory_space<vmem>>) attributes {dimension_semantics = [#tpu.dimension_semantics<parallel>, #tpu.dimension_semantics<parallel>, #tpu.dimension_semantics<arbitrary>], iteration_bounds = array<i64: 1, 1, 1>, scalar_prefetch = 0 : i64, scratch_operands = 1 : i64, tpu.core_type = #tpu.core_type<tc>, window_params = [{transform_indices = @transform_0, window_bounds = array<i64: 128, 128>}, {transform_indices = @transform_1, window_bounds = array<i64: 128, 128>}, {transform_indices = @transform_2, window_bounds = array<i64: 1, 128>}, {transform_indices = @transform_3, window_bounds = array<i64: 128, 128>}, {transform_indices = @transform_4, window_bounds = array<i64: 128, 128>}]} {
    %c0_i32 = arith.constant 0 : i32
    %0 = arith.cmpi eq, %arg2, %c0_i32 : i32
    %1 = arith.extui %0 : i1 to i32
    %c0_i32_0 = arith.constant 0 : i32
    %2 = arith.cmpi ne, %1, %c0_i32_0 : i32
    scf.if %2 {
      %cst_10 = arith.constant 0.000000e+00 : f32
      %12 = vector.broadcast %cst_10 : f32 to vector<128x128xf32>
      %c0_11 = arith.constant 0 : index
      %c0_12 = arith.constant 0 : index
      %13 = vector.load %arg8[%c0_11, %c0_12] : memref<128x128xf32, #tpu.memory_space<vmem>>, vector<128x128xf32>
      tpu.vector_store %arg8[%c0_11, %c0_12], %12 {strides = array<i32>} : memref<128x128xf32, #tpu.memory_space<vmem>>, vector<128x128xf32>,
    } else {
    }
    %c0 = arith.constant 0 : index
    %c0_1 = arith.constant 0 : index
    %3 = vector.load %arg8[%c0, %c0_1] : memref<128x128xf32, #tpu.memory_space<vmem>>, vector<128x128xf32>
    %c0_2 = arith.constant 0 : index
    %c0_3 = arith.constant 0 : index
    %4 = vector.load %arg3[%c0_2, %c0_3] : memref<128x128xbf16, #tpu.memory_space<vmem>>, vector<128x128xbf16>
    %c0_4 = arith.constant 0 : index
    %c0_5 = arith.constant 0 : index
    %5 = vector.load %arg4[%c0_4, %c0_5] : memref<128x128xbf16, #tpu.memory_space<vmem>>, vector<128x128xbf16>
    %cst = arith.constant dense<0.000000e+00> : vector<128x128xf32>
    %6 = tpu.matmul %4, %5, %cst {dimension_numbers = #tpu.dot_dimension_numbers<[1], [0], [0], [1], [0, 0, 1, 1], [], []>} : vector<128x128xbf16>, vector<128x128xbf16>, vector<128x128xf32> -> vector<128x128xf32>
    %7 = arith.addf %3, %6 : vector<128x128xf32>
    %c0_6 = arith.constant 0 : index
    %c0_7 = arith.constant 0 : index
    %8 = vector.load %arg8[%c0_6, %c0_7] : memref<128x128xf32, #tpu.memory_space<vmem>>, vector<128x128xf32>
    tpu.vector_store %arg8[%c0_6, %c0_7], %7 {strides = array<i32>} : memref<128x128xf32, #tpu.memory_space<vmem>>, vector<128x128xf32>,
    %c0_i32_8 = arith.constant 0 : i32
    %9 = arith.cmpi eq, %arg2, %c0_i32_8 : i32
    %10 = arith.extui %9 : i1 to i32
    %c0_i32_9 = arith.constant 0 : i32
    %11 = arith.cmpi ne, %10, %c0_i32_9 : i32
    scf.if %11 {
      %c0_10 = arith.constant 0 : index
      %c0_11 = arith.constant 0 : index
      %12 = vector.load %arg8[%c0_10, %c0_11] : memref<128x128xf32, #tpu.memory_space<vmem>>, vector<128x128xf32>
      %c0_12 = arith.constant 0 : index
      %c0_13 = arith.constant 0 : index
      %13 = vector.load %arg5[%c0_12, %c0_13] : memref<1x128xf32, #tpu.memory_space<vmem>>, vector<1x128xf32>
      %14 = vector.broadcast %13 : vector<1x128xf32> to vector<128x128xf32>
      %15 = arith.addf %12, %14 : vector<128x128xf32>
      %c0_14 = arith.constant 0 : index
      %c0_15 = arith.constant 0 : index
      %16 = vector.load %arg6[%c0_14, %c0_15] : memref<128x128xbf16, #tpu.memory_space<vmem>>, vector<128x128xbf16>
      %17 = arith.extf %16 : vector<128x128xbf16> to vector<128x128xf32>
      %18 = arith.addf %15, %17 : vector<128x128xf32>
      %cst_16 = arith.constant 0.000000e+00 : f32
      %19 = vector.broadcast %cst_16 : f32 to vector<128x128xf32>
      %20 = arith.maximumf %18, %19 : vector<128x128xf32>
      %21 = arith.truncf %20 : vector<128x128xf32> to vector<128x128xbf16>
      %c0_17 = arith.constant 0 : index
      %c0_18 = arith.constant 0 : index
      %22 = vector.load %arg7[%c0_17, %c0_18] : memref<128x128xbf16, #tpu.memory_space<vmem>>, vector<128x128xbf16>
      tpu.vector_store %arg7[%c0_17, %c0_18], %21 {strides = array<i32>} : memref<128x128xbf16, #tpu.memory_space<vmem>>, vector<128x128xbf16>,
    } else {
    }
    return
  }
  func.func @transform_0(%arg0: i32, %arg1: i32, %arg2: i32) -> (i32, i32) {
    %c0_i32 = arith.constant 0 : i32
    return %arg0, %arg2 : i32, i32
  }
  func.func @transform_1(%arg0: i32, %arg1: i32, %arg2: i32) -> (i32, i32) {
    %c0_i32 = arith.constant 0 : i32
    return %arg2, %arg1 : i32, i32
  }
  func.func @transform_2(%arg0: i32, %arg1: i32, %arg2: i32) -> (i32, i32) {
    %c0_i32 = arith.constant 0 : i32
    %c0_i32_0 = arith.constant 0 : i32
    return %c0_i32, %arg1 : i32, i32
  }
  func.func @transform_3(%arg0: i32, %arg1: i32, %arg2: i32) -> (i32, i32) {
    %c0_i32 = arith.constant 0 : i32
    return %arg0, %arg1 : i32, i32
  }
  func.func @transform_4(%arg0: i32, %arg1: i32, %arg2: i32) -> (i32, i32) {
    %c0_i32 = arith.constant 0 : i32
    return %arg0, %arg1 : i32, i32
  }
}

module attributes {stable_mosaic.version = 11 : i64} {
  func.func @_mm_bias_kernel(%arg0: i32, %arg1: i32, %arg2: i32, %arg3: memref<128x128xbf16, #tpu.memory_space<vmem>>, %arg4: memref<128x128xbf16, #tpu.memory_space<vmem>>, %arg5: memref<1x128xf32, #tpu.memory_space<vmem>>, %arg6: memref<128x128xbf16, #tpu.memory_space<vmem>>, %arg7: memref<128x128xf32, #tpu.memory_space<vmem>>) attributes {dimension_semantics = [#tpu.dimension_semantics<parallel>, #tpu.dimension_semantics<parallel>, #tpu.dimension_semantics<arbitrary>], iteration_bounds = array<i64: 1, 1, 1>, scalar_prefetch = 0 : i64, scratch_operands = 1 : i64, tpu.core_type = #tpu.core_type<tc>, window_params = [{transform_indices = @transform_0, window_bounds = array<i64: 128, 128>}, {transform_indices = @transform_1, window_bounds = array<i64: 128, 128>}, {transform_indices = @transform_2, window_bounds = array<i64: 1, 128>}, {transform_indices = @transform_3, window_bounds = array<i64: 128, 128>}]} {
    %c0_i32 = arith.constant 0 : i32
    %0 = arith.cmpi eq, %arg2, %c0_i32 : i32
    %1 = arith.extui %0 : i1 to i32
    %c0_i32_0 = arith.constant 0 : i32
    %2 = arith.cmpi ne, %1, %c0_i32_0 : i32
    scf.if %2 {
      %cst_10 = arith.constant 0.000000e+00 : f32
      %12 = vector.broadcast %cst_10 : f32 to vector<128x128xf32>
      %c0_11 = arith.constant 0 : index
      %c0_12 = arith.constant 0 : index
      %13 = vector.load %arg7[%c0_11, %c0_12] : memref<128x128xf32, #tpu.memory_space<vmem>>, vector<128x128xf32>
      tpu.vector_store %arg7[%c0_11, %c0_12], %12 {strides = array<i32>} : memref<128x128xf32, #tpu.memory_space<vmem>>, vector<128x128xf32>,
    } else {
    }
    %c0 = arith.constant 0 : index
    %c0_1 = arith.constant 0 : index
    %3 = vector.load %arg7[%c0, %c0_1] : memref<128x128xf32, #tpu.memory_space<vmem>>, vector<128x128xf32>
    %c0_2 = arith.constant 0 : index
    %c0_3 = arith.constant 0 : index
    %4 = vector.load %arg3[%c0_2, %c0_3] : memref<128x128xbf16, #tpu.memory_space<vmem>>, vector<128x128xbf16>
    %c0_4 = arith.constant 0 : index
    %c0_5 = arith.constant 0 : index
    %5 = vector.load %arg4[%c0_4, %c0_5] : memref<128x128xbf16, #tpu.memory_space<vmem>>, vector<128x128xbf16>
    %cst = arith.constant dense<0.000000e+00> : vector<128x128xf32>
    %6 = tpu.matmul %4, %5, %cst {dimension_numbers = #tpu.dot_dimension_numbers<[1], [0], [0], [1], [0, 0, 1, 1], [], []>} : vector<128x128xbf16>, vector<128x128xbf16>, vector<128x128xf32> -> vector<128x128xf32>
    %7 = arith.addf %3, %6 : vector<128x128xf32>
    %c0_6 = arith.constant 0 : index
    %c0_7 = arith.constant 0 : index
    %8 = vector.load %arg7[%c0_6, %c0_7] : memref<128x128xf32, #tpu.memory_space<vmem>>, vector<128x128xf32>
    tpu.vector_store %arg7[%c0_6, %c0_7], %7 {strides = array<i32>} : memref<128x128xf32, #tpu.memory_space<vmem>>, vector<128x128xf32>,
    %c0_i32_8 = arith.constant 0 : i32
    %9 = arith.cmpi eq, %arg2, %c0_i32_8 : i32
    %10 = arith.extui %9 : i1 to i32
    %c0_i32_9 = arith.constant 0 : i32
    %11 = arith.cmpi ne, %10, %c0_i32_9 : i32
    scf.if %11 {
      %c0_10 = arith.constant 0 : index
      %c0_11 = arith.constant 0 : index
      %12 = vector.load %arg7[%c0_10, %c0_11] : memref<128x128xf32, #tpu.memory_space<vmem>>, vector<128x128xf32>
      %c0_12 = arith.constant 0 : index
      %c0_13 = arith.constant 0 : index
      %13 = vector.load %arg5[%c0_12, %c0_13] : memref<1x128xf32, #tpu.memory_space<vmem>>, vector<1x128xf32>
      %14 = vector.broadcast %13 : vector<1x128xf32> to vector<128x128xf32>
      %15 = arith.addf %12, %14 : vector<128x128xf32>
      %16 = arith.truncf %15 : vector<128x128xf32> to vector<128x128xbf16>
      %c0_14 = arith.constant 0 : index
      %c0_15 = arith.constant 0 : index
      %17 = vector.load %arg6[%c0_14, %c0_15] : memref<128x128xbf16, #tpu.memory_space<vmem>>, vector<128x128xbf16>
      tpu.vector_store %arg6[%c0_14, %c0_15], %16 {strides = array<i32>} : memref<128x128xbf16, #tpu.memory_space<vmem>>, vector<128x128xbf16>,
    } else {
    }
    return
  }
  func.func @transform_0(%arg0: i32, %arg1: i32, %arg2: i32) -> (i32, i32) {
    %c0_i32 = arith.constant 0 : i32
    return %arg0, %arg2 : i32, i32
  }
  func.func @transform_1(%arg0: i32, %arg1: i32, %arg2: i32) -> (i32, i32) {
    %c0_i32 = arith.constant 0 : i32
    return %arg2, %arg1 : i32, i32
  }
  func.func @transform_2(%arg0: i32, %arg1: i32, %arg2: i32) -> (i32, i32) {
    %c0_i32 = arith.constant 0 : i32
    %c0_i32_0 = arith.constant 0 : i32
    return %c0_i32, %arg1 : i32, i32
  }
  func.func @transform_3(%arg0: i32, %arg1: i32, %arg2: i32) -> (i32, i32) {
    %c0_i32 = arith.constant 0 : i32
    return %arg0, %arg1 : i32, i32
  }
}

module attributes {stable_mosaic.version = 11 : i64} {
  func.func @_mm_bias_kernel(%arg0: i32, %arg1: i32, %arg2: i32, %arg3: memref<32x256xbf16, #tpu.memory_space<vmem>>, %arg4: memref<256x128xbf16, #tpu.memory_space<vmem>>, %arg5: memref<1x128xf32, #tpu.memory_space<vmem>>, %arg6: memref<32x128xbf16, #tpu.memory_space<vmem>>, %arg7: memref<32x128xf32, #tpu.memory_space<vmem>>) attributes {dimension_semantics = [#tpu.dimension_semantics<parallel>, #tpu.dimension_semantics<parallel>, #tpu.dimension_semantics<arbitrary>], iteration_bounds = array<i64: 1, 1, 1>, scalar_prefetch = 0 : i64, scratch_operands = 1 : i64, tpu.core_type = #tpu.core_type<tc>, window_params = [{transform_indices = @transform_0, window_bounds = array<i64: 32, 256>}, {transform_indices = @transform_1, window_bounds = array<i64: 256, 128>}, {transform_indices = @transform_2, window_bounds = array<i64: 1, 128>}, {transform_indices = @transform_3, window_bounds = array<i64: 32, 128>}]} {
    %c0_i32 = arith.constant 0 : i32
    %0 = arith.cmpi eq, %arg2, %c0_i32 : i32
    %1 = arith.extui %0 : i1 to i32
    %c0_i32_0 = arith.constant 0 : i32
    %2 = arith.cmpi ne, %1, %c0_i32_0 : i32
    scf.if %2 {
      %cst_10 = arith.constant 0.000000e+00 : f32
      %12 = vector.broadcast %cst_10 : f32 to vector<32x128xf32>
      %c0_11 = arith.constant 0 : index
      %c0_12 = arith.constant 0 : index
      %13 = vector.load %arg7[%c0_11, %c0_12] : memref<32x128xf32, #tpu.memory_space<vmem>>, vector<32x128xf32>
      tpu.vector_store %arg7[%c0_11, %c0_12], %12 {strides = array<i32>} : memref<32x128xf32, #tpu.memory_space<vmem>>, vector<32x128xf32>,
    } else {
    }
    %c0 = arith.constant 0 : index
    %c0_1 = arith.constant 0 : index
    %3 = vector.load %arg7[%c0, %c0_1] : memref<32x128xf32, #tpu.memory_space<vmem>>, vector<32x128xf32>
    %c0_2 = arith.constant 0 : index
    %c0_3 = arith.constant 0 : index
    %4 = vector.load %arg3[%c0_2, %c0_3] : memref<32x256xbf16, #tpu.memory_space<vmem>>, vector<32x256xbf16>
    %c0_4 = arith.constant 0 : index
    %c0_5 = arith.constant 0 : index
    %5 = vector.load %arg4[%c0_4, %c0_5] : memref<256x128xbf16, #tpu.memory_space<vmem>>, vector<256x128xbf16>
    %cst = arith.constant dense<0.000000e+00> : vector<32x128xf32>
    %6 = tpu.matmul %4, %5, %cst {dimension_numbers = #tpu.dot_dimension_numbers<[1], [0], [0], [1], [0, 0, 1, 1], [], []>} : vector<32x256xbf16>, vector<256x128xbf16>, vector<32x128xf32> -> vector<32x128xf32>
    %7 = arith.addf %3, %6 : vector<32x128xf32>
    %c0_6 = arith.constant 0 : index
    %c0_7 = arith.constant 0 : index
    %8 = vector.load %arg7[%c0_6, %c0_7] : memref<32x128xf32, #tpu.memory_space<vmem>>, vector<32x128xf32>
    tpu.vector_store %arg7[%c0_6, %c0_7], %7 {strides = array<i32>} : memref<32x128xf32, #tpu.memory_space<vmem>>, vector<32x128xf32>,
    %c0_i32_8 = arith.constant 0 : i32
    %9 = arith.cmpi eq, %arg2, %c0_i32_8 : i32
    %10 = arith.extui %9 : i1 to i32
    %c0_i32_9 = arith.constant 0 : i32
    %11 = arith.cmpi ne, %10, %c0_i32_9 : i32
    scf.if %11 {
      %c0_10 = arith.constant 0 : index
      %c0_11 = arith.constant 0 : index
      %12 = vector.load %arg7[%c0_10, %c0_11] : memref<32x128xf32, #tpu.memory_space<vmem>>, vector<32x128xf32>
      %c0_12 = arith.constant 0 : index
      %c0_13 = arith.constant 0 : index
      %13 = vector.load %arg5[%c0_12, %c0_13] : memref<1x128xf32, #tpu.memory_space<vmem>>, vector<1x128xf32>
      %14 = vector.broadcast %13 : vector<1x128xf32> to vector<32x128xf32>
      %15 = arith.addf %12, %14 : vector<32x128xf32>
      %cst_14 = arith.constant 0.000000e+00 : f32
      %16 = vector.broadcast %cst_14 : f32 to vector<32x128xf32>
      %17 = arith.maximumf %15, %16 : vector<32x128xf32>
      %18 = arith.truncf %17 : vector<32x128xf32> to vector<32x128xbf16>
      %c0_15 = arith.constant 0 : index
      %c0_16 = arith.constant 0 : index
      %19 = vector.load %arg6[%c0_15, %c0_16] : memref<32x128xbf16, #tpu.memory_space<vmem>>, vector<32x128xbf16>
      tpu.vector_store %arg6[%c0_15, %c0_16], %18 {strides = array<i32>} : memref<32x128xbf16, #tpu.memory_space<vmem>>, vector<32x128xbf16>,
    } else {
    }
    return
  }
  func.func @transform_0(%arg0: i32, %arg1: i32, %arg2: i32) -> (i32, i32) {
    %c0_i32 = arith.constant 0 : i32
    return %arg0, %arg2 : i32, i32
  }
  func.func @transform_1(%arg0: i32, %arg1: i32, %arg2: i32) -> (i32, i32) {
    %c0_i32 = arith.constant 0 : i32
    return %arg2, %arg1 : i32, i32
  }
  func.func @transform_2(%arg0: i32, %arg1: i32, %arg2: i32) -> (i32, i32) {
    %c0_i32 = arith.constant 0 : i32
    %c0_i32_0 = arith.constant 0 : i32
    return %c0_i32, %arg1 : i32, i32
  }
  func.func @transform_3(%arg0: i32, %arg1: i32, %arg2: i32) -> (i32, i32) {
    %c0_i32 = arith.constant 0 : i32
    return %arg0, %arg1 : i32, i32
  }
}

module attributes {stable_mosaic.version = 11 : i64} {
  func.func @_mm_bias_res_kernel(%arg0: i32, %arg1: i32, %arg2: i32, %arg3: memref<32x128xbf16, #tpu.memory_space<vmem>>, %arg4: memref<128x128xbf16, #tpu.memory_space<vmem>>, %arg5: memref<1x128xf32, #tpu.memory_space<vmem>>, %arg6: memref<32x128xbf16, #tpu.memory_space<vmem>>, %arg7: memref<32x128xbf16, #tpu.memory_space<vmem>>, %arg8: memref<32x128xf32, #tpu.memory_space<vmem>>) attributes {dimension_semantics = [#tpu.dimension_semantics<parallel>, #tpu.dimension_semantics<parallel>, #tpu.dimension_semantics<arbitrary>], iteration_bounds = array<i64: 1, 1, 1>, scalar_prefetch = 0 : i64, scratch_operands = 1 : i64, tpu.core_type = #tpu.core_type<tc>, window_params = [{transform_indices = @transform_0, window_bounds = array<i64: 32, 128>}, {transform_indices = @transform_1, window_bounds = array<i64: 128, 128>}, {transform_indices = @transform_2, window_bounds = array<i64: 1, 128>}, {transform_indices = @transform_3, window_bounds = array<i64: 32, 128>}, {transform_indices = @transform_4, window_bounds = array<i64: 32, 128>}]} {
    %c0_i32 = arith.constant 0 : i32
    %0 = arith.cmpi eq, %arg2, %c0_i32 : i32
    %1 = arith.extui %0 : i1 to i32
    %c0_i32_0 = arith.constant 0 : i32
    %2 = arith.cmpi ne, %1, %c0_i32_0 : i32
    scf.if %2 {
      %cst_10 = arith.constant 0.000000e+00 : f32
      %12 = vector.broadcast %cst_10 : f32 to vector<32x128xf32>
      %c0_11 = arith.constant 0 : index
      %c0_12 = arith.constant 0 : index
      %13 = vector.load %arg8[%c0_11, %c0_12] : memref<32x128xf32, #tpu.memory_space<vmem>>, vector<32x128xf32>
      tpu.vector_store %arg8[%c0_11, %c0_12], %12 {strides = array<i32>} : memref<32x128xf32, #tpu.memory_space<vmem>>, vector<32x128xf32>,
    } else {
    }
    %c0 = arith.constant 0 : index
    %c0_1 = arith.constant 0 : index
    %3 = vector.load %arg8[%c0, %c0_1] : memref<32x128xf32, #tpu.memory_space<vmem>>, vector<32x128xf32>
    %c0_2 = arith.constant 0 : index
    %c0_3 = arith.constant 0 : index
    %4 = vector.load %arg3[%c0_2, %c0_3] : memref<32x128xbf16, #tpu.memory_space<vmem>>, vector<32x128xbf16>
    %c0_4 = arith.constant 0 : index
    %c0_5 = arith.constant 0 : index
    %5 = vector.load %arg4[%c0_4, %c0_5] : memref<128x128xbf16, #tpu.memory_space<vmem>>, vector<128x128xbf16>
    %cst = arith.constant dense<0.000000e+00> : vector<32x128xf32>
    %6 = tpu.matmul %4, %5, %cst {dimension_numbers = #tpu.dot_dimension_numbers<[1], [0], [0], [1], [0, 0, 1, 1], [], []>} : vector<32x128xbf16>, vector<128x128xbf16>, vector<32x128xf32> -> vector<32x128xf32>
    %7 = arith.addf %3, %6 : vector<32x128xf32>
    %c0_6 = arith.constant 0 : index
    %c0_7 = arith.constant 0 : index
    %8 = vector.load %arg8[%c0_6, %c0_7] : memref<32x128xf32, #tpu.memory_space<vmem>>, vector<32x128xf32>
    tpu.vector_store %arg8[%c0_6, %c0_7], %7 {strides = array<i32>} : memref<32x128xf32, #tpu.memory_space<vmem>>, vector<32x128xf32>,
    %c0_i32_8 = arith.constant 0 : i32
    %9 = arith.cmpi eq, %arg2, %c0_i32_8 : i32
    %10 = arith.extui %9 : i1 to i32
    %c0_i32_9 = arith.constant 0 : i32
    %11 = arith.cmpi ne, %10, %c0_i32_9 : i32
    scf.if %11 {
      %c0_10 = arith.constant 0 : index
      %c0_11 = arith.constant 0 : index
      %12 = vector.load %arg8[%c0_10, %c0_11] : memref<32x128xf32, #tpu.memory_space<vmem>>, vector<32x128xf32>
      %c0_12 = arith.constant 0 : index
      %c0_13 = arith.constant 0 : index
      %13 = vector.load %arg5[%c0_12, %c0_13] : memref<1x128xf32, #tpu.memory_space<vmem>>, vector<1x128xf32>
      %14 = vector.broadcast %13 : vector<1x128xf32> to vector<32x128xf32>
      %15 = arith.addf %12, %14 : vector<32x128xf32>
      %c0_14 = arith.constant 0 : index
      %c0_15 = arith.constant 0 : index
      %16 = vector.load %arg6[%c0_14, %c0_15] : memref<32x128xbf16, #tpu.memory_space<vmem>>, vector<32x128xbf16>
      %17 = arith.extf %16 : vector<32x128xbf16> to vector<32x128xf32>
      %18 = arith.addf %15, %17 : vector<32x128xf32>
      %cst_16 = arith.constant 0.000000e+00 : f32
      %19 = vector.broadcast %cst_16 : f32 to vector<32x128xf32>
      %20 = arith.maximumf %18, %19 : vector<32x128xf32>
      %21 = arith.truncf %20 : vector<32x128xf32> to vector<32x128xbf16>
      %c0_17 = arith.constant 0 : index
      %c0_18 = arith.constant 0 : index
      %22 = vector.load %arg7[%c0_17, %c0_18] : memref<32x128xbf16, #tpu.memory_space<vmem>>, vector<32x128xbf16>
      tpu.vector_store %arg7[%c0_17, %c0_18], %21 {strides = array<i32>} : memref<32x128xbf16, #tpu.memory_space<vmem>>, vector<32x128xbf16>,
    } else {
    }
    return
  }
  func.func @transform_0(%arg0: i32, %arg1: i32, %arg2: i32) -> (i32, i32) {
    %c0_i32 = arith.constant 0 : i32
    return %arg0, %arg2 : i32, i32
  }
  func.func @transform_1(%arg0: i32, %arg1: i32, %arg2: i32) -> (i32, i32) {
    %c0_i32 = arith.constant 0 : i32
    return %arg2, %arg1 : i32, i32
  }
  func.func @transform_2(%arg0: i32, %arg1: i32, %arg2: i32) -> (i32, i32) {
    %c0_i32 = arith.constant 0 : i32
    %c0_i32_0 = arith.constant 0 : i32
    return %c0_i32, %arg1 : i32, i32
  }
  func.func @transform_3(%arg0: i32, %arg1: i32, %arg2: i32) -> (i32, i32) {
    %c0_i32 = arith.constant 0 : i32
    return %arg0, %arg1 : i32, i32
  }
  func.func @transform_4(%arg0: i32, %arg1: i32, %arg2: i32) -> (i32, i32) {
    %c0_i32 = arith.constant 0 : i32
    return %arg0, %arg1 : i32, i32
  }
}

module attributes {stable_mosaic.version = 11 : i64} {
  func.func @_mm_bias_kernel(%arg0: i32, %arg1: i32, %arg2: i32, %arg3: memref<32x128xbf16, #tpu.memory_space<vmem>>, %arg4: memref<128x128xbf16, #tpu.memory_space<vmem>>, %arg5: memref<1x128xf32, #tpu.memory_space<vmem>>, %arg6: memref<32x128xbf16, #tpu.memory_space<vmem>>, %arg7: memref<32x128xf32, #tpu.memory_space<vmem>>) attributes {dimension_semantics = [#tpu.dimension_semantics<parallel>, #tpu.dimension_semantics<parallel>, #tpu.dimension_semantics<arbitrary>], iteration_bounds = array<i64: 1, 1, 1>, scalar_prefetch = 0 : i64, scratch_operands = 1 : i64, tpu.core_type = #tpu.core_type<tc>, window_params = [{transform_indices = @transform_0, window_bounds = array<i64: 32, 128>}, {transform_indices = @transform_1, window_bounds = array<i64: 128, 128>}, {transform_indices = @transform_2, window_bounds = array<i64: 1, 128>}, {transform_indices = @transform_3, window_bounds = array<i64: 32, 128>}]} {
    %c0_i32 = arith.constant 0 : i32
    %0 = arith.cmpi eq, %arg2, %c0_i32 : i32
    %1 = arith.extui %0 : i1 to i32
    %c0_i32_0 = arith.constant 0 : i32
    %2 = arith.cmpi ne, %1, %c0_i32_0 : i32
    scf.if %2 {
      %cst_10 = arith.constant 0.000000e+00 : f32
      %12 = vector.broadcast %cst_10 : f32 to vector<32x128xf32>
      %c0_11 = arith.constant 0 : index
      %c0_12 = arith.constant 0 : index
      %13 = vector.load %arg7[%c0_11, %c0_12] : memref<32x128xf32, #tpu.memory_space<vmem>>, vector<32x128xf32>
      tpu.vector_store %arg7[%c0_11, %c0_12], %12 {strides = array<i32>} : memref<32x128xf32, #tpu.memory_space<vmem>>, vector<32x128xf32>,
    } else {
    }
    %c0 = arith.constant 0 : index
    %c0_1 = arith.constant 0 : index
    %3 = vector.load %arg7[%c0, %c0_1] : memref<32x128xf32, #tpu.memory_space<vmem>>, vector<32x128xf32>
    %c0_2 = arith.constant 0 : index
    %c0_3 = arith.constant 0 : index
    %4 = vector.load %arg3[%c0_2, %c0_3] : memref<32x128xbf16, #tpu.memory_space<vmem>>, vector<32x128xbf16>
    %c0_4 = arith.constant 0 : index
    %c0_5 = arith.constant 0 : index
    %5 = vector.load %arg4[%c0_4, %c0_5] : memref<128x128xbf16, #tpu.memory_space<vmem>>, vector<128x128xbf16>
    %cst = arith.constant dense<0.000000e+00> : vector<32x128xf32>
    %6 = tpu.matmul %4, %5, %cst {dimension_numbers = #tpu.dot_dimension_numbers<[1], [0], [0], [1], [0, 0, 1, 1], [], []>} : vector<32x128xbf16>, vector<128x128xbf16>, vector<32x128xf32> -> vector<32x128xf32>
    %7 = arith.addf %3, %6 : vector<32x128xf32>
    %c0_6 = arith.constant 0 : index
    %c0_7 = arith.constant 0 : index
    %8 = vector.load %arg7[%c0_6, %c0_7] : memref<32x128xf32, #tpu.memory_space<vmem>>, vector<32x128xf32>
    tpu.vector_store %arg7[%c0_6, %c0_7], %7 {strides = array<i32>} : memref<32x128xf32, #tpu.memory_space<vmem>>, vector<32x128xf32>,
    %c0_i32_8 = arith.constant 0 : i32
    %9 = arith.cmpi eq, %arg2, %c0_i32_8 : i32
    %10 = arith.extui %9 : i1 to i32
    %c0_i32_9 = arith.constant 0 : i32
    %11 = arith.cmpi ne, %10, %c0_i32_9 : i32
    scf.if %11 {
      %c0_10 = arith.constant 0 : index
      %c0_11 = arith.constant 0 : index
      %12 = vector.load %arg7[%c0_10, %c0_11] : memref<32x128xf32, #tpu.memory_space<vmem>>, vector<32x128xf32>
      %c0_12 = arith.constant 0 : index
      %c0_13 = arith.constant 0 : index
      %13 = vector.load %arg5[%c0_12, %c0_13] : memref<1x128xf32, #tpu.memory_space<vmem>>, vector<1x128xf32>
      %14 = vector.broadcast %13 : vector<1x128xf32> to vector<32x128xf32>
      %15 = arith.addf %12, %14 : vector<32x128xf32>
      %cst_14 = arith.constant 0.000000e+00 : f32
      %16 = vector.broadcast %cst_14 : f32 to vector<32x128xf32>
      %17 = arith.maximumf %15, %16 : vector<32x128xf32>
      %18 = arith.truncf %17 : vector<32x128xf32> to vector<32x128xbf16>
      %c0_15 = arith.constant 0 : index
      %c0_16 = arith.constant 0 : index
      %19 = vector.load %arg6[%c0_15, %c0_16] : memref<32x128xbf16, #tpu.memory_space<vmem>>, vector<32x128xbf16>
      tpu.vector_store %arg6[%c0_15, %c0_16], %18 {strides = array<i32>} : memref<32x128xbf16, #tpu.memory_space<vmem>>, vector<32x128xbf16>,
    } else {
    }
    return
  }
  func.func @transform_0(%arg0: i32, %arg1: i32, %arg2: i32) -> (i32, i32) {
    %c0_i32 = arith.constant 0 : i32
    return %arg0, %arg2 : i32, i32
  }
  func.func @transform_1(%arg0: i32, %arg1: i32, %arg2: i32) -> (i32, i32) {
    %c0_i32 = arith.constant 0 : i32
    return %arg2, %arg1 : i32, i32
  }
  func.func @transform_2(%arg0: i32, %arg1: i32, %arg2: i32) -> (i32, i32) {
    %c0_i32 = arith.constant 0 : i32
    %c0_i32_0 = arith.constant 0 : i32
    return %c0_i32, %arg1 : i32, i32
  }
  func.func @transform_3(%arg0: i32, %arg1: i32, %arg2: i32) -> (i32, i32) {
    %c0_i32 = arith.constant 0 : i32
    return %arg0, %arg1 : i32, i32
  }
}

module attributes {stable_mosaic.version = 11 : i64} {
  func.func @_mm_bias_kernel(%arg0: i32, %arg1: i32, %arg2: i32, %arg3: memref<32x128xbf16, #tpu.memory_space<vmem>>, %arg4: memref<128x128xbf16, #tpu.memory_space<vmem>>, %arg5: memref<1x128xf32, #tpu.memory_space<vmem>>, %arg6: memref<32x128xbf16, #tpu.memory_space<vmem>>, %arg7: memref<32x128xf32, #tpu.memory_space<vmem>>) attributes {dimension_semantics = [#tpu.dimension_semantics<parallel>, #tpu.dimension_semantics<parallel>, #tpu.dimension_semantics<arbitrary>], iteration_bounds = array<i64: 1, 1, 1>, scalar_prefetch = 0 : i64, scratch_operands = 1 : i64, tpu.core_type = #tpu.core_type<tc>, window_params = [{transform_indices = @transform_0, window_bounds = array<i64: 32, 128>}, {transform_indices = @transform_1, window_bounds = array<i64: 128, 128>}, {transform_indices = @transform_2, window_bounds = array<i64: 1, 128>}, {transform_indices = @transform_3, window_bounds = array<i64: 32, 128>}]} {
    %c0_i32 = arith.constant 0 : i32
    %0 = arith.cmpi eq, %arg2, %c0_i32 : i32
    %1 = arith.extui %0 : i1 to i32
    %c0_i32_0 = arith.constant 0 : i32
    %2 = arith.cmpi ne, %1, %c0_i32_0 : i32
    scf.if %2 {
      %cst_10 = arith.constant 0.000000e+00 : f32
      %12 = vector.broadcast %cst_10 : f32 to vector<32x128xf32>
      %c0_11 = arith.constant 0 : index
      %c0_12 = arith.constant 0 : index
      %13 = vector.load %arg7[%c0_11, %c0_12] : memref<32x128xf32, #tpu.memory_space<vmem>>, vector<32x128xf32>
      tpu.vector_store %arg7[%c0_11, %c0_12], %12 {strides = array<i32>} : memref<32x128xf32, #tpu.memory_space<vmem>>, vector<32x128xf32>,
    } else {
    }
    %c0 = arith.constant 0 : index
    %c0_1 = arith.constant 0 : index
    %3 = vector.load %arg7[%c0, %c0_1] : memref<32x128xf32, #tpu.memory_space<vmem>>, vector<32x128xf32>
    %c0_2 = arith.constant 0 : index
    %c0_3 = arith.constant 0 : index
    %4 = vector.load %arg3[%c0_2, %c0_3] : memref<32x128xbf16, #tpu.memory_space<vmem>>, vector<32x128xbf16>
    %c0_4 = arith.constant 0 : index
    %c0_5 = arith.constant 0 : index
    %5 = vector.load %arg4[%c0_4, %c0_5] : memref<128x128xbf16, #tpu.memory_space<vmem>>, vector<128x128xbf16>
    %cst = arith.constant dense<0.000000e+00> : vector<32x128xf32>
    %6 = tpu.matmul %4, %5, %cst {dimension_numbers = #tpu.dot_dimension_numbers<[1], [0], [0], [1], [0, 0, 1, 1], [], []>} : vector<32x128xbf16>, vector<128x128xbf16>, vector<32x128xf32> -> vector<32x128xf32>
    %7 = arith.addf %3, %6 : vector<32x128xf32>
    %c0_6 = arith.constant 0 : index
    %c0_7 = arith.constant 0 : index
    %8 = vector.load %arg7[%c0_6, %c0_7] : memref<32x128xf32, #tpu.memory_space<vmem>>, vector<32x128xf32>
    tpu.vector_store %arg7[%c0_6, %c0_7], %7 {strides = array<i32>} : memref<32x128xf32, #tpu.memory_space<vmem>>, vector<32x128xf32>,
    %c0_i32_8 = arith.constant 0 : i32
    %9 = arith.cmpi eq, %arg2, %c0_i32_8 : i32
    %10 = arith.extui %9 : i1 to i32
    %c0_i32_9 = arith.constant 0 : i32
    %11 = arith.cmpi ne, %10, %c0_i32_9 : i32
    scf.if %11 {
      %c0_10 = arith.constant 0 : index
      %c0_11 = arith.constant 0 : index
      %12 = vector.load %arg7[%c0_10, %c0_11] : memref<32x128xf32, #tpu.memory_space<vmem>>, vector<32x128xf32>
      %c0_12 = arith.constant 0 : index
      %c0_13 = arith.constant 0 : index
      %13 = vector.load %arg5[%c0_12, %c0_13] : memref<1x128xf32, #tpu.memory_space<vmem>>, vector<1x128xf32>
      %14 = vector.broadcast %13 : vector<1x128xf32> to vector<32x128xf32>
      %15 = arith.addf %12, %14 : vector<32x128xf32>
      %16 = arith.truncf %15 : vector<32x128xf32> to vector<32x128xbf16>
      %c0_14 = arith.constant 0 : index
      %c0_15 = arith.constant 0 : index
      %17 = vector.load %arg6[%c0_14, %c0_15] : memref<32x128xbf16, #tpu.memory_space<vmem>>, vector<32x128xbf16>
      tpu.vector_store %arg6[%c0_14, %c0_15], %16 {strides = array<i32>} : memref<32x128xbf16, #tpu.memory_space<vmem>>, vector<32x128xbf16>,
    } else {
    }
    return
  }
  func.func @transform_0(%arg0: i32, %arg1: i32, %arg2: i32) -> (i32, i32) {
    %c0_i32 = arith.constant 0 : i32
    return %arg0, %arg2 : i32, i32
  }
  func.func @transform_1(%arg0: i32, %arg1: i32, %arg2: i32) -> (i32, i32) {
    %c0_i32 = arith.constant 0 : i32
    return %arg2, %arg1 : i32, i32
  }
  func.func @transform_2(%arg0: i32, %arg1: i32, %arg2: i32) -> (i32, i32) {
    %c0_i32 = arith.constant 0 : i32
    %c0_i32_0 = arith.constant 0 : i32
    return %c0_i32, %arg1 : i32, i32
  }
  func.func @transform_3(%arg0: i32, %arg1: i32, %arg2: i32) -> (i32, i32) {
    %c0_i32 = arith.constant 0 : i32
    return %arg0, %arg1 : i32, i32
  }
}

module attributes {stable_mosaic.version = 11 : i64} {
  func.func @_mm_bias_kernel(%arg0: i32, %arg1: i32, %arg2: i32, %arg3: memref<8x384xbf16, #tpu.memory_space<vmem>>, %arg4: memref<384x128xbf16, #tpu.memory_space<vmem>>, %arg5: memref<1x128xf32, #tpu.memory_space<vmem>>, %arg6: memref<8x128xbf16, #tpu.memory_space<vmem>>, %arg7: memref<8x128xf32, #tpu.memory_space<vmem>>) attributes {dimension_semantics = [#tpu.dimension_semantics<parallel>, #tpu.dimension_semantics<parallel>, #tpu.dimension_semantics<arbitrary>], iteration_bounds = array<i64: 1, 1, 1>, scalar_prefetch = 0 : i64, scratch_operands = 1 : i64, tpu.core_type = #tpu.core_type<tc>, window_params = [{transform_indices = @transform_0, window_bounds = array<i64: 8, 384>}, {transform_indices = @transform_1, window_bounds = array<i64: 384, 128>}, {transform_indices = @transform_2, window_bounds = array<i64: 1, 128>}, {transform_indices = @transform_3, window_bounds = array<i64: 8, 128>}]} {
    %c0_i32 = arith.constant 0 : i32
    %0 = arith.cmpi eq, %arg2, %c0_i32 : i32
    %1 = arith.extui %0 : i1 to i32
    %c0_i32_0 = arith.constant 0 : i32
    %2 = arith.cmpi ne, %1, %c0_i32_0 : i32
    scf.if %2 {
      %cst_10 = arith.constant 0.000000e+00 : f32
      %12 = vector.broadcast %cst_10 : f32 to vector<8x128xf32>
      %c0_11 = arith.constant 0 : index
      %c0_12 = arith.constant 0 : index
      %13 = vector.load %arg7[%c0_11, %c0_12] : memref<8x128xf32, #tpu.memory_space<vmem>>, vector<8x128xf32>
      tpu.vector_store %arg7[%c0_11, %c0_12], %12 {strides = array<i32>} : memref<8x128xf32, #tpu.memory_space<vmem>>, vector<8x128xf32>,
    } else {
    }
    %c0 = arith.constant 0 : index
    %c0_1 = arith.constant 0 : index
    %3 = vector.load %arg7[%c0, %c0_1] : memref<8x128xf32, #tpu.memory_space<vmem>>, vector<8x128xf32>
    %c0_2 = arith.constant 0 : index
    %c0_3 = arith.constant 0 : index
    %4 = vector.load %arg3[%c0_2, %c0_3] : memref<8x384xbf16, #tpu.memory_space<vmem>>, vector<8x384xbf16>
    %c0_4 = arith.constant 0 : index
    %c0_5 = arith.constant 0 : index
    %5 = vector.load %arg4[%c0_4, %c0_5] : memref<384x128xbf16, #tpu.memory_space<vmem>>, vector<384x128xbf16>
    %cst = arith.constant dense<0.000000e+00> : vector<8x128xf32>
    %6 = tpu.matmul %4, %5, %cst {dimension_numbers = #tpu.dot_dimension_numbers<[1], [0], [0], [1], [0, 0, 1, 1], [], []>} : vector<8x384xbf16>, vector<384x128xbf16>, vector<8x128xf32> -> vector<8x128xf32>
    %7 = arith.addf %3, %6 : vector<8x128xf32>
    %c0_6 = arith.constant 0 : index
    %c0_7 = arith.constant 0 : index
    %8 = vector.load %arg7[%c0_6, %c0_7] : memref<8x128xf32, #tpu.memory_space<vmem>>, vector<8x128xf32>
    tpu.vector_store %arg7[%c0_6, %c0_7], %7 {strides = array<i32>} : memref<8x128xf32, #tpu.memory_space<vmem>>, vector<8x128xf32>,
    %c0_i32_8 = arith.constant 0 : i32
    %9 = arith.cmpi eq, %arg2, %c0_i32_8 : i32
    %10 = arith.extui %9 : i1 to i32
    %c0_i32_9 = arith.constant 0 : i32
    %11 = arith.cmpi ne, %10, %c0_i32_9 : i32
    scf.if %11 {
      %c0_10 = arith.constant 0 : index
      %c0_11 = arith.constant 0 : index
      %12 = vector.load %arg7[%c0_10, %c0_11] : memref<8x128xf32, #tpu.memory_space<vmem>>, vector<8x128xf32>
      %c0_12 = arith.constant 0 : index
      %c0_13 = arith.constant 0 : index
      %13 = vector.load %arg5[%c0_12, %c0_13] : memref<1x128xf32, #tpu.memory_space<vmem>>, vector<1x128xf32>
      %14 = vector.broadcast %13 : vector<1x128xf32> to vector<8x128xf32>
      %15 = arith.addf %12, %14 : vector<8x128xf32>
      %cst_14 = arith.constant 0.000000e+00 : f32
      %16 = vector.broadcast %cst_14 : f32 to vector<8x128xf32>
      %17 = arith.maximumf %15, %16 : vector<8x128xf32>
      %18 = arith.truncf %17 : vector<8x128xf32> to vector<8x128xbf16>
      %c0_15 = arith.constant 0 : index
      %c0_16 = arith.constant 0 : index
      %19 = vector.load %arg6[%c0_15, %c0_16] : memref<8x128xbf16, #tpu.memory_space<vmem>>, vector<8x128xbf16>
      tpu.vector_store %arg6[%c0_15, %c0_16], %18 {strides = array<i32>} : memref<8x128xbf16, #tpu.memory_space<vmem>>, vector<8x128xbf16>,
    } else {
    }
    return
  }
  func.func @transform_0(%arg0: i32, %arg1: i32, %arg2: i32) -> (i32, i32) {
    %c0_i32 = arith.constant 0 : i32
    return %arg0, %arg2 : i32, i32
  }
  func.func @transform_1(%arg0: i32, %arg1: i32, %arg2: i32) -> (i32, i32) {
    %c0_i32 = arith.constant 0 : i32
    return %arg2, %arg1 : i32, i32
  }
  func.func @transform_2(%arg0: i32, %arg1: i32, %arg2: i32) -> (i32, i32) {
    %c0_i32 = arith.constant 0 : i32
    %c0_i32_0 = arith.constant 0 : i32
    return %c0_i32, %arg1 : i32, i32
  }
  func.func @transform_3(%arg0: i32, %arg1: i32, %arg2: i32) -> (i32, i32) {
    %c0_i32 = arith.constant 0 : i32
    return %arg0, %arg1 : i32, i32
  }
}

module attributes {stable_mosaic.version = 11 : i64} {
  func.func @_mm_bias_kernel(%arg0: i32, %arg1: i32, %arg2: i32, %arg3: memref<8x128xbf16, #tpu.memory_space<vmem>>, %arg4: memref<128x128xbf16, #tpu.memory_space<vmem>>, %arg5: memref<1x128xf32, #tpu.memory_space<vmem>>, %arg6: memref<8x128xbf16, #tpu.memory_space<vmem>>, %arg7: memref<8x128xf32, #tpu.memory_space<vmem>>) attributes {dimension_semantics = [#tpu.dimension_semantics<parallel>, #tpu.dimension_semantics<parallel>, #tpu.dimension_semantics<arbitrary>], iteration_bounds = array<i64: 1, 1, 1>, scalar_prefetch = 0 : i64, scratch_operands = 1 : i64, tpu.core_type = #tpu.core_type<tc>, window_params = [{transform_indices = @transform_0, window_bounds = array<i64: 8, 128>}, {transform_indices = @transform_1, window_bounds = array<i64: 128, 128>}, {transform_indices = @transform_2, window_bounds = array<i64: 1, 128>}, {transform_indices = @transform_3, window_bounds = array<i64: 8, 128>}]} {
    %c0_i32 = arith.constant 0 : i32
    %0 = arith.cmpi eq, %arg2, %c0_i32 : i32
    %1 = arith.extui %0 : i1 to i32
    %c0_i32_0 = arith.constant 0 : i32
    %2 = arith.cmpi ne, %1, %c0_i32_0 : i32
    scf.if %2 {
      %cst_10 = arith.constant 0.000000e+00 : f32
      %12 = vector.broadcast %cst_10 : f32 to vector<8x128xf32>
      %c0_11 = arith.constant 0 : index
      %c0_12 = arith.constant 0 : index
      %13 = vector.load %arg7[%c0_11, %c0_12] : memref<8x128xf32, #tpu.memory_space<vmem>>, vector<8x128xf32>
      tpu.vector_store %arg7[%c0_11, %c0_12], %12 {strides = array<i32>} : memref<8x128xf32, #tpu.memory_space<vmem>>, vector<8x128xf32>,
    } else {
    }
    %c0 = arith.constant 0 : index
    %c0_1 = arith.constant 0 : index
    %3 = vector.load %arg7[%c0, %c0_1] : memref<8x128xf32, #tpu.memory_space<vmem>>, vector<8x128xf32>
    %c0_2 = arith.constant 0 : index
    %c0_3 = arith.constant 0 : index
    %4 = vector.load %arg3[%c0_2, %c0_3] : memref<8x128xbf16, #tpu.memory_space<vmem>>, vector<8x128xbf16>
    %c0_4 = arith.constant 0 : index
    %c0_5 = arith.constant 0 : index
    %5 = vector.load %arg4[%c0_4, %c0_5] : memref<128x128xbf16, #tpu.memory_space<vmem>>, vector<128x128xbf16>
    %cst = arith.constant dense<0.000000e+00> : vector<8x128xf32>
    %6 = tpu.matmul %4, %5, %cst {dimension_numbers = #tpu.dot_dimension_numbers<[1], [0], [0], [1], [0, 0, 1, 1], [], []>} : vector<8x128xbf16>, vector<128x128xbf16>, vector<8x128xf32> -> vector<8x128xf32>
    %7 = arith.addf %3, %6 : vector<8x128xf32>
    %c0_6 = arith.constant 0 : index
    %c0_7 = arith.constant 0 : index
    %8 = vector.load %arg7[%c0_6, %c0_7] : memref<8x128xf32, #tpu.memory_space<vmem>>, vector<8x128xf32>
    tpu.vector_store %arg7[%c0_6, %c0_7], %7 {strides = array<i32>} : memref<8x128xf32, #tpu.memory_space<vmem>>, vector<8x128xf32>,
    %c0_i32_8 = arith.constant 0 : i32
    %9 = arith.cmpi eq, %arg2, %c0_i32_8 : i32
    %10 = arith.extui %9 : i1 to i32
    %c0_i32_9 = arith.constant 0 : i32
    %11 = arith.cmpi ne, %10, %c0_i32_9 : i32
    scf.if %11 {
      %c0_10 = arith.constant 0 : index
      %c0_11 = arith.constant 0 : index
      %12 = vector.load %arg7[%c0_10, %c0_11] : memref<8x128xf32, #tpu.memory_space<vmem>>, vector<8x128xf32>
      %c0_12 = arith.constant 0 : index
      %c0_13 = arith.constant 0 : index
      %13 = vector.load %arg5[%c0_12, %c0_13] : memref<1x128xf32, #tpu.memory_space<vmem>>, vector<1x128xf32>
      %14 = vector.broadcast %13 : vector<1x128xf32> to vector<8x128xf32>
      %15 = arith.addf %12, %14 : vector<8x128xf32>
      %16 = arith.truncf %15 : vector<8x128xf32> to vector<8x128xbf16>
      %c0_14 = arith.constant 0 : index
      %c0_15 = arith.constant 0 : index
      %17 = vector.load %arg6[%c0_14, %c0_15] : memref<8x128xbf16, #tpu.memory_space<vmem>>, vector<8x128xbf16>
      tpu.vector_store %arg6[%c0_14, %c0_15], %16 {strides = array<i32>} : memref<8x128xbf16, #tpu.memory_space<vmem>>, vector<8x128xbf16>,
    } else {
    }
    return
  }
  func.func @transform_0(%arg0: i32, %arg1: i32, %arg2: i32) -> (i32, i32) {
    %c0_i32 = arith.constant 0 : i32
    return %arg0, %arg2 : i32, i32
  }
  func.func @transform_1(%arg0: i32, %arg1: i32, %arg2: i32) -> (i32, i32) {
    %c0_i32 = arith.constant 0 : i32
    return %arg2, %arg1 : i32, i32
  }
  func.func @transform_2(%arg0: i32, %arg1: i32, %arg2: i32) -> (i32, i32) {
    %c0_i32 = arith.constant 0 : i32
    %c0_i32_0 = arith.constant 0 : i32
    return %c0_i32, %arg1 : i32, i32
  }
  func.func @transform_3(%arg0: i32, %arg1: i32, %arg2: i32) -> (i32, i32) {
    %c0_i32 = arith.constant 0 : i32
    return %arg0, %arg1 : i32, i32
  }
}

module attributes {stable_mosaic.version = 11 : i64} {
  func.func @_mm_bias_kernel(%arg0: i32, %arg1: i32, %arg2: i32, %arg3: memref<8x128xbf16, #tpu.memory_space<vmem>>, %arg4: memref<128x256xbf16, #tpu.memory_space<vmem>>, %arg5: memref<1x256xf32, #tpu.memory_space<vmem>>, %arg6: memref<8x256xbf16, #tpu.memory_space<vmem>>, %arg7: memref<8x256xf32, #tpu.memory_space<vmem>>) attributes {dimension_semantics = [#tpu.dimension_semantics<parallel>, #tpu.dimension_semantics<parallel>, #tpu.dimension_semantics<arbitrary>], iteration_bounds = array<i64: 1, 1, 1>, scalar_prefetch = 0 : i64, scratch_operands = 1 : i64, tpu.core_type = #tpu.core_type<tc>, window_params = [{transform_indices = @transform_0, window_bounds = array<i64: 8, 128>}, {transform_indices = @transform_1, window_bounds = array<i64: 128, 256>}, {transform_indices = @transform_2, window_bounds = array<i64: 1, 256>}, {transform_indices = @transform_3, window_bounds = array<i64: 8, 256>}]} {
    %c0_i32 = arith.constant 0 : i32
    %0 = arith.cmpi eq, %arg2, %c0_i32 : i32
    %1 = arith.extui %0 : i1 to i32
    %c0_i32_0 = arith.constant 0 : i32
    %2 = arith.cmpi ne, %1, %c0_i32_0 : i32
    scf.if %2 {
      %cst_10 = arith.constant 0.000000e+00 : f32
      %12 = vector.broadcast %cst_10 : f32 to vector<8x256xf32>
      %c0_11 = arith.constant 0 : index
      %c0_12 = arith.constant 0 : index
      %13 = vector.load %arg7[%c0_11, %c0_12] : memref<8x256xf32, #tpu.memory_space<vmem>>, vector<8x256xf32>
      tpu.vector_store %arg7[%c0_11, %c0_12], %12 {strides = array<i32>} : memref<8x256xf32, #tpu.memory_space<vmem>>, vector<8x256xf32>,
    } else {
    }
    %c0 = arith.constant 0 : index
    %c0_1 = arith.constant 0 : index
    %3 = vector.load %arg7[%c0, %c0_1] : memref<8x256xf32, #tpu.memory_space<vmem>>, vector<8x256xf32>
    %c0_2 = arith.constant 0 : index
    %c0_3 = arith.constant 0 : index
    %4 = vector.load %arg3[%c0_2, %c0_3] : memref<8x128xbf16, #tpu.memory_space<vmem>>, vector<8x128xbf16>
    %c0_4 = arith.constant 0 : index
    %c0_5 = arith.constant 0 : index
    %5 = vector.load %arg4[%c0_4, %c0_5] : memref<128x256xbf16, #tpu.memory_space<vmem>>, vector<128x256xbf16>
    %cst = arith.constant dense<0.000000e+00> : vector<8x256xf32>
    %6 = tpu.matmul %4, %5, %cst {dimension_numbers = #tpu.dot_dimension_numbers<[1], [0], [0], [1], [0, 0, 1, 1], [], []>} : vector<8x128xbf16>, vector<128x256xbf16>, vector<8x256xf32> -> vector<8x256xf32>
    %7 = arith.addf %3, %6 : vector<8x256xf32>
    %c0_6 = arith.constant 0 : index
    %c0_7 = arith.constant 0 : index
    %8 = vector.load %arg7[%c0_6, %c0_7] : memref<8x256xf32, #tpu.memory_space<vmem>>, vector<8x256xf32>
    tpu.vector_store %arg7[%c0_6, %c0_7], %7 {strides = array<i32>} : memref<8x256xf32, #tpu.memory_space<vmem>>, vector<8x256xf32>,
    %c0_i32_8 = arith.constant 0 : i32
    %9 = arith.cmpi eq, %arg2, %c0_i32_8 : i32
    %10 = arith.extui %9 : i1 to i32
    %c0_i32_9 = arith.constant 0 : i32
    %11 = arith.cmpi ne, %10, %c0_i32_9 : i32
    scf.if %11 {
      %c0_10 = arith.constant 0 : index
      %c0_11 = arith.constant 0 : index
      %12 = vector.load %arg7[%c0_10, %c0_11] : memref<8x256xf32, #tpu.memory_space<vmem>>, vector<8x256xf32>
      %c0_12 = arith.constant 0 : index
      %c0_13 = arith.constant 0 : index
      %13 = vector.load %arg5[%c0_12, %c0_13] : memref<1x256xf32, #tpu.memory_space<vmem>>, vector<1x256xf32>
      %14 = vector.broadcast %13 : vector<1x256xf32> to vector<8x256xf32>
      %15 = arith.addf %12, %14 : vector<8x256xf32>
      %16 = arith.truncf %15 : vector<8x256xf32> to vector<8x256xbf16>
      %c0_14 = arith.constant 0 : index
      %c0_15 = arith.constant 0 : index
      %17 = vector.load %arg6[%c0_14, %c0_15] : memref<8x256xbf16, #tpu.memory_space<vmem>>, vector<8x256xbf16>
      tpu.vector_store %arg6[%c0_14, %c0_15], %16 {strides = array<i32>} : memref<8x256xbf16, #tpu.memory_space<vmem>>, vector<8x256xbf16>,
    } else {
    }
    return
  }
  func.func @transform_0(%arg0: i32, %arg1: i32, %arg2: i32) -> (i32, i32) {
    %c0_i32 = arith.constant 0 : i32
    return %arg0, %arg2 : i32, i32
  }
  func.func @transform_1(%arg0: i32, %arg1: i32, %arg2: i32) -> (i32, i32) {
    %c0_i32 = arith.constant 0 : i32
    return %arg2, %arg1 : i32, i32
  }
  func.func @transform_2(%arg0: i32, %arg1: i32, %arg2: i32) -> (i32, i32) {
    %c0_i32 = arith.constant 0 : i32
    %c0_i32_0 = arith.constant 0 : i32
    return %c0_i32, %arg1 : i32, i32
  }
  func.func @transform_3(%arg0: i32, %arg1: i32, %arg2: i32) -> (i32, i32) {
    %c0_i32 = arith.constant 0 : i32
    return %arg0, %arg1 : i32, i32
  }
}

module attributes {stable_mosaic.version = 11 : i64} {
  func.func @_mm_bias_res_kernel(%arg0: i32, %arg1: i32, %arg2: i32, %arg3: memref<8x128xbf16, #tpu.memory_space<vmem>>, %arg4: memref<128x128xbf16, #tpu.memory_space<vmem>>, %arg5: memref<1x128xf32, #tpu.memory_space<vmem>>, %arg6: memref<8x128xbf16, #tpu.memory_space<vmem>>, %arg7: memref<8x128xbf16, #tpu.memory_space<vmem>>, %arg8: memref<8x128xf32, #tpu.memory_space<vmem>>) attributes {dimension_semantics = [#tpu.dimension_semantics<parallel>, #tpu.dimension_semantics<parallel>, #tpu.dimension_semantics<arbitrary>], iteration_bounds = array<i64: 1, 1, 1>, scalar_prefetch = 0 : i64, scratch_operands = 1 : i64, tpu.core_type = #tpu.core_type<tc>, window_params = [{transform_indices = @transform_0, window_bounds = array<i64: 8, 128>}, {transform_indices = @transform_1, window_bounds = array<i64: 128, 128>}, {transform_indices = @transform_2, window_bounds = array<i64: 1, 128>}, {transform_indices = @transform_3, window_bounds = array<i64: 8, 128>}, {transform_indices = @transform_4, window_bounds = array<i64: 8, 128>}]} {
    %c0_i32 = arith.constant 0 : i32
    %0 = arith.cmpi eq, %arg2, %c0_i32 : i32
    %1 = arith.extui %0 : i1 to i32
    %c0_i32_0 = arith.constant 0 : i32
    %2 = arith.cmpi ne, %1, %c0_i32_0 : i32
    scf.if %2 {
      %cst_10 = arith.constant 0.000000e+00 : f32
      %12 = vector.broadcast %cst_10 : f32 to vector<8x128xf32>
      %c0_11 = arith.constant 0 : index
      %c0_12 = arith.constant 0 : index
      %13 = vector.load %arg8[%c0_11, %c0_12] : memref<8x128xf32, #tpu.memory_space<vmem>>, vector<8x128xf32>
      tpu.vector_store %arg8[%c0_11, %c0_12], %12 {strides = array<i32>} : memref<8x128xf32, #tpu.memory_space<vmem>>, vector<8x128xf32>,
    } else {
    }
    %c0 = arith.constant 0 : index
    %c0_1 = arith.constant 0 : index
    %3 = vector.load %arg8[%c0, %c0_1] : memref<8x128xf32, #tpu.memory_space<vmem>>, vector<8x128xf32>
    %c0_2 = arith.constant 0 : index
    %c0_3 = arith.constant 0 : index
    %4 = vector.load %arg3[%c0_2, %c0_3] : memref<8x128xbf16, #tpu.memory_space<vmem>>, vector<8x128xbf16>
    %c0_4 = arith.constant 0 : index
    %c0_5 = arith.constant 0 : index
    %5 = vector.load %arg4[%c0_4, %c0_5] : memref<128x128xbf16, #tpu.memory_space<vmem>>, vector<128x128xbf16>
    %cst = arith.constant dense<0.000000e+00> : vector<8x128xf32>
    %6 = tpu.matmul %4, %5, %cst {dimension_numbers = #tpu.dot_dimension_numbers<[1], [0], [0], [1], [0, 0, 1, 1], [], []>} : vector<8x128xbf16>, vector<128x128xbf16>, vector<8x128xf32> -> vector<8x128xf32>
    %7 = arith.addf %3, %6 : vector<8x128xf32>
    %c0_6 = arith.constant 0 : index
    %c0_7 = arith.constant 0 : index
    %8 = vector.load %arg8[%c0_6, %c0_7] : memref<8x128xf32, #tpu.memory_space<vmem>>, vector<8x128xf32>
    tpu.vector_store %arg8[%c0_6, %c0_7], %7 {strides = array<i32>} : memref<8x128xf32, #tpu.memory_space<vmem>>, vector<8x128xf32>,
    %c0_i32_8 = arith.constant 0 : i32
    %9 = arith.cmpi eq, %arg2, %c0_i32_8 : i32
    %10 = arith.extui %9 : i1 to i32
    %c0_i32_9 = arith.constant 0 : i32
    %11 = arith.cmpi ne, %10, %c0_i32_9 : i32
    scf.if %11 {
      %c0_10 = arith.constant 0 : index
      %c0_11 = arith.constant 0 : index
      %12 = vector.load %arg8[%c0_10, %c0_11] : memref<8x128xf32, #tpu.memory_space<vmem>>, vector<8x128xf32>
      %c0_12 = arith.constant 0 : index
      %c0_13 = arith.constant 0 : index
      %13 = vector.load %arg5[%c0_12, %c0_13] : memref<1x128xf32, #tpu.memory_space<vmem>>, vector<1x128xf32>
      %14 = vector.broadcast %13 : vector<1x128xf32> to vector<8x128xf32>
      %15 = arith.addf %12, %14 : vector<8x128xf32>
      %c0_14 = arith.constant 0 : index
      %c0_15 = arith.constant 0 : index
      %16 = vector.load %arg6[%c0_14, %c0_15] : memref<8x128xbf16, #tpu.memory_space<vmem>>, vector<8x128xbf16>
      %17 = arith.extf %16 : vector<8x128xbf16> to vector<8x128xf32>
      %18 = arith.addf %15, %17 : vector<8x128xf32>
      %cst_16 = arith.constant 0.000000e+00 : f32
      %19 = vector.broadcast %cst_16 : f32 to vector<8x128xf32>
      %20 = arith.maximumf %18, %19 : vector<8x128xf32>
      %21 = arith.truncf %20 : vector<8x128xf32> to vector<8x128xbf16>
      %c0_17 = arith.constant 0 : index
      %c0_18 = arith.constant 0 : index
      %22 = vector.load %arg7[%c0_17, %c0_18] : memref<8x128xbf16, #tpu.memory_space<vmem>>, vector<8x128xbf16>
      tpu.vector_store %arg7[%c0_17, %c0_18], %21 {strides = array<i32>} : memref<8x128xbf16, #tpu.memory_space<vmem>>, vector<8x128xbf16>,
    } else {
    }
    return
  }
  func.func @transform_0(%arg0: i32, %arg1: i32, %arg2: i32) -> (i32, i32) {
    %c0_i32 = arith.constant 0 : i32
    return %arg0, %arg2 : i32, i32
  }
  func.func @transform_1(%arg0: i32, %arg1: i32, %arg2: i32) -> (i32, i32) {
    %c0_i32 = arith.constant 0 : i32
    return %arg2, %arg1 : i32, i32
  }
  func.func @transform_2(%arg0: i32, %arg1: i32, %arg2: i32) -> (i32, i32) {
    %c0_i32 = arith.constant 0 : i32
    %c0_i32_0 = arith.constant 0 : i32
    return %c0_i32, %arg1 : i32, i32
  }
  func.func @transform_3(%arg0: i32, %arg1: i32, %arg2: i32) -> (i32, i32) {
    %c0_i32 = arith.constant 0 : i32
    return %arg0, %arg1 : i32, i32
  }
  func.func @transform_4(%arg0: i32, %arg1: i32, %arg2: i32) -> (i32, i32) {
    %c0_i32 = arith.constant 0 : i32
    return %arg0, %arg1 : i32, i32
  }
}

module attributes {stable_mosaic.version = 11 : i64} {
  func.func @_mm_bias_kernel(%arg0: i32, %arg1: i32, %arg2: i32, %arg3: memref<8x128xbf16, #tpu.memory_space<vmem>>, %arg4: memref<128x128xbf16, #tpu.memory_space<vmem>>, %arg5: memref<1x128xf32, #tpu.memory_space<vmem>>, %arg6: memref<8x128xbf16, #tpu.memory_space<vmem>>, %arg7: memref<8x128xf32, #tpu.memory_space<vmem>>) attributes {dimension_semantics = [#tpu.dimension_semantics<parallel>, #tpu.dimension_semantics<parallel>, #tpu.dimension_semantics<arbitrary>], iteration_bounds = array<i64: 1, 1, 1>, scalar_prefetch = 0 : i64, scratch_operands = 1 : i64, tpu.core_type = #tpu.core_type<tc>, window_params = [{transform_indices = @transform_0, window_bounds = array<i64: 8, 128>}, {transform_indices = @transform_1, window_bounds = array<i64: 128, 128>}, {transform_indices = @transform_2, window_bounds = array<i64: 1, 128>}, {transform_indices = @transform_3, window_bounds = array<i64: 8, 128>}]} {
    %c0_i32 = arith.constant 0 : i32
    %0 = arith.cmpi eq, %arg2, %c0_i32 : i32
    %1 = arith.extui %0 : i1 to i32
    %c0_i32_0 = arith.constant 0 : i32
    %2 = arith.cmpi ne, %1, %c0_i32_0 : i32
    scf.if %2 {
      %cst_10 = arith.constant 0.000000e+00 : f32
      %12 = vector.broadcast %cst_10 : f32 to vector<8x128xf32>
      %c0_11 = arith.constant 0 : index
      %c0_12 = arith.constant 0 : index
      %13 = vector.load %arg7[%c0_11, %c0_12] : memref<8x128xf32, #tpu.memory_space<vmem>>, vector<8x128xf32>
      tpu.vector_store %arg7[%c0_11, %c0_12], %12 {strides = array<i32>} : memref<8x128xf32, #tpu.memory_space<vmem>>, vector<8x128xf32>,
    } else {
    }
    %c0 = arith.constant 0 : index
    %c0_1 = arith.constant 0 : index
    %3 = vector.load %arg7[%c0, %c0_1] : memref<8x128xf32, #tpu.memory_space<vmem>>, vector<8x128xf32>
    %c0_2 = arith.constant 0 : index
    %c0_3 = arith.constant 0 : index
    %4 = vector.load %arg3[%c0_2, %c0_3] : memref<8x128xbf16, #tpu.memory_space<vmem>>, vector<8x128xbf16>
    %c0_4 = arith.constant 0 : index
    %c0_5 = arith.constant 0 : index
    %5 = vector.load %arg4[%c0_4, %c0_5] : memref<128x128xbf16, #tpu.memory_space<vmem>>, vector<128x128xbf16>
    %cst = arith.constant dense<0.000000e+00> : vector<8x128xf32>
    %6 = tpu.matmul %4, %5, %cst {dimension_numbers = #tpu.dot_dimension_numbers<[1], [0], [0], [1], [0, 0, 1, 1], [], []>} : vector<8x128xbf16>, vector<128x128xbf16>, vector<8x128xf32> -> vector<8x128xf32>
    %7 = arith.addf %3, %6 : vector<8x128xf32>
    %c0_6 = arith.constant 0 : index
    %c0_7 = arith.constant 0 : index
    %8 = vector.load %arg7[%c0_6, %c0_7] : memref<8x128xf32, #tpu.memory_space<vmem>>, vector<8x128xf32>
    tpu.vector_store %arg7[%c0_6, %c0_7], %7 {strides = array<i32>} : memref<8x128xf32, #tpu.memory_space<vmem>>, vector<8x128xf32>,
    %c0_i32_8 = arith.constant 0 : i32
    %9 = arith.cmpi eq, %arg2, %c0_i32_8 : i32
    %10 = arith.extui %9 : i1 to i32
    %c0_i32_9 = arith.constant 0 : i32
    %11 = arith.cmpi ne, %10, %c0_i32_9 : i32
    scf.if %11 {
      %c0_10 = arith.constant 0 : index
      %c0_11 = arith.constant 0 : index
      %12 = vector.load %arg7[%c0_10, %c0_11] : memref<8x128xf32, #tpu.memory_space<vmem>>, vector<8x128xf32>
      %c0_12 = arith.constant 0 : index
      %c0_13 = arith.constant 0 : index
      %13 = vector.load %arg5[%c0_12, %c0_13] : memref<1x128xf32, #tpu.memory_space<vmem>>, vector<1x128xf32>
      %14 = vector.broadcast %13 : vector<1x128xf32> to vector<8x128xf32>
      %15 = arith.addf %12, %14 : vector<8x128xf32>
      %cst_14 = arith.constant 0.000000e+00 : f32
      %16 = vector.broadcast %cst_14 : f32 to vector<8x128xf32>
      %17 = arith.maximumf %15, %16 : vector<8x128xf32>
      %18 = arith.truncf %17 : vector<8x128xf32> to vector<8x128xbf16>
      %c0_15 = arith.constant 0 : index
      %c0_16 = arith.constant 0 : index
      %19 = vector.load %arg6[%c0_15, %c0_16] : memref<8x128xbf16, #tpu.memory_space<vmem>>, vector<8x128xbf16>
      tpu.vector_store %arg6[%c0_15, %c0_16], %18 {strides = array<i32>} : memref<8x128xbf16, #tpu.memory_space<vmem>>, vector<8x128xbf16>,
    } else {
    }
    return
  }
  func.func @transform_0(%arg0: i32, %arg1: i32, %arg2: i32) -> (i32, i32) {
    %c0_i32 = arith.constant 0 : i32
    return %arg0, %arg2 : i32, i32
  }
  func.func @transform_1(%arg0: i32, %arg1: i32, %arg2: i32) -> (i32, i32) {
    %c0_i32 = arith.constant 0 : i32
    return %arg2, %arg1 : i32, i32
  }
  func.func @transform_2(%arg0: i32, %arg1: i32, %arg2: i32) -> (i32, i32) {
    %c0_i32 = arith.constant 0 : i32
    %c0_i32_0 = arith.constant 0 : i32
    return %c0_i32, %arg1 : i32, i32
  }
  func.func @transform_3(%arg0: i32, %arg1: i32, %arg2: i32) -> (i32, i32) {
    %c0_i32 = arith.constant 0 : i32
    return %arg0, %arg1 : i32, i32
  }
}

module attributes {stable_mosaic.version = 11 : i64} {
  func.func @_mm_bias_kernel(%arg0: i32, %arg1: i32, %arg2: i32, %arg3: memref<8x128xbf16, #tpu.memory_space<vmem>>, %arg4: memref<128x128xbf16, #tpu.memory_space<vmem>>, %arg5: memref<1x128xf32, #tpu.memory_space<vmem>>, %arg6: memref<8x128xbf16, #tpu.memory_space<vmem>>, %arg7: memref<8x128xf32, #tpu.memory_space<vmem>>) attributes {dimension_semantics = [#tpu.dimension_semantics<parallel>, #tpu.dimension_semantics<parallel>, #tpu.dimension_semantics<arbitrary>], iteration_bounds = array<i64: 1, 1, 5>, scalar_prefetch = 0 : i64, scratch_operands = 1 : i64, tpu.core_type = #tpu.core_type<tc>, window_params = [{transform_indices = @transform_0, window_bounds = array<i64: 8, 128>}, {transform_indices = @transform_1, window_bounds = array<i64: 128, 128>}, {transform_indices = @transform_2, window_bounds = array<i64: 1, 128>}, {transform_indices = @transform_3, window_bounds = array<i64: 8, 128>}]} {
    %c0_i32 = arith.constant 0 : i32
    %0 = arith.cmpi eq, %arg2, %c0_i32 : i32
    %1 = arith.extui %0 : i1 to i32
    %c0_i32_0 = arith.constant 0 : i32
    %2 = arith.cmpi ne, %1, %c0_i32_0 : i32
    scf.if %2 {
      %cst_9 = arith.constant 0.000000e+00 : f32
      %12 = vector.broadcast %cst_9 : f32 to vector<8x128xf32>
      %c0_10 = arith.constant 0 : index
      %c0_11 = arith.constant 0 : index
      %13 = vector.load %arg7[%c0_10, %c0_11] : memref<8x128xf32, #tpu.memory_space<vmem>>, vector<8x128xf32>
      tpu.vector_store %arg7[%c0_10, %c0_11], %12 {strides = array<i32>} : memref<8x128xf32, #tpu.memory_space<vmem>>, vector<8x128xf32>,
    } else {
    }
    %c0 = arith.constant 0 : index
    %c0_1 = arith.constant 0 : index
    %3 = vector.load %arg7[%c0, %c0_1] : memref<8x128xf32, #tpu.memory_space<vmem>>, vector<8x128xf32>
    %c0_2 = arith.constant 0 : index
    %c0_3 = arith.constant 0 : index
    %4 = vector.load %arg3[%c0_2, %c0_3] : memref<8x128xbf16, #tpu.memory_space<vmem>>, vector<8x128xbf16>
    %c0_4 = arith.constant 0 : index
    %c0_5 = arith.constant 0 : index
    %5 = vector.load %arg4[%c0_4, %c0_5] : memref<128x128xbf16, #tpu.memory_space<vmem>>, vector<128x128xbf16>
    %cst = arith.constant dense<0.000000e+00> : vector<8x128xf32>
    %6 = tpu.matmul %4, %5, %cst {dimension_numbers = #tpu.dot_dimension_numbers<[1], [0], [0], [1], [0, 0, 1, 1], [], []>} : vector<8x128xbf16>, vector<128x128xbf16>, vector<8x128xf32> -> vector<8x128xf32>
    %7 = arith.addf %3, %6 : vector<8x128xf32>
    %c0_6 = arith.constant 0 : index
    %c0_7 = arith.constant 0 : index
    %8 = vector.load %arg7[%c0_6, %c0_7] : memref<8x128xf32, #tpu.memory_space<vmem>>, vector<8x128xf32>
    tpu.vector_store %arg7[%c0_6, %c0_7], %7 {strides = array<i32>} : memref<8x128xf32, #tpu.memory_space<vmem>>, vector<8x128xf32>,
    %c4_i32 = arith.constant 4 : i32
    %9 = arith.cmpi eq, %arg2, %c4_i32 : i32
    %10 = arith.extui %9 : i1 to i32
    %c0_i32_8 = arith.constant 0 : i32
    %11 = arith.cmpi ne, %10, %c0_i32_8 : i32
    scf.if %11 {
      %c0_9 = arith.constant 0 : index
      %c0_10 = arith.constant 0 : index
      %12 = vector.load %arg7[%c0_9, %c0_10] : memref<8x128xf32, #tpu.memory_space<vmem>>, vector<8x128xf32>
      %c0_11 = arith.constant 0 : index
      %c0_12 = arith.constant 0 : index
      %13 = vector.load %arg5[%c0_11, %c0_12] : memref<1x128xf32, #tpu.memory_space<vmem>>, vector<1x128xf32>
      %14 = vector.broadcast %13 : vector<1x128xf32> to vector<8x128xf32>
      %15 = arith.addf %12, %14 : vector<8x128xf32>
      %cst_13 = arith.constant 0.000000e+00 : f32
      %16 = vector.broadcast %cst_13 : f32 to vector<8x128xf32>
      %17 = arith.maximumf %15, %16 : vector<8x128xf32>
      %18 = arith.truncf %17 : vector<8x128xf32> to vector<8x128xbf16>
      %c0_14 = arith.constant 0 : index
      %c0_15 = arith.constant 0 : index
      %19 = vector.load %arg6[%c0_14, %c0_15] : memref<8x128xbf16, #tpu.memory_space<vmem>>, vector<8x128xbf16>
      tpu.vector_store %arg6[%c0_14, %c0_15], %18 {strides = array<i32>} : memref<8x128xbf16, #tpu.memory_space<vmem>>, vector<8x128xbf16>,
    } else {
    }
    return
  }
  func.func @transform_0(%arg0: i32, %arg1: i32, %arg2: i32) -> (i32, i32) {
    %c0_i32 = arith.constant 0 : i32
    return %arg0, %arg2 : i32, i32
  }
  func.func @transform_1(%arg0: i32, %arg1: i32, %arg2: i32) -> (i32, i32) {
    %c0_i32 = arith.constant 0 : i32
    return %arg2, %arg1 : i32, i32
  }
  func.func @transform_2(%arg0: i32, %arg1: i32, %arg2: i32) -> (i32, i32) {
    %c0_i32 = arith.constant 0 : i32
    %c0_i32_0 = arith.constant 0 : i32
    return %c0_i32, %arg1 : i32, i32
  }
  func.func @transform_3(%arg0: i32, %arg1: i32, %arg2: i32) -> (i32, i32) {
    %c0_i32 = arith.constant 0 : i32
    return %arg0, %arg1 : i32, i32
  }
}

module attributes {stable_mosaic.version = 11 : i64} {
  func.func @_mm_bias_kernel(%arg0: i32, %arg1: i32, %arg2: i32, %arg3: memref<8x256xbf16, #tpu.memory_space<vmem>>, %arg4: memref<256x128xbf16, #tpu.memory_space<vmem>>, %arg5: memref<1x128xf32, #tpu.memory_space<vmem>>, %arg6: memref<8x128xf32, #tpu.memory_space<vmem>>, %arg7: memref<8x128xf32, #tpu.memory_space<vmem>>) attributes {dimension_semantics = [#tpu.dimension_semantics<parallel>, #tpu.dimension_semantics<parallel>, #tpu.dimension_semantics<arbitrary>], iteration_bounds = array<i64: 1, 1, 1>, scalar_prefetch = 0 : i64, scratch_operands = 1 : i64, tpu.core_type = #tpu.core_type<tc>, window_params = [{transform_indices = @transform_0, window_bounds = array<i64: 8, 256>}, {transform_indices = @transform_1, window_bounds = array<i64: 256, 128>}, {transform_indices = @transform_2, window_bounds = array<i64: 1, 128>}, {transform_indices = @transform_3, window_bounds = array<i64: 8, 128>}]} {
    %c0_i32 = arith.constant 0 : i32
    %0 = arith.cmpi eq, %arg2, %c0_i32 : i32
    %1 = arith.extui %0 : i1 to i32
    %c0_i32_0 = arith.constant 0 : i32
    %2 = arith.cmpi ne, %1, %c0_i32_0 : i32
    scf.if %2 {
      %cst_10 = arith.constant 0.000000e+00 : f32
      %12 = vector.broadcast %cst_10 : f32 to vector<8x128xf32>
      %c0_11 = arith.constant 0 : index
      %c0_12 = arith.constant 0 : index
      %13 = vector.load %arg7[%c0_11, %c0_12] : memref<8x128xf32, #tpu.memory_space<vmem>>, vector<8x128xf32>
      tpu.vector_store %arg7[%c0_11, %c0_12], %12 {strides = array<i32>} : memref<8x128xf32, #tpu.memory_space<vmem>>, vector<8x128xf32>,
    } else {
    }
    %c0 = arith.constant 0 : index
    %c0_1 = arith.constant 0 : index
    %3 = vector.load %arg7[%c0, %c0_1] : memref<8x128xf32, #tpu.memory_space<vmem>>, vector<8x128xf32>
    %c0_2 = arith.constant 0 : index
    %c0_3 = arith.constant 0 : index
    %4 = vector.load %arg3[%c0_2, %c0_3] : memref<8x256xbf16, #tpu.memory_space<vmem>>, vector<8x256xbf16>
    %c0_4 = arith.constant 0 : index
    %c0_5 = arith.constant 0 : index
    %5 = vector.load %arg4[%c0_4, %c0_5] : memref<256x128xbf16, #tpu.memory_space<vmem>>, vector<256x128xbf16>
    %cst = arith.constant dense<0.000000e+00> : vector<8x128xf32>
    %6 = tpu.matmul %4, %5, %cst {dimension_numbers = #tpu.dot_dimension_numbers<[1], [0], [0], [1], [0, 0, 1, 1], [], []>} : vector<8x256xbf16>, vector<256x128xbf16>, vector<8x128xf32> -> vector<8x128xf32>
    %7 = arith.addf %3, %6 : vector<8x128xf32>
    %c0_6 = arith.constant 0 : index
    %c0_7 = arith.constant 0 : index
    %8 = vector.load %arg7[%c0_6, %c0_7] : memref<8x128xf32, #tpu.memory_space<vmem>>, vector<8x128xf32>
    tpu.vector_store %arg7[%c0_6, %c0_7], %7 {strides = array<i32>} : memref<8x128xf32, #tpu.memory_space<vmem>>, vector<8x128xf32>,
    %c0_i32_8 = arith.constant 0 : i32
    %9 = arith.cmpi eq, %arg2, %c0_i32_8 : i32
    %10 = arith.extui %9 : i1 to i32
    %c0_i32_9 = arith.constant 0 : i32
    %11 = arith.cmpi ne, %10, %c0_i32_9 : i32
    scf.if %11 {
      %c0_10 = arith.constant 0 : index
      %c0_11 = arith.constant 0 : index
      %12 = vector.load %arg7[%c0_10, %c0_11] : memref<8x128xf32, #tpu.memory_space<vmem>>, vector<8x128xf32>
      %c0_12 = arith.constant 0 : index
      %c0_13 = arith.constant 0 : index
      %13 = vector.load %arg5[%c0_12, %c0_13] : memref<1x128xf32, #tpu.memory_space<vmem>>, vector<1x128xf32>
      %14 = vector.broadcast %13 : vector<1x128xf32> to vector<8x128xf32>
      %15 = arith.addf %12, %14 : vector<8x128xf32>
      %c0_14 = arith.constant 0 : index
      %c0_15 = arith.constant 0 : index
      %16 = vector.load %arg6[%c0_14, %c0_15] : memref<8x128xf32, #tpu.memory_space<vmem>>, vector<8x128xf32>
      tpu.vector_store %arg6[%c0_14, %c0_15], %15 {strides = array<i32>} : memref<8x128xf32, #tpu.memory_space<vmem>>, vector<8x128xf32>,
    } else {
    }
    return
  }
  func.func @transform_0(%arg0: i32, %arg1: i32, %arg2: i32) -> (i32, i32) {
    %c0_i32 = arith.constant 0 : i32
    return %arg0, %arg2 : i32, i32
  }
  func.func @transform_1(%arg0: i32, %arg1: i32, %arg2: i32) -> (i32, i32) {
    %c0_i32 = arith.constant 0 : i32
    return %arg2, %arg1 : i32, i32
  }
  func.func @transform_2(%arg0: i32, %arg1: i32, %arg2: i32) -> (i32, i32) {
    %c0_i32 = arith.constant 0 : i32
    %c0_i32_0 = arith.constant 0 : i32
    return %c0_i32, %arg1 : i32, i32
  }
  func.func @transform_3(%arg0: i32, %arg1: i32, %arg2: i32) -> (i32, i32) {
    %c0_i32 = arith.constant 0 : i32
    return %arg0, %arg1 : i32, i32
  }
}

module attributes {stable_mosaic.version = 11 : i64} {
  func.func @_mm_bias_res_kernel(%arg0: i32, %arg1: i32, %arg2: i32, %arg3: memref<8x128xbf16, #tpu.memory_space<vmem>>, %arg4: memref<128x256xbf16, #tpu.memory_space<vmem>>, %arg5: memref<1x256xf32, #tpu.memory_space<vmem>>, %arg6: memref<8x256xbf16, #tpu.memory_space<vmem>>, %arg7: memref<8x256xbf16, #tpu.memory_space<vmem>>, %arg8: memref<8x256xf32, #tpu.memory_space<vmem>>) attributes {dimension_semantics = [#tpu.dimension_semantics<parallel>, #tpu.dimension_semantics<parallel>, #tpu.dimension_semantics<arbitrary>], iteration_bounds = array<i64: 1, 1, 1>, scalar_prefetch = 0 : i64, scratch_operands = 1 : i64, tpu.core_type = #tpu.core_type<tc>, window_params = [{transform_indices = @transform_0, window_bounds = array<i64: 8, 128>}, {transform_indices = @transform_1, window_bounds = array<i64: 128, 256>}, {transform_indices = @transform_2, window_bounds = array<i64: 1, 256>}, {transform_indices = @transform_3, window_bounds = array<i64: 8, 256>}, {transform_indices = @transform_4, window_bounds = array<i64: 8, 256>}]} {
    %c0_i32 = arith.constant 0 : i32
    %0 = arith.cmpi eq, %arg2, %c0_i32 : i32
    %1 = arith.extui %0 : i1 to i32
    %c0_i32_0 = arith.constant 0 : i32
    %2 = arith.cmpi ne, %1, %c0_i32_0 : i32
    scf.if %2 {
      %cst_10 = arith.constant 0.000000e+00 : f32
      %12 = vector.broadcast %cst_10 : f32 to vector<8x256xf32>
      %c0_11 = arith.constant 0 : index
      %c0_12 = arith.constant 0 : index
      %13 = vector.load %arg8[%c0_11, %c0_12] : memref<8x256xf32, #tpu.memory_space<vmem>>, vector<8x256xf32>
      tpu.vector_store %arg8[%c0_11, %c0_12], %12 {strides = array<i32>} : memref<8x256xf32, #tpu.memory_space<vmem>>, vector<8x256xf32>,
    } else {
    }
    %c0 = arith.constant 0 : index
    %c0_1 = arith.constant 0 : index
    %3 = vector.load %arg8[%c0, %c0_1] : memref<8x256xf32, #tpu.memory_space<vmem>>, vector<8x256xf32>
    %c0_2 = arith.constant 0 : index
    %c0_3 = arith.constant 0 : index
    %4 = vector.load %arg3[%c0_2, %c0_3] : memref<8x128xbf16, #tpu.memory_space<vmem>>, vector<8x128xbf16>
    %c0_4 = arith.constant 0 : index
    %c0_5 = arith.constant 0 : index
    %5 = vector.load %arg4[%c0_4, %c0_5] : memref<128x256xbf16, #tpu.memory_space<vmem>>, vector<128x256xbf16>
    %cst = arith.constant dense<0.000000e+00> : vector<8x256xf32>
    %6 = tpu.matmul %4, %5, %cst {dimension_numbers = #tpu.dot_dimension_numbers<[1], [0], [0], [1], [0, 0, 1, 1], [], []>} : vector<8x128xbf16>, vector<128x256xbf16>, vector<8x256xf32> -> vector<8x256xf32>
    %7 = arith.addf %3, %6 : vector<8x256xf32>
    %c0_6 = arith.constant 0 : index
    %c0_7 = arith.constant 0 : index
    %8 = vector.load %arg8[%c0_6, %c0_7] : memref<8x256xf32, #tpu.memory_space<vmem>>, vector<8x256xf32>
    tpu.vector_store %arg8[%c0_6, %c0_7], %7 {strides = array<i32>} : memref<8x256xf32, #tpu.memory_space<vmem>>, vector<8x256xf32>,
    %c0_i32_8 = arith.constant 0 : i32
    %9 = arith.cmpi eq, %arg2, %c0_i32_8 : i32
    %10 = arith.extui %9 : i1 to i32
    %c0_i32_9 = arith.constant 0 : i32
    %11 = arith.cmpi ne, %10, %c0_i32_9 : i32
    scf.if %11 {
      %c0_10 = arith.constant 0 : index
      %c0_11 = arith.constant 0 : index
      %12 = vector.load %arg8[%c0_10, %c0_11] : memref<8x256xf32, #tpu.memory_space<vmem>>, vector<8x256xf32>
      %c0_12 = arith.constant 0 : index
      %c0_13 = arith.constant 0 : index
      %13 = vector.load %arg5[%c0_12, %c0_13] : memref<1x256xf32, #tpu.memory_space<vmem>>, vector<1x256xf32>
      %14 = vector.broadcast %13 : vector<1x256xf32> to vector<8x256xf32>
      %15 = arith.addf %12, %14 : vector<8x256xf32>
      %c0_14 = arith.constant 0 : index
      %c0_15 = arith.constant 0 : index
      %16 = vector.load %arg6[%c0_14, %c0_15] : memref<8x256xbf16, #tpu.memory_space<vmem>>, vector<8x256xbf16>
      %17 = arith.extf %16 : vector<8x256xbf16> to vector<8x256xf32>
      %18 = arith.addf %15, %17 : vector<8x256xf32>
      %cst_16 = arith.constant 0.000000e+00 : f32
      %19 = vector.broadcast %cst_16 : f32 to vector<8x256xf32>
      %20 = arith.maximumf %18, %19 : vector<8x256xf32>
      %21 = arith.truncf %20 : vector<8x256xf32> to vector<8x256xbf16>
      %c0_17 = arith.constant 0 : index
      %c0_18 = arith.constant 0 : index
      %22 = vector.load %arg7[%c0_17, %c0_18] : memref<8x256xbf16, #tpu.memory_space<vmem>>, vector<8x256xbf16>
      tpu.vector_store %arg7[%c0_17, %c0_18], %21 {strides = array<i32>} : memref<8x256xbf16, #tpu.memory_space<vmem>>, vector<8x256xbf16>,
    } else {
    }
    return
  }
  func.func @transform_0(%arg0: i32, %arg1: i32, %arg2: i32) -> (i32, i32) {
    %c0_i32 = arith.constant 0 : i32
    return %arg0, %arg2 : i32, i32
  }
  func.func @transform_1(%arg0: i32, %arg1: i32, %arg2: i32) -> (i32, i32) {
    %c0_i32 = arith.constant 0 : i32
    return %arg2, %arg1 : i32, i32
  }
  func.func @transform_2(%arg0: i32, %arg1: i32, %arg2: i32) -> (i32, i32) {
    %c0_i32 = arith.constant 0 : i32
    %c0_i32_0 = arith.constant 0 : i32
    return %c0_i32, %arg1 : i32, i32
  }
  func.func @transform_3(%arg0: i32, %arg1: i32, %arg2: i32) -> (i32, i32) {
    %c0_i32 = arith.constant 0 : i32
    return %arg0, %arg1 : i32, i32
  }
  func.func @transform_4(%arg0: i32, %arg1: i32, %arg2: i32) -> (i32, i32) {
    %c0_i32 = arith.constant 0 : i32
    return %arg0, %arg1 : i32, i32
  }
}

module attributes {stable_mosaic.version = 11 : i64} {
  func.func @_avg_pool_kernel(%arg0: i32, %arg1: memref<1x8x256xbf16, #tpu.memory_space<vmem>>, %arg2: memref<8x256xf32, #tpu.memory_space<vmem>>, %arg3: memref<8x256xf32, #tpu.memory_space<vmem>>) attributes {dimension_semantics = [#tpu.dimension_semantics<arbitrary>], iteration_bounds = array<i64: 1>, scalar_prefetch = 0 : i64, scratch_operands = 1 : i64, tpu.core_type = #tpu.core_type<tc>, window_params = [{transform_indices = @transform_0, window_bounds = array<i64: 1, 8, 256>}, {pipeline_mode = #tpu.pipeline_mode<synchronous>, transform_indices = @transform_1, window_bounds = array<i64: 8, 256>}]} {
    %c0_i32 = arith.constant 0 : i32
    %0 = arith.cmpi eq, %arg0, %c0_i32 : i32
    %1 = arith.extui %0 : i1 to i32
    %c0_i32_0 = arith.constant 0 : i32
    %2 = arith.cmpi ne, %1, %c0_i32_0 : i32
    scf.if %2 {
      %cst_9 = arith.constant 0.000000e+00 : f32
      %12 = vector.broadcast %cst_9 : f32 to vector<8x256xf32>
      %c0_10 = arith.constant 0 : index
      %c0_11 = arith.constant 0 : index
      %13 = vector.load %arg3[%c0_10, %c0_11] : memref<8x256xf32, #tpu.memory_space<vmem>>, vector<8x256xf32>
      tpu.vector_store %arg3[%c0_10, %c0_11], %12 {strides = array<i32>} : memref<8x256xf32, #tpu.memory_space<vmem>>, vector<8x256xf32>,
    } else {
    }
    %c0 = arith.constant 0 : index
    %c0_1 = arith.constant 0 : index
    %3 = vector.load %arg3[%c0, %c0_1] : memref<8x256xf32, #tpu.memory_space<vmem>>, vector<8x256xf32>
    %c0_2 = arith.constant 0 : index
    %c0_3 = arith.constant 0 : index
    %c0_4 = arith.constant 0 : index
    %4 = vector.load %arg1[%c0_2, %c0_3, %c0_4] : memref<1x8x256xbf16, #tpu.memory_space<vmem>>, vector<1x8x256xbf16>
    %5 = arith.extf %4 : vector<1x8x256xbf16> to vector<1x8x256xf32>
    %cst = arith.constant dense<0.000000e+00> : vector<8x256xf32>
    %6 = vector.multi_reduction <add>, %5, %cst [0] : vector<1x8x256xf32> to vector<8x256xf32>
    %7 = arith.addf %3, %6 : vector<8x256xf32>
    %c0_5 = arith.constant 0 : index
    %c0_6 = arith.constant 0 : index
    %8 = vector.load %arg3[%c0_5, %c0_6] : memref<8x256xf32, #tpu.memory_space<vmem>>, vector<8x256xf32>
    tpu.vector_store %arg3[%c0_5, %c0_6], %7 {strides = array<i32>} : memref<8x256xf32, #tpu.memory_space<vmem>>, vector<8x256xf32>,
    %c0_i32_7 = arith.constant 0 : i32
    %9 = arith.cmpi eq, %arg0, %c0_i32_7 : i32
    %10 = arith.extui %9 : i1 to i32
    %c0_i32_8 = arith.constant 0 : i32
    %11 = arith.cmpi ne, %10, %c0_i32_8 : i32
    scf.if %11 {
      %c0_9 = arith.constant 0 : index
      %c0_10 = arith.constant 0 : index
      %12 = vector.load %arg3[%c0_9, %c0_10] : memref<8x256xf32, #tpu.memory_space<vmem>>, vector<8x256xf32>
      %cst_11 = arith.constant 1.000000e+00 : f32
      %13 = vector.broadcast %cst_11 : f32 to vector<8x256xf32>
      %14 = arith.mulf %12, %13 : vector<8x256xf32>
      %c0_12 = arith.constant 0 : index
      %c0_13 = arith.constant 0 : index
      %15 = vector.load %arg2[%c0_12, %c0_13] : memref<8x256xf32, #tpu.memory_space<vmem>>, vector<8x256xf32>
      tpu.vector_store %arg2[%c0_12, %c0_13], %14 {strides = array<i32>} : memref<8x256xf32, #tpu.memory_space<vmem>>, vector<8x256xf32>,
    } else {
    }
    return
  }
  func.func @transform_0(%arg0: i32) -> (i32, i32, i32) {
    %c0_i32 = arith.constant 0 : i32
    %c0_i32_0 = arith.constant 0 : i32
    %c0_i32_1 = arith.constant 0 : i32
    return %arg0, %c0_i32, %c0_i32_0 : i32, i32, i32
  }
  func.func @transform_1(%arg0: i32) -> (i32, i32) {
    %c0_i32 = arith.constant 0 : i32
    %c0_i32_0 = arith.constant 0 : i32
    %c0_i32_1 = arith.constant 0 : i32
    return %c0_i32, %c0_i32_0 : i32, i32
  }
}

</mosaic_0001>

<bundles_post_ra>
// kernel: _lambda_.21
= control target key start
LH: loop header
LB: loop body
LE: loop exit
PB: predicated region body
PF: predicated region fallthrough
CT: control target
= control target key end

     0   :  { %s1196_s0 = inlined_call_operand.vmem [shape: bf16[9,128,128], index: 0, kind: input, shape index: {}]   ;;  %s1197_s1 = inlined_call_operand.vmem [shape: bf16[128,128], index: 1, kind: output, shape index: {}]  }
   0x1   :  { %v541_v0 = vld [vmem:[%s1196_s0] sm:$0xff]   ;;  %v868_v16 = vld [vmem:[%s1196_s0 + $0x8] sm:$0xff]   ;;  %v869_v56 = vld [vmem:[%s1196_s0 + $0x10] sm:$0xff]  }
   0x2   :  { %v875_v1 = vld [vmem:[%s1196_s0 + $0x40] sm:$0xff]   ;;  %v542_v3 = vunpack.c.l.bf16 %v541_v0  ;;  %v543_v4 = vunpack.c.h.bf16 %v541_v0  ;;  %v876_v17 = vld [vmem:[%s1196_s0 + $0x48] sm:$0xff]   ;;  %v546_v28 = vunpack.c.l.bf16 %v868_v16  ;;  %v547_v29 = vunpack.c.h.bf16 %v868_v16  ;;  %v877_v61 = vld [vmem:[%s1196_s0 + $0x50] sm:$0xff]  }
   0x3   :  { %v883_v2 = vld [vmem:[%s1196_s0 + $0x80] sm:$0xff]   ;;  %v574_v5 = vunpack.c.l.bf16 %v875_v1  ;;  %v575_v6 = vunpack.c.h.bf16 %v875_v1  ;;  %v884_v26 = vld [vmem:[%s1196_s0 + $0x88] sm:$0xff]   ;;  %v578_v30 = vunpack.c.l.bf16 %v876_v17  ;;  %v579_v31 = vunpack.c.h.bf16 %v876_v17 }
   0x4   :  { %v891_v7 = vld [vmem:[%s1196_s0 + $0xc0] sm:$0xff]   ;;  %v606_v8 = vunpack.c.l.bf16 %v883_v2  ;;  %v607_v9 = vunpack.c.h.bf16 %v883_v2  ;;  %v892_v36 = vld [vmem:[%s1196_s0 + $0xc8] sm:$0xff]   ;;  %v610_v39 = vunpack.c.l.bf16 %v884_v26  ;;  %v611_v40 = vunpack.c.h.bf16 %v884_v26 }
   0x5   :  { %v899_v10 = vld [vmem:[%s1196_s0 + $0x100] sm:$0xff]   ;;  %v638_v12 = vunpack.c.l.bf16 %v891_v7  ;;  %v639_v13 = vunpack.c.h.bf16 %v891_v7  ;;  %v296_v14 = vmax.f32 %v542_v3, %v574_v5  ;;  %v304_v15 = vmax.f32 %v543_v4, %v575_v6  ;;  %v900_v41 = vld [vmem:[%s1196_s0 + $0x108] sm:$0xff]   ;;  %v885_v7 = vld [vmem:[%s1196_s0 + $0x90] sm:$0xff]  }
   0x6   :  { %v907_v11 = vld [vmem:[%s1196_s0 + $0x140] sm:$0xff]   ;;  %v670_v18 = vunpack.c.l.bf16 %v899_v10  ;;  %v671_v19 = vunpack.c.h.bf16 %v899_v10  ;;  %v908_v46 = vld [vmem:[%s1196_s0 + $0x148] sm:$0xff]   ;;  %v642_v47 = vunpack.c.l.bf16 %v892_v36  ;;  %v643_v48 = vunpack.c.h.bf16 %v892_v36 }
   0x7   :  { %v915_v20 = vld [vmem:[%s1196_s0 + $0x180] sm:$0xff]   ;;  %v702_v21 = vunpack.c.l.bf16 %v907_v11  ;;  %v703_v22 = vunpack.c.h.bf16 %v907_v11  ;;  %v297_v24 = vmax.f32 %v296_v14, %v606_v8  ;;  %v305_v25 = vmax.f32 %v304_v15, %v607_v9  ;;  %v916_v49 = vld [vmem:[%s1196_s0 + $0x188] sm:$0xff]  }
   0x8   :  { %v923_v23 = vld [vmem:[%s1196_s0 + $0x1c0] sm:$0xff]   ;;  %v734_v32 = vunpack.c.l.bf16 %v915_v20  ;;  %v735_v33 = vunpack.c.h.bf16 %v915_v20  ;;  %v312_v50 = vmax.f32 %v546_v28, %v578_v30  ;;  %v320_v51 = vmax.f32 %v547_v29, %v579_v31  ;;  %v924_v2 = vld [vmem:[%s1196_s0 + $0x1c8] sm:$0xff]   ;;  %v917_v30 = vld [vmem:[%s1196_s0 + $0x190] sm:$0xff]  }
   0x9   :  { %v931_v27 = vld [vmem:[%s1196_s0 + $0x200] sm:$0xff]   ;;  %v298_v34 = vmax.f32 %v297_v24, %v638_v12  ;;  %v306_v35 = vmax.f32 %v305_v25, %v639_v13  ;;  %v766_v37 = vunpack.c.l.bf16 %v923_v23  ;;  %v767_v38 = vunpack.c.h.bf16 %v923_v23  ;;  %v932_v10 = vld [vmem:[%s1196_s0 + $0x208] sm:$0xff]   ;;  %v893_v13 = vld [vmem:[%s1196_s0 + $0xd0] sm:$0xff]  }
   0xa   :  { %v798_v42 = vunpack.c.l.bf16 %v931_v27  ;;  %v799_v43 = vunpack.c.h.bf16 %v931_v27  ;;  %v674_v54 = vunpack.c.l.bf16 %v900_v41  ;;  %v675_v55 = vunpack.c.h.bf16 %v900_v41  ;;  %v909_v27 = vld [vmem:[%s1196_s0 + $0x150] sm:$0xff]  }
   0xb   :  { %v299_v44 = vmax.f32 %v298_v34, %v670_v18  ;;  %v307_v45 = vmax.f32 %v306_v35, %v671_v19  ;;  %v706_v57 = vunpack.c.l.bf16 %v908_v46  ;;  %v707_v58 = vunpack.c.h.bf16 %v908_v46 }
   0xc   :  { %v313_v59 = vmax.f32 %v312_v50, %v610_v39  ;;  %v321_v60 = vmax.f32 %v320_v51, %v611_v40  ;;  %v738_v0 = vunpack.c.l.bf16 %v916_v49  ;;  %v739_v1 = vunpack.c.h.bf16 %v916_v49 }
   0xd   :  { %v300_v52 = vmax.f32 %v299_v44, %v702_v21  ;;  %v308_v53 = vmax.f32 %v307_v45, %v703_v22  ;;  %v550_v5 = vunpack.c.l.bf16 %v869_v56  ;;  %v551_v6 = vunpack.c.h.bf16 %v869_v56  ;;  %v901_v22 = vld [vmem:[%s1196_s0 + $0x110] sm:$0xff]  }
   0xe   :  { %v314_v3 = vmax.f32 %v313_v59, %v642_v47  ;;  %v322_v4 = vmax.f32 %v321_v60, %v643_v48  ;;  %v582_v11 = vunpack.c.l.bf16 %v877_v61  ;;  %v583_v12 = vunpack.c.h.bf16 %v877_v61  ;;  %v925_v47 = vld [vmem:[%s1196_s0 + $0x1d0] sm:$0xff]  }
   0xf   :  { %v301_v62 = vmax.f32 %v300_v52, %v734_v32  ;;  %v309_v63 = vmax.f32 %v308_v53, %v735_v33  ;;  %v770_v14 = vunpack.c.l.bf16 %v924_v2  ;;  %v771_v15 = vunpack.c.h.bf16 %v924_v2  ;;  %v886_v52 = vld [vmem:[%s1196_s0 + $0x98] sm:$0xff]  }
  0x10   :  { %v315_v16 = vmax.f32 %v314_v3, %v674_v54  ;;  %v323_v17 = vmax.f32 %v322_v4, %v675_v55  ;;  %v614_v20 = vunpack.c.l.bf16 %v885_v7  ;;  %v615_v21 = vunpack.c.h.bf16 %v885_v7  ;;  %v933_v55 = vld [vmem:[%s1196_s0 + $0x210] sm:$0xff]   ;;  %v902_v3 = vld [vmem:[%s1196_s0 + $0x118] sm:$0xff]  }
  0x11   :  { %v302_v8 = vmax.f32 %v301_v62, %v766_v37  ;;  %v310_v9 = vmax.f32 %v309_v63, %v767_v38  ;;  %v802_v23 = vunpack.c.l.bf16 %v932_v10  ;;  %v646_v26 = vunpack.c.l.bf16 %v893_v13  ;;  %v870_v37 = vld [vmem:[%s1196_s0 + $0x18] sm:$0xff]  }
  0x12   :  { %v316_v24 = vmax.f32 %v315_v16, %v706_v57  ;;  %v324_v25 = vmax.f32 %v323_v17, %v707_v58  ;;  %v647_v29 = vunpack.c.h.bf16 %v893_v13  ;;  %v328_v31 = vmax.f32 %v550_v5, %v582_v11  ;;  %v894_v62 = vld [vmem:[%s1196_s0 + $0xd8] sm:$0xff]  }
  0x13   :  { %v303_v18 = vmax.f32 %v302_v8, %v798_v42  ;;  %v311_v19 = vmax.f32 %v310_v9, %v799_v43  ;;  %v336_v32 = vmax.f32 %v551_v6, %v583_v12  ;;  %v803_v33 = vunpack.c.h.bf16 %v932_v10  ;;  %v878_v42 = vld [vmem:[%s1196_s0 + $0x58] sm:$0xff]  }
  0x14   :  { %v317_v34 = vmax.f32 %v316_v24, %v738_v0  ;;  %v325_v35 = vmax.f32 %v324_v25, %v739_v1  ;;  %v678_v36 = vunpack.c.l.bf16 %v901_v22  ;;  %v679_v38 = vunpack.c.h.bf16 %v901_v22  ;;  %v910_v8 = vld [vmem:[%s1196_s0 + $0x158] sm:$0xff]  }
  0x15   :  { %v831_v28 = vpack.c.bf16 %v311_v19, %v303_v18  ;;  %v710_v39 = vunpack.c.l.bf16 %v909_v27  ;;  %v329_v40 = vmax.f32 %v328_v31, %v614_v20  ;;  %v337_v41 = vmax.f32 %v336_v32, %v615_v21  ;;  %v918_v11 = vld [vmem:[%s1196_s0 + $0x198] sm:$0xff]   ;;  %v871_v18 = vld [vmem:[%s1196_s0 + $0x20] sm:$0xff]  }
  0x16   :  { %v318_v43 = vmax.f32 %v317_v34, %v770_v14  ;;  %v326_v44 = vmax.f32 %v325_v35, %v771_v15  ;;  %v711_v45 = vunpack.c.h.bf16 %v909_v27  ;;  %v742_v46 = vunpack.c.l.bf16 %v917_v30  ;;  %v879_v19 = vld [vmem:[%s1196_s0 + $0x60] sm:$0xff]  }
  0x17   :  { %832 = vst [vmem:[%s1197_s1] sm:$0xff] %v831_v28   ;;  %v330_v48 = vmax.f32 %v329_v40, %v646_v26  ;;  %v338_v49 = vmax.f32 %v337_v41, %v647_v29  ;;  %v554_v50 = vunpack.c.l.bf16 %v870_v37  ;;  %v555_v51 = vunpack.c.h.bf16 %v870_v37  ;;  %v926_v28 = vld [vmem:[%s1196_s0 + $0x1d8] sm:$0xff]   ;;  %v887_v29 = vld [vmem:[%s1196_s0 + $0xa0] sm:$0xff]  }
  0x18   :  { %v319_v53 = vmax.f32 %v318_v43, %v802_v23  ;;  %v327_v54 = vmax.f32 %v326_v44, %v803_v33  ;;  %v586_v56 = vunpack.c.l.bf16 %v878_v42  ;;  %v587_v57 = vunpack.c.h.bf16 %v878_v42  ;;  %v903_v44 = vld [vmem:[%s1196_s0 + $0x120] sm:$0xff]  }
  0x19   :  { %v743_v58 = vunpack.c.h.bf16 %v917_v30  ;;  %v774_v59 = vunpack.c.l.bf16 %v925_v47  ;;  %v331_v60 = vmax.f32 %v330_v48, %v678_v36  ;;  %v339_v61 = vmax.f32 %v338_v49, %v679_v38  ;;  %v934_v30 = vld [vmem:[%s1196_s0 + $0x218] sm:$0xff]  }
  0x1a   :  { %v836_v63 = vpack.c.bf16 %v327_v54, %v319_v53  ;;  %v775_v0 = vunpack.c.h.bf16 %v925_v47  ;;  %v618_v1 = vunpack.c.l.bf16 %v886_v52  ;;  %v619_v2 = vunpack.c.h.bf16 %v886_v52  ;;  %v911_v52 = vld [vmem:[%s1196_s0 + $0x160] sm:$0xff]  }
  0x1b   :  { %v806_v4 = vunpack.c.l.bf16 %v933_v55  ;;  %v807_v5 = vunpack.c.h.bf16 %v933_v55  ;;  %v332_v6 = vmax.f32 %v331_v60, %v710_v39  ;;  %v340_v7 = vmax.f32 %v339_v61, %v711_v45  ;;  %v895_v39 = vld [vmem:[%s1196_s0 + $0xe0] sm:$0xff]  }
  0x1c   :  { %939 = vst [vmem:[%s1197_s1 + $0x8] sm:$0xff] %v836_v63   ;;  %v650_v9 = vunpack.c.l.bf16 %v894_v62  ;;  %v651_v10 = vunpack.c.h.bf16 %v894_v62  ;;  %v344_v12 = vmax.f32 %v554_v50, %v586_v56  ;;  %v352_v13 = vmax.f32 %v555_v51, %v587_v57  ;;  %v919_v53 = vld [vmem:[%s1196_s0 + $0x1a0] sm:$0xff]  }
  0x1d   :  { %v333_v14 = vmax.f32 %v332_v6, %v742_v46  ;;  %v341_v15 = vmax.f32 %v340_v7, %v743_v58  ;;  %v682_v16 = vunpack.c.l.bf16 %v902_v3  ;;  %v683_v17 = vunpack.c.h.bf16 %v902_v3  ;;  %v927_v7 = vld [vmem:[%s1196_s0 + $0x1e0] sm:$0xff]  }
  0x1e   :  { %v714_v20 = vunpack.c.l.bf16 %v910_v8  ;;  %v715_v21 = vunpack.c.h.bf16 %v910_v8  ;;  %v345_v22 = vmax.f32 %v344_v12, %v618_v1  ;;  %v353_v23 = vmax.f32 %v352_v13, %v619_v2 }
  0x1f   :  { %v334_v24 = vmax.f32 %v333_v14, %v774_v59  ;;  %v342_v25 = vmax.f32 %v341_v15, %v775_v0  ;;  %v746_v26 = vunpack.c.l.bf16 %v918_v11  ;;  %v747_v27 = vunpack.c.h.bf16 %v918_v11  ;;  %v872_v59 = vld [vmem:[%s1196_s0 + $0x28] sm:$0xff]  }
  0x20   :  { %v346_v31 = vmax.f32 %v345_v22, %v650_v9  ;;  %v354_v32 = vmax.f32 %v353_v23, %v651_v10  ;;  %v558_v33 = vunpack.c.l.bf16 %v871_v18  ;;  %v590_v34 = vunpack.c.l.bf16 %v879_v19  ;;  %v880_v0 = vld [vmem:[%s1196_s0 + $0x68] sm:$0xff]  }
  0x21   :  { %v335_v35 = vmax.f32 %v334_v24, %v806_v4  ;;  %v343_v36 = vmax.f32 %v342_v25, %v807_v5  ;;  %v559_v37 = vunpack.c.h.bf16 %v871_v18  ;;  %v591_v38 = vunpack.c.h.bf16 %v879_v19  ;;  %v888_v10 = vld [vmem:[%s1196_s0 + $0xa8] sm:$0xff]  }
  0x22   :  { %v778_v40 = vunpack.c.l.bf16 %v926_v28  ;;  %v347_v41 = vmax.f32 %v346_v31, %v682_v16  ;;  %v355_v42 = vmax.f32 %v354_v32, %v683_v17  ;;  %v622_v43 = vunpack.c.l.bf16 %v887_v29  ;;  %v896_v15 = vld [vmem:[%s1196_s0 + $0xe8] sm:$0xff]  }
  0x23   :  { %v841_v45 = vpack.c.bf16 %v343_v36, %v335_v35  ;;  %v779_v46 = vunpack.c.h.bf16 %v926_v28  ;;  %v810_v47 = vunpack.c.l.bf16 %v934_v30  ;;  %v623_v48 = vunpack.c.h.bf16 %v887_v29  ;;  %v904_v25 = vld [vmem:[%s1196_s0 + $0x128] sm:$0xff]  }
  0x24   :  { %v348_v49 = vmax.f32 %v347_v41, %v714_v20  ;;  %v356_v50 = vmax.f32 %v355_v42, %v715_v21  ;;  %v654_v51 = vunpack.c.l.bf16 %v895_v39  ;;  %v360_v54 = vmax.f32 %v558_v33, %v590_v34  ;;  %v935_v21 = vld [vmem:[%s1196_s0 + $0x220] sm:$0xff]   ;;  %v912_v32 = vld [vmem:[%s1196_s0 + $0x168] sm:$0xff]  }
  0x25   :  { %940 = vst [vmem:[%s1197_s1 + $0x10] sm:$0xff] %v841_v45   ;;  %v811_v55 = vunpack.c.h.bf16 %v934_v30  ;;  %v655_v56 = vunpack.c.h.bf16 %v895_v39  ;;  %v686_v57 = vunpack.c.l.bf16 %v903_v44  ;;  %v368_v58 = vmax.f32 %v559_v37, %v591_v38  ;;  %v920_v33 = vld [vmem:[%s1196_s0 + $0x1a8] sm:$0xff]   ;;  %v881_v45 = vld [vmem:[%s1196_s0 + $0x70] sm:$0xff]  }
  0x26   :  { %v349_v60 = vmax.f32 %v348_v49, %v746_v26  ;;  %v357_v61 = vmax.f32 %v356_v50, %v747_v27  ;;  %v687_v62 = vunpack.c.h.bf16 %v903_v44  ;;  %v361_v63 = vmax.f32 %v360_v54, %v622_v43 }
  0x27   :  { %v718_v1 = vunpack.c.l.bf16 %v911_v52  ;;  %v719_v2 = vunpack.c.h.bf16 %v911_v52  ;;  %v750_v3 = vunpack.c.l.bf16 %v919_v53  ;;  %v369_v4 = vmax.f32 %v368_v58, %v623_v48 }
  0x28   :  { %v350_v5 = vmax.f32 %v349_v60, %v778_v40  ;;  %v358_v6 = vmax.f32 %v357_v61, %v779_v46  ;;  %v362_v8 = vmax.f32 %v361_v63, %v654_v51  ;;  %v562_v9 = vunpack.c.l.bf16 %v872_v59  ;;  %v873_v40 = vld [vmem:[%s1196_s0 + $0x30] sm:$0xff]   ;;  %v928_v51 = vld [vmem:[%s1196_s0 + $0x1e8] sm:$0xff]  }
  0x29   :  { %v370_v11 = vmax.f32 %v369_v4, %v655_v56  ;;  %v563_v12 = vunpack.c.h.bf16 %v872_v59  ;;  %v594_v13 = vunpack.c.l.bf16 %v880_v0  ;;  %v595_v14 = vunpack.c.h.bf16 %v880_v0  ;;  %v897_v0 = vld [vmem:[%s1196_s0 + $0xf0] sm:$0xff]  }
  0x2a   :  { %v351_v16 = vmax.f32 %v350_v5, %v810_v47  ;;  %v359_v17 = vmax.f32 %v358_v6, %v811_v55  ;;  %v751_v18 = vunpack.c.h.bf16 %v919_v53  ;;  %v363_v19 = vmax.f32 %v362_v8, %v686_v57  ;;  %v889_v55 = vld [vmem:[%s1196_s0 + $0xb0] sm:$0xff]  }
  0x2b   :  { %v782_v20 = vunpack.c.l.bf16 %v927_v7  ;;  %v371_v22 = vmax.f32 %v370_v11, %v687_v62  ;;  %v626_v23 = vunpack.c.l.bf16 %v888_v10  ;;  %v627_v24 = vunpack.c.h.bf16 %v888_v10 }
  0x2c   :  { %v846_v26 = vpack.c.bf16 %v359_v17, %v351_v16  ;;  %v783_v27 = vunpack.c.h.bf16 %v927_v7  ;;  %v364_v28 = vmax.f32 %v363_v19, %v718_v1  ;;  %v658_v29 = vunpack.c.l.bf16 %v896_v15  ;;  %v874_v19 = vld [vmem:[%s1196_s0 + $0x38] sm:$0xff]  }
  0x2d   :  { %v372_v30 = vmax.f32 %v371_v22, %v719_v2  ;;  %v659_v31 = vunpack.c.h.bf16 %v896_v15  ;;  %v376_v34 = vmax.f32 %v562_v9, %v594_v13  ;;  %v384_v35 = vmax.f32 %v563_v12, %v595_v14  ;;  %v936_v2 = vld [vmem:[%s1196_s0 + $0x228] sm:$0xff]   ;;  %v905_v9 = vld [vmem:[%s1196_s0 + $0x130] sm:$0xff]  }
  0x2e   :  { %941 = vst [vmem:[%s1197_s1 + $0x18] sm:$0xff] %v846_v26   ;;  %v814_v36 = vunpack.c.l.bf16 %v935_v21  ;;  %v815_v37 = vunpack.c.h.bf16 %v935_v21  ;;  %v365_v38 = vmax.f32 %v364_v28, %v750_v3  ;;  %v690_v39 = vunpack.c.l.bf16 %v904_v25  ;;  %v913_v12 = vld [vmem:[%s1196_s0 + $0x170] sm:$0xff]  }
  0x2f   :  { %v373_v41 = vmax.f32 %v372_v30, %v751_v18  ;;  %v691_v42 = vunpack.c.h.bf16 %v904_v25  ;;  %v377_v43 = vmax.f32 %v376_v34, %v626_v23  ;;  %v385_v44 = vmax.f32 %v384_v35, %v627_v24  ;;  %v882_v24 = vld [vmem:[%s1196_s0 + $0x78] sm:$0xff]  }
  0x30   :  { %v366_v46 = vmax.f32 %v365_v38, %v782_v20  ;;  %v722_v47 = vunpack.c.l.bf16 %v912_v32  ;;  %v723_v48 = vunpack.c.h.bf16 %v912_v32  ;;  %v754_v49 = vunpack.c.l.bf16 %v920_v33  ;;  %v890_v34 = vld [vmem:[%s1196_s0 + $0xb8] sm:$0xff]  }
  0x31   :  { %v374_v50 = vmax.f32 %v373_v41, %v783_v27  ;;  %v378_v52 = vmax.f32 %v377_v43, %v658_v29  ;;  %v386_v53 = vmax.f32 %v385_v44, %v659_v31  ;;  %v566_v54 = vunpack.c.l.bf16 %v873_v40  ;;  %v921_v29 = vld [vmem:[%s1196_s0 + $0x1b0] sm:$0xff]   ;;  %v898_v44 = vld [vmem:[%s1196_s0 + $0xf8] sm:$0xff]  }
  0x32   :  { %v367_v56 = vmax.f32 %v366_v46, %v814_v36  ;;  %v567_v57 = vunpack.c.h.bf16 %v873_v40  ;;  %v598_v58 = vunpack.c.l.bf16 %v881_v45  ;;  %v599_v59 = vunpack.c.h.bf16 %v881_v45  ;;  %v937_v46 = vld [vmem:[%s1196_s0 + $0x230] sm:$0xff]  }
  0x33   :  { %v375_v60 = vmax.f32 %v374_v50, %v815_v37  ;;  %v755_v61 = vunpack.c.h.bf16 %v920_v33  ;;  %v379_v62 = vmax.f32 %v378_v52, %v690_v39  ;;  %v387_v63 = vmax.f32 %v386_v53, %v691_v42  ;;  %v929_v37 = vld [vmem:[%s1196_s0 + $0x1f0] sm:$0xff]   ;;  %v906_v53 = vld [vmem:[%s1196_s0 + $0x138] sm:$0xff]  }
  0x34   :  { %v786_v1 = vunpack.c.l.bf16 %v928_v51  ;;  %v630_v3 = vunpack.c.l.bf16 %v889_v55  ;;  %v631_v4 = vunpack.c.h.bf16 %v889_v55  ;;  %v787_v6 = vunpack.c.h.bf16 %v928_v51 }
  0x35   :  { %v851_v5 = vpack.c.bf16 %v375_v60, %v367_v56  ;;  %v380_v7 = vmax.f32 %v379_v62, %v722_v47  ;;  %v388_v8 = vmax.f32 %v387_v63, %v723_v48  ;;  %v662_v10 = vunpack.c.l.bf16 %v897_v0  ;;  %v914_v62 = vld [vmem:[%s1196_s0 + $0x178] sm:$0xff]  }
  0x36   :  { %v663_v11 = vunpack.c.h.bf16 %v897_v0  ;;  %v392_v13 = vmax.f32 %v566_v54, %v598_v58  ;;  %v400_v14 = vmax.f32 %v567_v57, %v599_v59  ;;  %v818_v15 = vunpack.c.l.bf16 %v936_v2 }
  0x37   :  { %942 = vst [vmem:[%s1197_s1 + $0x20] sm:$0xff] %v851_v5   ;;  %v819_v16 = vunpack.c.h.bf16 %v936_v2  ;;  %v381_v17 = vmax.f32 %v380_v7, %v754_v49  ;;  %v389_v18 = vmax.f32 %v388_v8, %v755_v61  ;;  %v694_v20 = vunpack.c.l.bf16 %v905_v9  ;;  %v922_v5 = vld [vmem:[%s1196_s0 + $0x1b8] sm:$0xff]  }
  0x38   :  { %v695_v21 = vunpack.c.h.bf16 %v905_v9  ;;  %v393_v22 = vmax.f32 %v392_v13, %v630_v3  ;;  %v401_v23 = vmax.f32 %v400_v14, %v631_v4  ;;  %v726_v27 = vunpack.c.l.bf16 %v913_v12 }
  0x39   :  { %v382_v25 = vmax.f32 %v381_v17, %v786_v1  ;;  %v390_v26 = vmax.f32 %v389_v18, %v787_v6  ;;  %v727_v28 = vunpack.c.h.bf16 %v913_v12  ;;  %v570_v32 = vunpack.c.l.bf16 %v874_v19  ;;  %v930_v12 = vld [vmem:[%s1196_s0 + $0x1f8] sm:$0xff]  }
  0x3a   :  { %v394_v30 = vmax.f32 %v393_v22, %v662_v10  ;;  %v402_v31 = vmax.f32 %v401_v23, %v663_v11  ;;  %v571_v33 = vunpack.c.h.bf16 %v874_v19  ;;  %v602_v38 = vunpack.c.l.bf16 %v882_v24  ;;  %v938_v18 = vld [vmem:[%s1196_s0 + $0x238] sm:$0xff]  }
  0x3b   :  { %v383_v35 = vmax.f32 %v382_v25, %v818_v15  ;;  %v391_v36 = vmax.f32 %v390_v26, %v819_v16  ;;  %v603_v39 = vunpack.c.h.bf16 %v882_v24  ;;  %v758_v40 = vunpack.c.l.bf16 %v921_v29 }
  0x3c   :  { %v759_v41 = vunpack.c.h.bf16 %v921_v29  ;;  %v395_v42 = vmax.f32 %v394_v30, %v694_v20  ;;  %v403_v43 = vmax.f32 %v402_v31, %v695_v21  ;;  %v634_v47 = vunpack.c.l.bf16 %v890_v34 }
  0x3d   :  { %v856_v45 = vpack.c.bf16 %v391_v36, %v383_v35  ;;  %v635_v48 = vunpack.c.h.bf16 %v890_v34  ;;  %v790_v49 = vunpack.c.l.bf16 %v929_v37  ;;  %v791_v50 = vunpack.c.h.bf16 %v929_v37 }
  0x3e   :  { %v396_v51 = vmax.f32 %v395_v42, %v726_v27  ;;  %v404_v52 = vmax.f32 %v403_v43, %v727_v28  ;;  %v666_v54 = vunpack.c.l.bf16 %v898_v44  ;;  %v667_v55 = vunpack.c.h.bf16 %v898_v44 }
  0x3f   :  { %943 = vst [vmem:[%s1197_s1 + $0x28] sm:$0xff] %v856_v45   ;;  %v408_v56 = vmax.f32 %v570_v32, %v602_v38  ;;  %v416_v57 = vmax.f32 %v571_v33, %v603_v39  ;;  %v822_v58 = vunpack.c.l.bf16 %v937_v46  ;;  %v823_v59 = vunpack.c.h.bf16 %v937_v46 }
  0x40   :  { %v397_v60 = vmax.f32 %v396_v51, %v758_v40  ;;  %v405_v61 = vmax.f32 %v404_v52, %v759_v41  ;;  %v698_v63 = vunpack.c.l.bf16 %v906_v53  ;;  %v699_v0 = vunpack.c.h.bf16 %v906_v53 }
  0x41   :  { %v409_v1 = vmax.f32 %v408_v56, %v634_v47  ;;  %v417_v2 = vmax.f32 %v416_v57, %v635_v48  ;;  %v730_v6 = vunpack.c.l.bf16 %v914_v62  ;;  %v731_v7 = vunpack.c.h.bf16 %v914_v62 }
  0x42   :  { %v398_v3 = vmax.f32 %v397_v60, %v790_v49  ;;  %v406_v4 = vmax.f32 %v405_v61, %v791_v50  ;;  %v762_v13 = vunpack.c.l.bf16 %v922_v5  ;;  %v763_v14 = vunpack.c.h.bf16 %v922_v5 }
  0x43   :  { %v410_v8 = vmax.f32 %v409_v1, %v666_v54  ;;  %v418_v9 = vmax.f32 %v417_v2, %v667_v55  ;;  %v794_v19 = vunpack.c.l.bf16 %v930_v12  ;;  %v795_v20 = vunpack.c.h.bf16 %v930_v12 }
  0x44   :  { %v399_v10 = vmax.f32 %v398_v3, %v822_v58  ;;  %v407_v11 = vmax.f32 %v406_v4, %v823_v59  ;;  %v826_v23 = vunpack.c.l.bf16 %v938_v18  ;;  %v827_v24 = vunpack.c.h.bf16 %v938_v18 }
  0x45   :  { %v411_v15 = vmax.f32 %v410_v8, %v698_v63  ;;  %v419_v16 = vmax.f32 %v418_v9, %v699_v0 }
  0x46   :  { %v861_v17 = vpack.c.bf16 %v407_v11, %v399_v10 }
  0x47   :  { %v412_v21 = vmax.f32 %v411_v15, %v730_v6  ;;  %v420_v22 = vmax.f32 %v419_v16, %v731_v7 }
  0x48   :  { %944 = vst [vmem:[%s1197_s1 + $0x30] sm:$0xff] %v861_v17  }
  0x49   :  { %v413_v25 = vmax.f32 %v412_v21, %v762_v13  ;;  %v421_v26 = vmax.f32 %v420_v22, %v763_v14 }
  0x4b   :  { %v414_v27 = vmax.f32 %v413_v25, %v794_v19  ;;  %v422_v28 = vmax.f32 %v421_v26, %v795_v20 }
  0x4d   :  { %v415_v29 = vmax.f32 %v414_v27, %v826_v23  ;;  %v423_v30 = vmax.f32 %v422_v28, %v827_v24 }
  0x4f   :  { %v866_v31 = vpack.c.bf16 %v423_v30, %v415_v29 }
  0x51   :  { %945 = vst [vmem:[%s1197_s1 + $0x38] sm:$0xff] %v866_v31  }

// kernel: _lambda_.20
= control target key start
LH: loop header
LB: loop body
LE: loop exit
PB: predicated region body
PF: predicated region fallthrough
CT: control target
= control target key end

     0   :  { %s2251_s1 = inlined_call_operand.vmem [shape: bf16[128,128], index: 1, kind: input, shape index: {}]   ;;  %s2252_s0 = inlined_call_operand.vmem [shape: bf16[512,128], index: 0, kind: input, shape index: {}]   ;;  %s2253_s2 = inlined_call_operand.vmem [shape: f32[1,128], index: 2, kind: input, shape index: {}]   ;;  %s2254_s3 = inlined_call_operand.vmem [shape: bf16[512,128], index: 3, kind: output, shape index: {}]  }
   0x1   :  { %v1906_v0 = vld [vmem:[%s2251_s1] sm:$0xff]   ;;  %v1907_v1 = vld [vmem:[%s2251_s1 + $0x8] sm:$0xff]   ;;  %v1908_v2 = vld [vmem:[%s2251_s1 + $0x10] sm:$0xff]  }
   0x2   :  { %1810 = vmatprep.subr.bf16.mxu0 %v1906_v0  ;;  %1890 = vmatprep.subr.bf16.mxu1 %v1906_v0  ;;  %v1909_v3 = vld [vmem:[%s2251_s1 + $0x18] sm:$0xff]   ;;  %v1914_v4 = vld [vmem:[%s2252_s0] sm:$0xff]   ;;  %v1911_v7 = vld [vmem:[%s2251_s1 + $0x28] sm:$0xff]  }
   0x3   :  { %1811 = vmatpush3.bf16.msra.mxu0 %v1906_v0  ;;  %1898 = vmatpush3.bf16.msra.mxu1 %v1906_v0  ;;  %v1915_v5 = vld [vmem:[%s2252_s0 + $0x80] sm:$0xff]   ;;  %v1912_v8 = vld [vmem:[%s2251_s1 + $0x30] sm:$0xff]   ;;  %v1913_v9 = vld [vmem:[%s2251_s1 + $0x38] sm:$0xff]  }
   0x4   :  { %1812 = vmatprep.subr.bf16.mxu0 %v1907_v1  ;;  %1891 = vmatprep.subr.bf16.mxu1 %v1907_v1  ;;  %v1910_v6 = vld [vmem:[%s2251_s1 + $0x20] sm:$0xff]   ;;  %v1916_v10 = vld [vmem:[%s2252_s0 + $0x8] sm:$0xff]   ;;  %v1918_v12 = vld [vmem:[%s2252_s0 + $0x10] sm:$0xff]  }
   0x5   :  { %1826 = vmatprep.mubr.bf16.mxu0 %v1914_v4  ;;  %1858 = vmatprep.mubr.bf16.mxu1 %v1915_v5  ;;  %v1917_v11 = vld [vmem:[%s2252_s0 + $0x88] sm:$0xff]   ;;  %v1919_v13 = vld [vmem:[%s2252_s0 + $0x90] sm:$0xff]   ;;  %v1920_v14 = vld [vmem:[%s2252_s0 + $0x18] sm:$0xff]  }
   0x6   :  { %v1921_v15 = vld [vmem:[%s2252_s0 + $0x98] sm:$0xff]   ;;  %v1922_v16 = vld [vmem:[%s2252_s0 + $0x20] sm:$0xff]   ;;  %v1924_v18 = vld [vmem:[%s2252_s0 + $0x28] sm:$0xff]  }
   0x7   :  { %1813 = vmatpush3.bf16.msra.mxu0 %v1907_v1  ;;  %1899 = vmatpush3.bf16.msra.mxu1 %v1907_v1  ;;  %v1923_v17 = vld [vmem:[%s2252_s0 + $0xa0] sm:$0xff]   ;;  %v1925_v19 = vld [vmem:[%s2252_s0 + $0xa8] sm:$0xff]   ;;  %v1926_v20 = vld [vmem:[%s2252_s0 + $0x30] sm:$0xff]  }
   0x8   :  { %1814 = vmatprep.subr.bf16.mxu0 %v1908_v2  ;;  %1892 = vmatprep.subr.bf16.mxu1 %v1908_v2  ;;  %v1927_v21 = vld [vmem:[%s2252_s0 + $0xb0] sm:$0xff]   ;;  %v1928_v22 = vld [vmem:[%s2252_s0 + $0x38] sm:$0xff]   ;;  %v1930_v24 = vld [vmem:[%s2252_s0 + $0x40] sm:$0xff]  }
   0x9   :  { %v1929_v23 = vld [vmem:[%s2252_s0 + $0xb8] sm:$0xff]   ;;  %v1931_v25 = vld [vmem:[%s2252_s0 + $0xc0] sm:$0xff]   ;;  %v1932_v26 = vld [vmem:[%s2252_s0 + $0x48] sm:$0xff]  }
   0xa   :  { %v1933_v27 = vld [vmem:[%s2252_s0 + $0xc8] sm:$0xff]   ;;  %v1934_v28 = vld [vmem:[%s2252_s0 + $0x50] sm:$0xff]   ;;  %v1936_v30 = vld [vmem:[%s2252_s0 + $0x58] sm:$0xff]  }
   0xb   :  { %1815 = vmatpush3.bf16.msra.mxu0 %v1908_v2  ;;  %1900 = vmatpush3.bf16.msra.mxu1 %v1908_v2  ;;  %v1935_v29 = vld [vmem:[%s2252_s0 + $0xd0] sm:$0xff]   ;;  %v1937_v31 = vld [vmem:[%s2252_s0 + $0xd8] sm:$0xff]   ;;  %v1938_v32 = vld [vmem:[%s2252_s0 + $0x60] sm:$0xff]  }
   0xc   :  { %1816 = vmatprep.subr.bf16.mxu0 %v1909_v3  ;;  %1893 = vmatprep.subr.bf16.mxu1 %v1909_v3  ;;  %v1939_v33 = vld [vmem:[%s2252_s0 + $0xe0] sm:$0xff]   ;;  %v1940_v34 = vld [vmem:[%s2252_s0 + $0x68] sm:$0xff]   ;;  %v1942_v36 = vld [vmem:[%s2252_s0 + $0x70] sm:$0xff]  }
   0xd   :  { %v1941_v35 = vld [vmem:[%s2252_s0 + $0xe8] sm:$0xff]   ;;  %v1943_v37 = vld [vmem:[%s2252_s0 + $0xf0] sm:$0xff]   ;;  %v1944_v38 = vld [vmem:[%s2252_s0 + $0x78] sm:$0xff]  }
   0xe   :  { %v1945_v39 = vld [vmem:[%s2252_s0 + $0xf8] sm:$0xff]   ;;  %v2089_v40 = vld [vmem:[%s2253_s2] ss:$0 sm:$0xff] }
   0xf   :  { %1817 = vmatpush3.bf16.msra.mxu0 %v1909_v3  ;;  %1901 = vmatpush3.bf16.msra.mxu1 %v1909_v3 }
  0x10   :  { %1818 = vmatprep.subr.bf16.mxu0 %v1910_v6  ;;  %1894 = vmatprep.subr.bf16.mxu1 %v1910_v6 }
  0x13   :  { %1819 = vmatpush3.bf16.msra.mxu0 %v1910_v6  ;;  %1902 = vmatpush3.bf16.msra.mxu1 %v1910_v6 }
  0x14   :  { %1820 = vmatprep.subr.bf16.mxu0 %v1911_v7  ;;  %1895 = vmatprep.subr.bf16.mxu1 %v1911_v7 }
  0x17   :  { %1821 = vmatpush3.bf16.msra.mxu0 %v1911_v7  ;;  %1903 = vmatpush3.bf16.msra.mxu1 %v1911_v7 }
  0x18   :  { %1822 = vmatprep.subr.bf16.mxu0 %v1912_v8  ;;  %1896 = vmatprep.subr.bf16.mxu1 %v1912_v8 }
  0x1b   :  { %1823 = vmatpush3.bf16.msra.mxu0 %v1912_v8  ;;  %1904 = vmatpush3.bf16.msra.mxu1 %v1912_v8 }
  0x1c   :  { %1824 = vmatprep.subr.bf16.mxu0 %v1913_v9  ;;  %1897 = vmatprep.subr.bf16.mxu1 %v1913_v9 }
  0x1f   :  { %1825 = vmatpush3.bf16.msra.mxu0 %v1913_v9  ;;  %1905 = vmatpush3.bf16.msra.mxu1 %v1913_v9 }
  0x22   :  { %1827 = vmatmul.mubr.bf16.vlgmr.msra.gmra.mrb[0].mxu0 %v1916_v10  ;;  %1859 = vmatmul.mubr.bf16.vlgmr.msra.gmra.mrb[0].mxu1 %v1917_v11 }
  0x23   :  { %1830 = vmatprep.mubr.bf16.mxu0 %v1918_v12  ;;  %1862 = vmatprep.mubr.bf16.mxu1 %v1919_v13 }
  0x2a   :  { %1831 = vmatmul.mubr.bf16.gmra.mrb[4].mxu0 %v1920_v14  ;;  %1863 = vmatmul.mubr.bf16.gmra.mrb[4].mxu1 %v1921_v15 }
  0x2b   :  { %1834 = vmatprep.mubr.bf16.mxu0 %v1922_v16  ;;  %1866 = vmatprep.mubr.bf16.mxu1 %v1923_v17 }
  0x32   :  { %1835 = vmatmul.mubr.bf16.gmra.mrb[8].mxu0 %v1924_v18  ;;  %1867 = vmatmul.mubr.bf16.gmra.mrb[8].mxu1 %v1925_v19 }
  0x33   :  { %1838 = vmatprep.mubr.bf16.mxu0 %v1926_v20  ;;  %1870 = vmatprep.mubr.bf16.mxu1 %v1927_v21 }
  0x3a   :  { %1839 = vmatmul.mubr.bf16.gmra.mrb[12].mxu0 %v1928_v22  ;;  %1871 = vmatmul.mubr.bf16.gmra.mrb[12].mxu1 %v1929_v23 }
  0x3b   :  { %1842 = vmatprep.mubr.bf16.mxu0 %v1930_v24  ;;  %1874 = vmatprep.mubr.bf16.mxu1 %v1931_v25 }
  0x42   :  { %1843 = vmatmul.mubr.bf16.gmra.mrb[16].mxu0 %v1932_v26  ;;  %1875 = vmatmul.mubr.bf16.gmra.mrb[16].mxu1 %v1933_v27 }
  0x43   :  { %1846 = vmatprep.mubr.bf16.mxu0 %v1934_v28  ;;  %1878 = vmatprep.mubr.bf16.mxu1 %v1935_v29 }
  0x4a   :  { %1847 = vmatmul.mubr.bf16.gmra.mrb[20].mxu0 %v1936_v30  ;;  %1879 = vmatmul.mubr.bf16.gmra.mrb[20].mxu1 %v1937_v31 }
  0x4b   :  { %1850 = vmatprep.mubr.bf16.mxu0 %v1938_v32  ;;  %1882 = vmatprep.mubr.bf16.mxu1 %v1939_v33 }
  0x52   :  { %1851 = vmatmul.mubr.bf16.gmra.mrb[24].mxu0 %v1940_v34  ;;  %1883 = vmatmul.mubr.bf16.gmra.mrb[24].mxu1 %v1941_v35 }
  0x53   :  { %1854 = vmatprep.mubr.bf16.mxu0 %v1942_v36  ;;  %1886 = vmatprep.mubr.bf16.mxu1 %v1943_v37 }
  0x5a   :  { %1855 = vmatmul.mubr.bf16.gmra.mrb[28].mxu0 %v1944_v38  ;;  %1887 = vmatmul.mubr.bf16.gmra.mrb[28].mxu1 %v1945_v39 }
  0xf5   :  { %v1828_v41 = vpop.f32.mrb[0].mxu0  ;;  %v1860_v42 = vpop.f32.mrb[0].mxu1 }
  0xf6   :  { %v960_v43 = vadd.f32 %v1828_v41, %v2089_v40  ;;  %v992_v44 = vadd.f32 %v1860_v42, %v2089_v40  ;;  %v501_v45 = vpop.f32.mrb[1].mxu0  ;;  %v629_v46 = vpop.f32.mrb[1].mxu1 }
  0xf7   :  { %v958_v47 = vadd.f32 %v2089_v40, %v501_v45  ;;  %v990_v48 = vadd.f32 %v2089_v40, %v629_v46  ;;  %v1829_v49 = vpop.f32.mrb[2].mxu0  ;;  %v1861_v50 = vpop.f32.mrb[2].mxu1 }
  0xf8   :  { %v961_v51 = vadd.f32 %v1829_v49, %v2089_v40  ;;  %v993_v52 = vadd.f32 %v1861_v50, %v2089_v40  ;;  %v504_v53 = vpop.f32.mrb[3].mxu0  ;;  %v632_v54 = vpop.f32.mrb[3].mxu1  ;;  %v1024_v57 = vmax.f32 %v960_v43, 0.0  ;;  %v1056_v58 = vmax.f32 %v992_v44, 0.0 }
  0xf9   :  { %v959_v55 = vadd.f32 %v2089_v40, %v504_v53  ;;  %v991_v56 = vadd.f32 %v2089_v40, %v632_v54  ;;  %v1022_v61 = vmax.f32 %v958_v47, 0.0  ;;  %v1054_v62 = vmax.f32 %v990_v48, 0.0 }
  0xfa   :  { %v1025_v59 = vmax.f32 %v961_v51, 0.0  ;;  %v1057_v60 = vmax.f32 %v993_v52, 0.0 }
  0xfb   :  { %v1023_v63 = vmax.f32 %v959_v55, 0.0  ;;  %v1055_v0 = vmax.f32 %v991_v56, 0.0 }
  0xfc   :  { %v1587_v1 = vpack.c.bf16 %v1025_v59, %v1024_v57  ;;  %v1667_v2 = vpack.c.bf16 %v1057_v60, %v1056_v58 }
  0xfd   :  { %v1582_v3 = vpack.c.bf16 %v1023_v63, %v1022_v61  ;;  %v1662_v4 = vpack.c.bf16 %v1055_v0, %v1054_v62  ;;  %v1832_v5 = vpop.f32.mrb[4].mxu0  ;;  %v1864_v6 = vpop.f32.mrb[4].mxu1 }
  0xfe   :  { %1739 = vst [vmem:[%s2254_s3 + $0x8] sm:$0xff] %v1587_v1   ;;  %1755 = vst [vmem:[%s2254_s3 + $0x88] sm:$0xff] %v1667_v2   ;;  %v964_v7 = vadd.f32 %v1832_v5, %v2089_v40  ;;  %v996_v8 = vadd.f32 %v1864_v6, %v2089_v40  ;;  %v517_v9 = vpop.f32.mrb[5].mxu0  ;;  %v645_v10 = vpop.f32.mrb[5].mxu1 }
  0xff   :  { %1583 = vst [vmem:[%s2254_s3] sm:$0xff] %v1582_v3   ;;  %1754 = vst [vmem:[%s2254_s3 + $0x80] sm:$0xff] %v1662_v4   ;;  %v962_v11 = vadd.f32 %v2089_v40, %v517_v9  ;;  %v994_v12 = vadd.f32 %v2089_v40, %v645_v10  ;;  %v1833_v13 = vpop.f32.mrb[6].mxu0  ;;  %v1865_v14 = vpop.f32.mrb[6].mxu1 }
 0x100   :  { %v965_v15 = vadd.f32 %v1833_v13, %v2089_v40  ;;  %v997_v16 = vadd.f32 %v1865_v14, %v2089_v40  ;;  %v520_v17 = vpop.f32.mrb[7].mxu0  ;;  %v648_v18 = vpop.f32.mrb[7].mxu1  ;;  %v1028_v21 = vmax.f32 %v964_v7, 0.0  ;;  %v1060_v22 = vmax.f32 %v996_v8, 0.0 }
 0x101   :  { %v963_v19 = vadd.f32 %v2089_v40, %v520_v17  ;;  %v995_v20 = vadd.f32 %v2089_v40, %v648_v18  ;;  %v1026_v25 = vmax.f32 %v962_v11, 0.0  ;;  %v1058_v26 = vmax.f32 %v994_v12, 0.0 }
 0x102   :  { %v1029_v23 = vmax.f32 %v965_v15, 0.0  ;;  %v1061_v24 = vmax.f32 %v997_v16, 0.0 }
 0x103   :  { %v1027_v27 = vmax.f32 %v963_v19, 0.0  ;;  %v1059_v28 = vmax.f32 %v995_v20, 0.0 }
 0x104   :  { %v1597_v29 = vpack.c.bf16 %v1029_v23, %v1028_v21  ;;  %v1677_v30 = vpack.c.bf16 %v1061_v24, %v1060_v22 }
 0x105   :  { %v1592_v31 = vpack.c.bf16 %v1027_v27, %v1026_v25  ;;  %v1672_v32 = vpack.c.bf16 %v1059_v28, %v1058_v26  ;;  %v1836_v33 = vpop.f32.mrb[8].mxu0  ;;  %v1868_v34 = vpop.f32.mrb[8].mxu1 }
 0x106   :  { %1741 = vst [vmem:[%s2254_s3 + $0x18] sm:$0xff] %v1597_v29   ;;  %1757 = vst [vmem:[%s2254_s3 + $0x98] sm:$0xff] %v1677_v30   ;;  %v968_v35 = vadd.f32 %v1836_v33, %v2089_v40  ;;  %v1000_v36 = vadd.f32 %v1868_v34, %v2089_v40  ;;  %v533_v37 = vpop.f32.mrb[9].mxu0  ;;  %v661_v38 = vpop.f32.mrb[9].mxu1 }
 0x107   :  { %1740 = vst [vmem:[%s2254_s3 + $0x10] sm:$0xff] %v1592_v31   ;;  %1756 = vst [vmem:[%s2254_s3 + $0x90] sm:$0xff] %v1672_v32   ;;  %v966_v39 = vadd.f32 %v2089_v40, %v533_v37  ;;  %v998_v41 = vadd.f32 %v2089_v40, %v661_v38  ;;  %v1837_v42 = vpop.f32.mrb[10].mxu0  ;;  %v1869_v43 = vpop.f32.mrb[10].mxu1 }
 0x108   :  { %v969_v44 = vadd.f32 %v1837_v42, %v2089_v40  ;;  %v1001_v45 = vadd.f32 %v1869_v43, %v2089_v40  ;;  %v536_v46 = vpop.f32.mrb[11].mxu0  ;;  %v664_v47 = vpop.f32.mrb[11].mxu1  ;;  %v1032_v50 = vmax.f32 %v968_v35, 0.0  ;;  %v1064_v51 = vmax.f32 %v1000_v36, 0.0 }
 0x109   :  { %v967_v48 = vadd.f32 %v2089_v40, %v536_v46  ;;  %v999_v49 = vadd.f32 %v2089_v40, %v664_v47  ;;  %v1030_v54 = vmax.f32 %v966_v39, 0.0  ;;  %v1062_v55 = vmax.f32 %v998_v41, 0.0 }
 0x10a   :  { %v1033_v52 = vmax.f32 %v969_v44, 0.0  ;;  %v1065_v53 = vmax.f32 %v1001_v45, 0.0 }
 0x10b   :  { %v1031_v56 = vmax.f32 %v967_v48, 0.0  ;;  %v1063_v57 = vmax.f32 %v999_v49, 0.0 }
 0x10c   :  { %v1607_v58 = vpack.c.bf16 %v1033_v52, %v1032_v50  ;;  %v1687_v59 = vpack.c.bf16 %v1065_v53, %v1064_v51 }
 0x10d   :  { %v1602_v60 = vpack.c.bf16 %v1031_v56, %v1030_v54  ;;  %v1682_v61 = vpack.c.bf16 %v1063_v57, %v1062_v55  ;;  %v1840_v62 = vpop.f32.mrb[12].mxu0  ;;  %v1872_v63 = vpop.f32.mrb[12].mxu1 }
 0x10e   :  { %1743 = vst [vmem:[%s2254_s3 + $0x28] sm:$0xff] %v1607_v58   ;;  %1759 = vst [vmem:[%s2254_s3 + $0xa8] sm:$0xff] %v1687_v59   ;;  %v972_v0 = vadd.f32 %v1840_v62, %v2089_v40  ;;  %v1004_v1 = vadd.f32 %v1872_v63, %v2089_v40  ;;  %v549_v2 = vpop.f32.mrb[13].mxu0  ;;  %v677_v3 = vpop.f32.mrb[13].mxu1 }
 0x10f   :  { %1742 = vst [vmem:[%s2254_s3 + $0x20] sm:$0xff] %v1602_v60   ;;  %1758 = vst [vmem:[%s2254_s3 + $0xa0] sm:$0xff] %v1682_v61   ;;  %v970_v4 = vadd.f32 %v2089_v40, %v549_v2  ;;  %v1002_v5 = vadd.f32 %v2089_v40, %v677_v3  ;;  %v1841_v6 = vpop.f32.mrb[14].mxu0  ;;  %v1873_v7 = vpop.f32.mrb[14].mxu1 }
 0x110   :  { %v973_v8 = vadd.f32 %v1841_v6, %v2089_v40  ;;  %v1005_v9 = vadd.f32 %v1873_v7, %v2089_v40  ;;  %v552_v10 = vpop.f32.mrb[15].mxu0  ;;  %v680_v11 = vpop.f32.mrb[15].mxu1  ;;  %v1036_v14 = vmax.f32 %v972_v0, 0.0  ;;  %v1068_v15 = vmax.f32 %v1004_v1, 0.0 }
 0x111   :  { %v971_v12 = vadd.f32 %v2089_v40, %v552_v10  ;;  %v1003_v13 = vadd.f32 %v2089_v40, %v680_v11  ;;  %v1034_v18 = vmax.f32 %v970_v4, 0.0  ;;  %v1066_v19 = vmax.f32 %v1002_v5, 0.0 }
 0x112   :  { %v1037_v16 = vmax.f32 %v973_v8, 0.0  ;;  %v1069_v17 = vmax.f32 %v1005_v9, 0.0 }
 0x113   :  { %v1035_v20 = vmax.f32 %v971_v12, 0.0  ;;  %v1067_v21 = vmax.f32 %v1003_v13, 0.0 }
 0x114   :  { %v1617_v22 = vpack.c.bf16 %v1037_v16, %v1036_v14  ;;  %v1697_v23 = vpack.c.bf16 %v1069_v17, %v1068_v15 }
 0x115   :  { %v1612_v24 = vpack.c.bf16 %v1035_v20, %v1034_v18  ;;  %v1692_v25 = vpack.c.bf16 %v1067_v21, %v1066_v19  ;;  %v1844_v26 = vpop.f32.mrb[16].mxu0  ;;  %v1876_v27 = vpop.f32.mrb[16].mxu1 }
 0x116   :  { %1745 = vst [vmem:[%s2254_s3 + $0x38] sm:$0xff] %v1617_v22   ;;  %1761 = vst [vmem:[%s2254_s3 + $0xb8] sm:$0xff] %v1697_v23   ;;  %v976_v28 = vadd.f32 %v1844_v26, %v2089_v40  ;;  %v1008_v29 = vadd.f32 %v1876_v27, %v2089_v40  ;;  %v565_v30 = vpop.f32.mrb[17].mxu0  ;;  %v693_v31 = vpop.f32.mrb[17].mxu1 }
 0x117   :  { %1744 = vst [vmem:[%s2254_s3 + $0x30] sm:$0xff] %v1612_v24   ;;  %1760 = vst [vmem:[%s2254_s3 + $0xb0] sm:$0xff] %v1692_v25   ;;  %v974_v32 = vadd.f32 %v2089_v40, %v565_v30  ;;  %v1006_v33 = vadd.f32 %v2089_v40, %v693_v31  ;;  %v1845_v34 = vpop.f32.mrb[18].mxu0  ;;  %v1877_v35 = vpop.f32.mrb[18].mxu1 }
 0x118   :  { %v977_v36 = vadd.f32 %v1845_v34, %v2089_v40  ;;  %v1009_v37 = vadd.f32 %v1877_v35, %v2089_v40  ;;  %v568_v38 = vpop.f32.mrb[19].mxu0  ;;  %v696_v39 = vpop.f32.mrb[19].mxu1  ;;  %v1040_v43 = vmax.f32 %v976_v28, 0.0  ;;  %v1072_v44 = vmax.f32 %v1008_v29, 0.0 }
 0x119   :  { %v975_v41 = vadd.f32 %v2089_v40, %v568_v38  ;;  %v1007_v42 = vadd.f32 %v2089_v40, %v696_v39  ;;  %v1038_v47 = vmax.f32 %v974_v32, 0.0  ;;  %v1070_v48 = vmax.f32 %v1006_v33, 0.0 }
 0x11a   :  { %v1041_v45 = vmax.f32 %v977_v36, 0.0  ;;  %v1073_v46 = vmax.f32 %v1009_v37, 0.0 }
 0x11b   :  { %v1039_v49 = vmax.f32 %v975_v41, 0.0  ;;  %v1071_v50 = vmax.f32 %v1007_v42, 0.0 }
 0x11c   :  { %v1627_v51 = vpack.c.bf16 %v1041_v45, %v1040_v43  ;;  %v1707_v52 = vpack.c.bf16 %v1073_v46, %v1072_v44 }
 0x11d   :  { %v1622_v53 = vpack.c.bf16 %v1039_v49, %v1038_v47  ;;  %v1702_v54 = vpack.c.bf16 %v1071_v50, %v1070_v48  ;;  %v1848_v55 = vpop.f32.mrb[20].mxu0  ;;  %v1880_v56 = vpop.f32.mrb[20].mxu1 }
 0x11e   :  { %1747 = vst [vmem:[%s2254_s3 + $0x48] sm:$0xff] %v1627_v51   ;;  %1763 = vst [vmem:[%s2254_s3 + $0xc8] sm:$0xff] %v1707_v52   ;;  %v980_v57 = vadd.f32 %v1848_v55, %v2089_v40  ;;  %v1012_v58 = vadd.f32 %v1880_v56, %v2089_v40  ;;  %v581_v59 = vpop.f32.mrb[21].mxu0  ;;  %v709_v60 = vpop.f32.mrb[21].mxu1 }
 0x11f   :  { %1746 = vst [vmem:[%s2254_s3 + $0x40] sm:$0xff] %v1622_v53   ;;  %1762 = vst [vmem:[%s2254_s3 + $0xc0] sm:$0xff] %v1702_v54   ;;  %v978_v61 = vadd.f32 %v2089_v40, %v581_v59  ;;  %v1010_v62 = vadd.f32 %v2089_v40, %v709_v60  ;;  %v1849_v63 = vpop.f32.mrb[22].mxu0  ;;  %v1881_v0 = vpop.f32.mrb[22].mxu1 }
 0x120   :  { %v981_v1 = vadd.f32 %v1849_v63, %v2089_v40  ;;  %v1013_v2 = vadd.f32 %v1881_v0, %v2089_v40  ;;  %v584_v3 = vpop.f32.mrb[23].mxu0  ;;  %v712_v4 = vpop.f32.mrb[23].mxu1  ;;  %v1044_v7 = vmax.f32 %v980_v57, 0.0  ;;  %v1076_v8 = vmax.f32 %v1012_v58, 0.0 }
 0x121   :  { %v979_v5 = vadd.f32 %v2089_v40, %v584_v3  ;;  %v1011_v6 = vadd.f32 %v2089_v40, %v712_v4  ;;  %v1042_v11 = vmax.f32 %v978_v61, 0.0  ;;  %v1074_v12 = vmax.f32 %v1010_v62, 0.0 }
 0x122   :  { %v1045_v9 = vmax.f32 %v981_v1, 0.0  ;;  %v1077_v10 = vmax.f32 %v1013_v2, 0.0 }
 0x123   :  { %v1043_v13 = vmax.f32 %v979_v5, 0.0  ;;  %v1075_v14 = vmax.f32 %v1011_v6, 0.0 }
 0x124   :  { %v1637_v15 = vpack.c.bf16 %v1045_v9, %v1044_v7  ;;  %v1717_v16 = vpack.c.bf16 %v1077_v10, %v1076_v8 }
 0x125   :  { %v1632_v17 = vpack.c.bf16 %v1043_v13, %v1042_v11  ;;  %v1712_v18 = vpack.c.bf16 %v1075_v14, %v1074_v12  ;;  %v1852_v19 = vpop.f32.mrb[24].mxu0  ;;  %v1884_v20 = vpop.f32.mrb[24].mxu1 }
 0x126   :  { %1749 = vst [vmem:[%s2254_s3 + $0x58] sm:$0xff] %v1637_v15   ;;  %1765 = vst [vmem:[%s2254_s3 + $0xd8] sm:$0xff] %v1717_v16   ;;  %v984_v21 = vadd.f32 %v1852_v19, %v2089_v40  ;;  %v1016_v22 = vadd.f32 %v1884_v20, %v2089_v40  ;;  %v597_v23 = vpop.f32.mrb[25].mxu0  ;;  %v725_v24 = vpop.f32.mrb[25].mxu1 }
 0x127   :  { %1748 = vst [vmem:[%s2254_s3 + $0x50] sm:$0xff] %v1632_v17   ;;  %1764 = vst [vmem:[%s2254_s3 + $0xd0] sm:$0xff] %v1712_v18   ;;  %v982_v25 = vadd.f32 %v2089_v40, %v597_v23  ;;  %v1014_v26 = vadd.f32 %v2089_v40, %v725_v24  ;;  %v1853_v27 = vpop.f32.mrb[26].mxu0  ;;  %v1885_v28 = vpop.f32.mrb[26].mxu1 }
 0x128   :  { %v985_v29 = vadd.f32 %v1853_v27, %v2089_v40  ;;  %v1017_v30 = vadd.f32 %v1885_v28, %v2089_v40  ;;  %v600_v31 = vpop.f32.mrb[27].mxu0  ;;  %v728_v32 = vpop.f32.mrb[27].mxu1  ;;  %v1048_v35 = vmax.f32 %v984_v21, 0.0  ;;  %v1080_v36 = vmax.f32 %v1016_v22, 0.0 }
 0x129   :  { %v983_v33 = vadd.f32 %v2089_v40, %v600_v31  ;;  %v1015_v34 = vadd.f32 %v2089_v40, %v728_v32  ;;  %v1046_v39 = vmax.f32 %v982_v25, 0.0  ;;  %v1078_v41 = vmax.f32 %v1014_v26, 0.0 }
 0x12a   :  { %v1049_v37 = vmax.f32 %v985_v29, 0.0  ;;  %v1081_v38 = vmax.f32 %v1017_v30, 0.0 }
 0x12b   :  { %v1047_v42 = vmax.f32 %v983_v33, 0.0  ;;  %v1079_v43 = vmax.f32 %v1015_v34, 0.0 }
 0x12c   :  { %v1647_v44 = vpack.c.bf16 %v1049_v37, %v1048_v35  ;;  %v1727_v45 = vpack.c.bf16 %v1081_v38, %v1080_v36 }
 0x12d   :  { %v1642_v46 = vpack.c.bf16 %v1047_v42, %v1046_v39  ;;  %v1722_v47 = vpack.c.bf16 %v1079_v43, %v1078_v41  ;;  %v1856_v48 = vpop.f32.mrb[28].mxu0  ;;  %v1888_v49 = vpop.f32.mrb[28].mxu1 }
 0x12e   :  { %1751 = vst [vmem:[%s2254_s3 + $0x68] sm:$0xff] %v1647_v44   ;;  %1767 = vst [vmem:[%s2254_s3 + $0xe8] sm:$0xff] %v1727_v45   ;;  %v988_v50 = vadd.f32 %v1856_v48, %v2089_v40  ;;  %v1020_v51 = vadd.f32 %v1888_v49, %v2089_v40  ;;  %v613_v52 = vpop.f32.mrb[29].mxu0  ;;  %v741_v53 = vpop.f32.mrb[29].mxu1 }
 0x12f   :  { %1750 = vst [vmem:[%s2254_s3 + $0x60] sm:$0xff] %v1642_v46   ;;  %1766 = vst [vmem:[%s2254_s3 + $0xe0] sm:$0xff] %v1722_v47   ;;  %v986_v54 = vadd.f32 %v2089_v40, %v613_v52  ;;  %v1018_v55 = vadd.f32 %v2089_v40, %v741_v53  ;;  %v1857_v56 = vpop.f32.mrb[30].mxu0  ;;  %v1889_v57 = vpop.f32.mrb[30].mxu1 }
 0x130   :  { %v989_v58 = vadd.f32 %v1857_v56, %v2089_v40  ;;  %v1021_v59 = vadd.f32 %v1889_v57, %v2089_v40  ;;  %v616_v60 = vpop.f32.mrb[31].mxu0  ;;  %v744_v61 = vpop.f32.mrb[31].mxu1  ;;  %v1052_v0 = vmax.f32 %v988_v50, 0.0  ;;  %v1084_v1 = vmax.f32 %v1020_v51, 0.0 }
 0x131   :  { %v987_v62 = vadd.f32 %v2089_v40, %v616_v60  ;;  %v1019_v63 = vadd.f32 %v2089_v40, %v744_v61  ;;  %v1050_v4 = vmax.f32 %v986_v54, 0.0  ;;  %v1082_v5 = vmax.f32 %v1018_v55, 0.0 }
 0x132   :  { %v1053_v2 = vmax.f32 %v989_v58, 0.0  ;;  %v1085_v3 = vmax.f32 %v1021_v59, 0.0 }
 0x133   :  { %v1051_v6 = vmax.f32 %v987_v62, 0.0  ;;  %v1083_v7 = vmax.f32 %v1019_v63, 0.0 }
 0x134   :  { %v1657_v8 = vpack.c.bf16 %v1053_v2, %v1052_v0  ;;  %v1737_v9 = vpack.c.bf16 %v1085_v3, %v1084_v1 }
 0x135   :  { %v1652_v10 = vpack.c.bf16 %v1051_v6, %v1050_v4  ;;  %v1732_v11 = vpack.c.bf16 %v1083_v7, %v1082_v5 }
 0x136   :  { %1753 = vst [vmem:[%s2254_s3 + $0x78] sm:$0xff] %v1657_v8   ;;  %1769 = vst [vmem:[%s2254_s3 + $0xf8] sm:$0xff] %v1737_v9  }
 0x137   :  { %1752 = vst [vmem:[%s2254_s3 + $0x70] sm:$0xff] %v1652_v10   ;;  %1768 = vst [vmem:[%s2254_s3 + $0xf0] sm:$0xff] %v1732_v11  }

// kernel: _lambda_.22
= control target key start
LH: loop header
LB: loop body
LE: loop exit
PB: predicated region body
PF: predicated region fallthrough
CT: control target
= control target key end

     0   :  { %s721_s1 = inlined_call_operand.vmem [shape: bf16[128,128], index: 1, kind: input, shape index: {}]   ;;  %s722_s0 = inlined_call_operand.vmem [shape: bf16[128,128], index: 0, kind: input, shape index: {}]   ;;  %s723_s2 = inlined_call_operand.vmem [shape: f32[1,128], index: 2, kind: input, shape index: {}]   ;;  %s724_s3 = inlined_call_operand.vmem [shape: bf16[128,128], index: 3, kind: output, shape index: {}]  }
   0x1   :  { %v610_v0 = vld [vmem:[%s721_s1] sm:$0xff]   ;;  %v611_v1 = vld [vmem:[%s721_s1 + $0x8] sm:$0xff]   ;;  %v612_v2 = vld [vmem:[%s721_s1 + $0x10] sm:$0xff]  }
   0x2   :  { %562 = vmatprep.subr.bf16.mxu0 %v610_v0  ;;  %594 = vmatprep.subr.bf16.mxu1 %v610_v0  ;;  %v613_v3 = vld [vmem:[%s721_s1 + $0x18] sm:$0xff]   ;;  %v618_v4 = vld [vmem:[%s722_s0] sm:$0xff]   ;;  %v615_v7 = vld [vmem:[%s721_s1 + $0x28] sm:$0xff]  }
   0x3   :  { %563 = vmatpush3.bf16.msra.mxu0 %v610_v0  ;;  %602 = vmatpush3.bf16.msra.mxu1 %v610_v0  ;;  %v619_v5 = vld [vmem:[%s722_s0 + $0x20] sm:$0xff]   ;;  %v616_v8 = vld [vmem:[%s721_s1 + $0x30] sm:$0xff]   ;;  %v617_v9 = vld [vmem:[%s721_s1 + $0x38] sm:$0xff]  }
   0x4   :  { %564 = vmatprep.subr.bf16.mxu0 %v611_v1  ;;  %595 = vmatprep.subr.bf16.mxu1 %v611_v1  ;;  %v614_v6 = vld [vmem:[%s721_s1 + $0x20] sm:$0xff]   ;;  %v620_v10 = vld [vmem:[%s722_s0 + $0x8] sm:$0xff]   ;;  %v622_v12 = vld [vmem:[%s722_s0 + $0x10] sm:$0xff]  }
   0x5   :  { %578 = vmatprep.mubr.bf16.mxu0 %v618_v4  ;;  %586 = vmatprep.mubr.bf16.mxu1 %v619_v5  ;;  %v621_v11 = vld [vmem:[%s722_s0 + $0x28] sm:$0xff]   ;;  %v623_v13 = vld [vmem:[%s722_s0 + $0x30] sm:$0xff]   ;;  %v624_v14 = vld [vmem:[%s722_s0 + $0x18] sm:$0xff]  }
   0x6   :  { %v625_v15 = vld [vmem:[%s722_s0 + $0x38] sm:$0xff]   ;;  %v466_v16 = vld [vmem:[%s723_s2] ss:$0 sm:$0xff] }
   0x7   :  { %565 = vmatpush3.bf16.msra.mxu0 %v611_v1  ;;  %603 = vmatpush3.bf16.msra.mxu1 %v611_v1 }
   0x8   :  { %566 = vmatprep.subr.bf16.mxu0 %v612_v2  ;;  %596 = vmatprep.subr.bf16.mxu1 %v612_v2 }
   0xb   :  { %567 = vmatpush3.bf16.msra.mxu0 %v612_v2  ;;  %604 = vmatpush3.bf16.msra.mxu1 %v612_v2 }
   0xc   :  { %568 = vmatprep.subr.bf16.mxu0 %v613_v3  ;;  %597 = vmatprep.subr.bf16.mxu1 %v613_v3 }
   0xf   :  { %569 = vmatpush3.bf16.msra.mxu0 %v613_v3  ;;  %605 = vmatpush3.bf16.msra.mxu1 %v613_v3 }
  0x10   :  { %570 = vmatprep.subr.bf16.mxu0 %v614_v6  ;;  %598 = vmatprep.subr.bf16.mxu1 %v614_v6 }
  0x13   :  { %571 = vmatpush3.bf16.msra.mxu0 %v614_v6  ;;  %606 = vmatpush3.bf16.msra.mxu1 %v614_v6 }
  0x14   :  { %572 = vmatprep.subr.bf16.mxu0 %v615_v7  ;;  %599 = vmatprep.subr.bf16.mxu1 %v615_v7 }
  0x17   :  { %573 = vmatpush3.bf16.msra.mxu0 %v615_v7  ;;  %607 = vmatpush3.bf16.msra.mxu1 %v615_v7 }
  0x18   :  { %574 = vmatprep.subr.bf16.mxu0 %v616_v8  ;;  %600 = vmatprep.subr.bf16.mxu1 %v616_v8 }
  0x1b   :  { %575 = vmatpush3.bf16.msra.mxu0 %v616_v8  ;;  %608 = vmatpush3.bf16.msra.mxu1 %v616_v8 }
  0x1c   :  { %576 = vmatprep.subr.bf16.mxu0 %v617_v9  ;;  %601 = vmatprep.subr.bf16.mxu1 %v617_v9 }
  0x1f   :  { %577 = vmatpush3.bf16.msra.mxu0 %v617_v9  ;;  %609 = vmatpush3.bf16.msra.mxu1 %v617_v9 }
  0x22   :  { %579 = vmatmul.mubr.bf16.vlgmr.msra.gmra.mrb[0].mxu0 %v620_v10  ;;  %587 = vmatmul.mubr.bf16.vlgmr.msra.gmra.mrb[0].mxu1 %v621_v11 }
  0x23   :  { %582 = vmatprep.mubr.bf16.mxu0 %v622_v12  ;;  %590 = vmatprep.mubr.bf16.mxu1 %v623_v13 }
  0x2a   :  { %583 = vmatmul.mubr.bf16.gmra.mrb[4].mxu0 %v624_v14  ;;  %591 = vmatmul.mubr.bf16.gmra.mrb[4].mxu1 %v625_v15 }
  0xf5   :  { %v580_v17 = vpop.f32.mrb[0].mxu0  ;;  %v588_v18 = vpop.f32.mrb[0].mxu1 }
  0xf6   :  { %v336_v19 = vadd.f32 %v580_v17, %v466_v16  ;;  %v344_v20 = vadd.f32 %v588_v18, %v466_v16  ;;  %v213_v21 = vpop.f32.mrb[1].mxu0  ;;  %v245_v22 = vpop.f32.mrb[1].mxu1 }
  0xf7   :  { %v334_v23 = vadd.f32 %v466_v16, %v213_v21  ;;  %v342_v24 = vadd.f32 %v466_v16, %v245_v22  ;;  %v581_v25 = vpop.f32.mrb[2].mxu0  ;;  %v589_v26 = vpop.f32.mrb[2].mxu1 }
  0xf8   :  { %v337_v27 = vadd.f32 %v581_v25, %v466_v16  ;;  %v345_v28 = vadd.f32 %v589_v26, %v466_v16  ;;  %v216_v29 = vpop.f32.mrb[3].mxu0  ;;  %v248_v30 = vpop.f32.mrb[3].mxu1  ;;  %v352_v33 = vmax.f32 %v336_v19, 0.0  ;;  %v360_v34 = vmax.f32 %v344_v20, 0.0 }
  0xf9   :  { %v335_v31 = vadd.f32 %v466_v16, %v216_v29  ;;  %v343_v32 = vadd.f32 %v466_v16, %v248_v30  ;;  %v350_v37 = vmax.f32 %v334_v23, 0.0  ;;  %v358_v38 = vmax.f32 %v342_v24, 0.0 }
  0xfa   :  { %v353_v35 = vmax.f32 %v337_v27, 0.0  ;;  %v361_v36 = vmax.f32 %v345_v28, 0.0 }
  0xfb   :  { %v351_v39 = vmax.f32 %v335_v31, 0.0  ;;  %v359_v40 = vmax.f32 %v343_v32, 0.0 }
  0xfc   :  { %v507_v41 = vpack.c.bf16 %v353_v35, %v352_v33  ;;  %v527_v42 = vpack.c.bf16 %v361_v36, %v360_v34 }
  0xfd   :  { %v502_v43 = vpack.c.bf16 %v351_v39, %v350_v37  ;;  %v522_v44 = vpack.c.bf16 %v359_v40, %v358_v38  ;;  %v584_v45 = vpop.f32.mrb[4].mxu0  ;;  %v592_v46 = vpop.f32.mrb[4].mxu1 }
  0xfe   :  { %539 = vst [vmem:[%s724_s3 + $0x8] sm:$0xff] %v507_v41   ;;  %543 = vst [vmem:[%s724_s3 + $0x28] sm:$0xff] %v527_v42   ;;  %v340_v47 = vadd.f32 %v584_v45, %v466_v16  ;;  %v348_v48 = vadd.f32 %v592_v46, %v466_v16  ;;  %v229_v49 = vpop.f32.mrb[5].mxu0  ;;  %v261_v50 = vpop.f32.mrb[5].mxu1 }
  0xff   :  { %503 = vst [vmem:[%s724_s3] sm:$0xff] %v502_v43   ;;  %542 = vst [vmem:[%s724_s3 + $0x20] sm:$0xff] %v522_v44   ;;  %v338_v51 = vadd.f32 %v466_v16, %v229_v49  ;;  %v346_v52 = vadd.f32 %v466_v16, %v261_v50  ;;  %v585_v53 = vpop.f32.mrb[6].mxu0  ;;  %v593_v54 = vpop.f32.mrb[6].mxu1 }
 0x100   :  { %v341_v55 = vadd.f32 %v585_v53, %v466_v16  ;;  %v349_v56 = vadd.f32 %v593_v54, %v466_v16  ;;  %v232_v57 = vpop.f32.mrb[7].mxu0  ;;  %v264_v58 = vpop.f32.mrb[7].mxu1  ;;  %v356_v61 = vmax.f32 %v340_v47, 0.0  ;;  %v364_v62 = vmax.f32 %v348_v48, 0.0 }
 0x101   :  { %v339_v59 = vadd.f32 %v466_v16, %v232_v57  ;;  %v347_v60 = vadd.f32 %v466_v16, %v264_v58  ;;  %v354_v1 = vmax.f32 %v338_v51, 0.0  ;;  %v362_v2 = vmax.f32 %v346_v52, 0.0 }
 0x102   :  { %v357_v63 = vmax.f32 %v341_v55, 0.0  ;;  %v365_v0 = vmax.f32 %v349_v56, 0.0 }
 0x103   :  { %v355_v3 = vmax.f32 %v339_v59, 0.0  ;;  %v363_v4 = vmax.f32 %v347_v60, 0.0 }
 0x104   :  { %v517_v5 = vpack.c.bf16 %v357_v63, %v356_v61  ;;  %v537_v6 = vpack.c.bf16 %v365_v0, %v364_v62 }
 0x105   :  { %v512_v7 = vpack.c.bf16 %v355_v3, %v354_v1  ;;  %v532_v8 = vpack.c.bf16 %v363_v4, %v362_v2 }
 0x106   :  { %541 = vst [vmem:[%s724_s3 + $0x18] sm:$0xff] %v517_v5   ;;  %545 = vst [vmem:[%s724_s3 + $0x38] sm:$0xff] %v537_v6  }
 0x107   :  { %540 = vst [vmem:[%s724_s3 + $0x10] sm:$0xff] %v512_v7   ;;  %544 = vst [vmem:[%s724_s3 + $0x30] sm:$0xff] %v532_v8  }

// kernel: _lambda_.25
= control target key start
LH: loop header
LB: loop body
LE: loop exit
PB: predicated region body
PF: predicated region fallthrough
CT: control target
= control target key end

     0   :  { %s874_s1 = inlined_call_operand.vmem [shape: bf16[128,128], index: 1, kind: input, shape index: {}]   ;;  %s875_s0 = inlined_call_operand.vmem [shape: bf16[128,128], index: 0, kind: input, shape index: {}]   ;;  %s876_s3 = inlined_call_operand.vmem [shape: bf16[128,128], index: 3, kind: input, shape index: {}]   ;;  %s877_s2 = inlined_call_operand.vmem [shape: f32[1,128], index: 2, kind: input, shape index: {}]   ;;  %s878_s4 = inlined_call_operand.vmem [shape: bf16[128,128], index: 4, kind: output, shape index: {}]  }
   0x1   :  { %v700_v0 = vld [vmem:[%s874_s1] sm:$0xff]   ;;  %v701_v1 = vld [vmem:[%s874_s1 + $0x8] sm:$0xff]   ;;  %v702_v2 = vld [vmem:[%s874_s1 + $0x10] sm:$0xff]  }
   0x2   :  { %652 = vmatprep.subr.bf16.mxu0 %v700_v0  ;;  %684 = vmatprep.subr.bf16.mxu1 %v700_v0  ;;  %v703_v3 = vld [vmem:[%s874_s1 + $0x18] sm:$0xff]   ;;  %v708_v4 = vld [vmem:[%s875_s0] sm:$0xff]   ;;  %v705_v7 = vld [vmem:[%s874_s1 + $0x28] sm:$0xff]  }
   0x3   :  { %653 = vmatpush3.bf16.msra.mxu0 %v700_v0  ;;  %692 = vmatpush3.bf16.msra.mxu1 %v700_v0  ;;  %v709_v5 = vld [vmem:[%s875_s0 + $0x20] sm:$0xff]   ;;  %v706_v8 = vld [vmem:[%s874_s1 + $0x30] sm:$0xff]   ;;  %v707_v9 = vld [vmem:[%s874_s1 + $0x38] sm:$0xff]  }
   0x4   :  { %654 = vmatprep.subr.bf16.mxu0 %v701_v1  ;;  %685 = vmatprep.subr.bf16.mxu1 %v701_v1  ;;  %v704_v6 = vld [vmem:[%s874_s1 + $0x20] sm:$0xff]   ;;  %v710_v10 = vld [vmem:[%s875_s0 + $0x8] sm:$0xff]   ;;  %v712_v12 = vld [vmem:[%s875_s0 + $0x10] sm:$0xff]  }
   0x5   :  { %668 = vmatprep.mubr.bf16.mxu0 %v708_v4  ;;  %676 = vmatprep.mubr.bf16.mxu1 %v709_v5  ;;  %v711_v11 = vld [vmem:[%s875_s0 + $0x28] sm:$0xff]   ;;  %v713_v13 = vld [vmem:[%s875_s0 + $0x30] sm:$0xff]   ;;  %v714_v14 = vld [vmem:[%s875_s0 + $0x18] sm:$0xff]  }
   0x6   :  { %v715_v15 = vld [vmem:[%s875_s0 + $0x38] sm:$0xff]   ;;  %v622_v16 = vld [vmem:[%s876_s3 + $0x8] sm:$0xff]   ;;  %v551_v18 = vld [vmem:[%s876_s3] sm:$0xff]  }
   0x7   :  { %655 = vmatpush3.bf16.msra.mxu0 %v701_v1  ;;  %693 = vmatpush3.bf16.msra.mxu1 %v701_v1  ;;  %v626_v17 = vld [vmem:[%s876_s3 + $0x28] sm:$0xff]   ;;  %v625_v19 = vld [vmem:[%s876_s3 + $0x20] sm:$0xff]   ;;  %v809_v21 = vld [vmem:[%s876_s3 + $0x18] sm:$0xff]   ;;  %v556_v23 = vunpack.c.l.bf16 %v622_v16  ;;  %v552_v25 = vunpack.c.l.bf16 %v551_v18  ;;  %v557_v31 = vunpack.c.h.bf16 %v622_v16  ;;  %v553_v33 = vunpack.c.h.bf16 %v551_v18 }
   0x8   :  { %656 = vmatprep.subr.bf16.mxu0 %v702_v2  ;;  %686 = vmatprep.subr.bf16.mxu1 %v702_v2  ;;  %v804_v20 = vld [vmem:[%s877_s2] ss:$0 sm:$0xff]  ;;  %v814_v22 = vld [vmem:[%s876_s3 + $0x38] sm:$0xff]   ;;  %v572_v24 = vunpack.c.l.bf16 %v626_v17  ;;  %v568_v26 = vunpack.c.l.bf16 %v625_v19  ;;  %v819_v27 = vld [vmem:[%s876_s3 + $0x10] sm:$0xff]   ;;  %v573_v32 = vunpack.c.h.bf16 %v626_v17  ;;  %v569_v34 = vunpack.c.h.bf16 %v625_v19 }
   0x9   :  { %v824_v28 = vld [vmem:[%s876_s3 + $0x30] sm:$0xff]   ;;  %v564_v39 = vunpack.c.l.bf16 %v809_v21  ;;  %v580_v40 = vunpack.c.l.bf16 %v814_v22  ;;  %v560_v45 = vunpack.c.l.bf16 %v819_v27  ;;  %v565_v59 = vunpack.c.h.bf16 %v809_v21 }
   0xa   :  { %v576_v46 = vunpack.c.l.bf16 %v824_v28  ;;  %v581_v60 = vunpack.c.h.bf16 %v814_v22  ;;  %v561_v63 = vunpack.c.h.bf16 %v819_v27  ;;  %v577_v0 = vunpack.c.h.bf16 %v824_v28 }
   0xb   :  { %657 = vmatpush3.bf16.msra.mxu0 %v702_v2  ;;  %694 = vmatpush3.bf16.msra.mxu1 %v702_v2 }
   0xc   :  { %658 = vmatprep.subr.bf16.mxu0 %v703_v3  ;;  %687 = vmatprep.subr.bf16.mxu1 %v703_v3 }
   0xf   :  { %659 = vmatpush3.bf16.msra.mxu0 %v703_v3  ;;  %695 = vmatpush3.bf16.msra.mxu1 %v703_v3 }
  0x10   :  { %660 = vmatprep.subr.bf16.mxu0 %v704_v6  ;;  %688 = vmatprep.subr.bf16.mxu1 %v704_v6 }
  0x13   :  { %661 = vmatpush3.bf16.msra.mxu0 %v704_v6  ;;  %696 = vmatpush3.bf16.msra.mxu1 %v704_v6 }
  0x14   :  { %662 = vmatprep.subr.bf16.mxu0 %v705_v7  ;;  %689 = vmatprep.subr.bf16.mxu1 %v705_v7 }
  0x17   :  { %663 = vmatpush3.bf16.msra.mxu0 %v705_v7  ;;  %697 = vmatpush3.bf16.msra.mxu1 %v705_v7 }
  0x18   :  { %664 = vmatprep.subr.bf16.mxu0 %v706_v8  ;;  %690 = vmatprep.subr.bf16.mxu1 %v706_v8 }
  0x1b   :  { %665 = vmatpush3.bf16.msra.mxu0 %v706_v8  ;;  %698 = vmatpush3.bf16.msra.mxu1 %v706_v8 }
  0x1c   :  { %666 = vmatprep.subr.bf16.mxu0 %v707_v9  ;;  %691 = vmatprep.subr.bf16.mxu1 %v707_v9 }
  0x1f   :  { %667 = vmatpush3.bf16.msra.mxu0 %v707_v9  ;;  %699 = vmatpush3.bf16.msra.mxu1 %v707_v9 }
  0x22   :  { %669 = vmatmul.mubr.bf16.vlgmr.msra.gmra.mrb[0].mxu0 %v710_v10  ;;  %677 = vmatmul.mubr.bf16.vlgmr.msra.gmra.mrb[0].mxu1 %v711_v11 }
  0x23   :  { %672 = vmatprep.mubr.bf16.mxu0 %v712_v12  ;;  %680 = vmatprep.mubr.bf16.mxu1 %v713_v13 }
  0x2a   :  { %673 = vmatmul.mubr.bf16.gmra.mrb[4].mxu0 %v714_v14  ;;  %681 = vmatmul.mubr.bf16.gmra.mrb[4].mxu1 %v715_v15 }
  0xf5   :  { %v670_v29 = vpop.f32.mrb[0].mxu0  ;;  %v678_v30 = vpop.f32.mrb[0].mxu1 }
  0xf6   :  { %v339_v35 = vadd.f32 %v670_v29, %v804_v20  ;;  %v347_v36 = vadd.f32 %v678_v30, %v804_v20  ;;  %v216_v37 = vpop.f32.mrb[1].mxu0  ;;  %v248_v38 = vpop.f32.mrb[1].mxu1 }
  0xf7   :  { %v337_v41 = vadd.f32 %v804_v20, %v216_v37  ;;  %v345_v42 = vadd.f32 %v804_v20, %v248_v38  ;;  %v671_v43 = vpop.f32.mrb[2].mxu0  ;;  %v679_v44 = vpop.f32.mrb[2].mxu1 }
  0xf8   :  { %v387_v47 = vadd.f32 %v556_v23, %v339_v35  ;;  %v395_v48 = vadd.f32 %v572_v24, %v347_v36  ;;  %v340_v49 = vadd.f32 %v671_v43, %v804_v20  ;;  %v348_v50 = vadd.f32 %v679_v44, %v804_v20  ;;  %v219_v51 = vpop.f32.mrb[3].mxu0  ;;  %v251_v52 = vpop.f32.mrb[3].mxu1 }
  0xf9   :  { %v385_v53 = vadd.f32 %v552_v25, %v337_v41  ;;  %v393_v54 = vadd.f32 %v568_v26, %v345_v42  ;;  %v338_v55 = vadd.f32 %v804_v20, %v219_v51  ;;  %v346_v56 = vadd.f32 %v804_v20, %v251_v52 }
  0xfa   :  { %v388_v57 = vadd.f32 %v557_v31, %v340_v49  ;;  %v396_v58 = vadd.f32 %v573_v32, %v348_v50  ;;  %v403_v1 = vmax.f32 %v387_v47, 0.0  ;;  %v411_v2 = vmax.f32 %v395_v48, 0.0 }
  0xfb   :  { %v386_v61 = vadd.f32 %v553_v33, %v338_v55  ;;  %v394_v62 = vadd.f32 %v569_v34, %v346_v56  ;;  %v401_v5 = vmax.f32 %v385_v53, 0.0  ;;  %v409_v6 = vmax.f32 %v393_v54, 0.0 }
  0xfc   :  { %v404_v3 = vmax.f32 %v388_v57, 0.0  ;;  %v412_v4 = vmax.f32 %v396_v58, 0.0 }
  0xfd   :  { %v402_v7 = vmax.f32 %v386_v61, 0.0  ;;  %v410_v8 = vmax.f32 %v394_v62, 0.0  ;;  %v674_v9 = vpop.f32.mrb[4].mxu0  ;;  %v682_v10 = vpop.f32.mrb[4].mxu1 }
  0xfe   :  { %v590_v11 = vpack.c.bf16 %v404_v3, %v403_v1  ;;  %v610_v12 = vpack.c.bf16 %v412_v4, %v411_v2  ;;  %v343_v13 = vadd.f32 %v674_v9, %v804_v20  ;;  %v351_v14 = vadd.f32 %v682_v10, %v804_v20  ;;  %v232_v15 = vpop.f32.mrb[5].mxu0  ;;  %v264_v16 = vpop.f32.mrb[5].mxu1 }
  0xff   :  { %v585_v17 = vpack.c.bf16 %v402_v7, %v401_v5  ;;  %v605_v18 = vpack.c.bf16 %v410_v8, %v409_v6  ;;  %v341_v19 = vadd.f32 %v804_v20, %v232_v15  ;;  %v349_v21 = vadd.f32 %v804_v20, %v264_v16  ;;  %v675_v22 = vpop.f32.mrb[6].mxu0  ;;  %v683_v23 = vpop.f32.mrb[6].mxu1 }
 0x100   :  { %629 = vst [vmem:[%s878_s4 + $0x8] sm:$0xff] %v590_v11   ;;  %633 = vst [vmem:[%s878_s4 + $0x28] sm:$0xff] %v610_v12   ;;  %v391_v24 = vadd.f32 %v564_v39, %v343_v13  ;;  %v399_v25 = vadd.f32 %v580_v40, %v351_v14  ;;  %v344_v26 = vadd.f32 %v675_v22, %v804_v20  ;;  %v235_v28 = vpop.f32.mrb[7].mxu0  ;;  %v267_v29 = vpop.f32.mrb[7].mxu1 }
 0x101   :  { %v352_v27 = vadd.f32 %v683_v23, %v804_v20  ;;  %586 = vst [vmem:[%s878_s4] sm:$0xff] %v585_v17   ;;  %632 = vst [vmem:[%s878_s4 + $0x20] sm:$0xff] %v605_v18   ;;  %v389_v30 = vadd.f32 %v560_v45, %v341_v19  ;;  %v397_v31 = vadd.f32 %v576_v46, %v349_v21 }
 0x102   :  { %v342_v32 = vadd.f32 %v804_v20, %v235_v28  ;;  %v350_v33 = vadd.f32 %v804_v20, %v267_v29  ;;  %v392_v34 = vadd.f32 %v565_v59, %v344_v26  ;;  %v407_v38 = vmax.f32 %v391_v24, 0.0 }
 0x103   :  { %v400_v35 = vadd.f32 %v581_v60, %v352_v27  ;;  %v415_v39 = vmax.f32 %v399_v25, 0.0  ;;  %v405_v42 = vmax.f32 %v389_v30, 0.0  ;;  %v413_v43 = vmax.f32 %v397_v31, 0.0 }
 0x104   :  { %v390_v36 = vadd.f32 %v561_v63, %v342_v32  ;;  %v398_v37 = vadd.f32 %v577_v0, %v350_v33  ;;  %v408_v40 = vmax.f32 %v392_v34, 0.0 }
 0x105   :  { %v416_v41 = vmax.f32 %v400_v35, 0.0 }
 0x106   :  { %v406_v44 = vmax.f32 %v390_v36, 0.0  ;;  %v414_v47 = vmax.f32 %v398_v37, 0.0  ;;  %v600_v48 = vpack.c.bf16 %v408_v40, %v407_v38 }
 0x107   :  { %v620_v49 = vpack.c.bf16 %v416_v41, %v415_v39 }
 0x108   :  { %v595_v45 = vpack.c.bf16 %v406_v44, %v405_v42  ;;  %v615_v46 = vpack.c.bf16 %v414_v47, %v413_v43  ;;  %631 = vst [vmem:[%s878_s4 + $0x18] sm:$0xff] %v600_v48  }
 0x109   :  { %635 = vst [vmem:[%s878_s4 + $0x38] sm:$0xff] %v620_v49  }
 0x10a   :  { %630 = vst [vmem:[%s878_s4 + $0x10] sm:$0xff] %v595_v45   ;;  %634 = vst [vmem:[%s878_s4 + $0x30] sm:$0xff] %v615_v46  }

// kernel: _lambda_.24
= control target key start
LH: loop header
LB: loop body
LE: loop exit
PB: predicated region body
PF: predicated region fallthrough
CT: control target
= control target key end

     0   :  { %s705_s1 = inlined_call_operand.vmem [shape: bf16[128,128], index: 1, kind: input, shape index: {}]   ;;  %s706_s0 = inlined_call_operand.vmem [shape: bf16[128,128], index: 0, kind: input, shape index: {}]   ;;  %s707_s2 = inlined_call_operand.vmem [shape: f32[1,128], index: 2, kind: input, shape index: {}]   ;;  %s708_s3 = inlined_call_operand.vmem [shape: bf16[128,128], index: 3, kind: output, shape index: {}]  }
   0x1   :  { %v594_v0 = vld [vmem:[%s705_s1] sm:$0xff]   ;;  %v595_v1 = vld [vmem:[%s705_s1 + $0x8] sm:$0xff]   ;;  %v596_v2 = vld [vmem:[%s705_s1 + $0x10] sm:$0xff]  }
   0x2   :  { %546 = vmatprep.subr.bf16.mxu0 %v594_v0  ;;  %578 = vmatprep.subr.bf16.mxu1 %v594_v0  ;;  %v597_v3 = vld [vmem:[%s705_s1 + $0x18] sm:$0xff]   ;;  %v602_v4 = vld [vmem:[%s706_s0] sm:$0xff]   ;;  %v599_v7 = vld [vmem:[%s705_s1 + $0x28] sm:$0xff]  }
   0x3   :  { %547 = vmatpush3.bf16.msra.mxu0 %v594_v0  ;;  %586 = vmatpush3.bf16.msra.mxu1 %v594_v0  ;;  %v603_v5 = vld [vmem:[%s706_s0 + $0x20] sm:$0xff]   ;;  %v600_v8 = vld [vmem:[%s705_s1 + $0x30] sm:$0xff]   ;;  %v601_v9 = vld [vmem:[%s705_s1 + $0x38] sm:$0xff]  }
   0x4   :  { %548 = vmatprep.subr.bf16.mxu0 %v595_v1  ;;  %579 = vmatprep.subr.bf16.mxu1 %v595_v1  ;;  %v598_v6 = vld [vmem:[%s705_s1 + $0x20] sm:$0xff]   ;;  %v604_v10 = vld [vmem:[%s706_s0 + $0x8] sm:$0xff]   ;;  %v606_v12 = vld [vmem:[%s706_s0 + $0x10] sm:$0xff]  }
   0x5   :  { %562 = vmatprep.mubr.bf16.mxu0 %v602_v4  ;;  %570 = vmatprep.mubr.bf16.mxu1 %v603_v5  ;;  %v605_v11 = vld [vmem:[%s706_s0 + $0x28] sm:$0xff]   ;;  %v607_v13 = vld [vmem:[%s706_s0 + $0x30] sm:$0xff]   ;;  %v608_v14 = vld [vmem:[%s706_s0 + $0x18] sm:$0xff]  }
   0x6   :  { %v609_v15 = vld [vmem:[%s706_s0 + $0x38] sm:$0xff]   ;;  %v450_v17 = vld [vmem:[%s707_s2] ss:$0 sm:$0xff] }
   0x7   :  { %549 = vmatpush3.bf16.msra.mxu0 %v595_v1  ;;  %587 = vmatpush3.bf16.msra.mxu1 %v595_v1 }
   0x8   :  { %550 = vmatprep.subr.bf16.mxu0 %v596_v2  ;;  %580 = vmatprep.subr.bf16.mxu1 %v596_v2 }
   0xb   :  { %551 = vmatpush3.bf16.msra.mxu0 %v596_v2  ;;  %588 = vmatpush3.bf16.msra.mxu1 %v596_v2 }
   0xc   :  { %552 = vmatprep.subr.bf16.mxu0 %v597_v3  ;;  %581 = vmatprep.subr.bf16.mxu1 %v597_v3 }
   0xf   :  { %553 = vmatpush3.bf16.msra.mxu0 %v597_v3  ;;  %589 = vmatpush3.bf16.msra.mxu1 %v597_v3 }
  0x10   :  { %554 = vmatprep.subr.bf16.mxu0 %v598_v6  ;;  %582 = vmatprep.subr.bf16.mxu1 %v598_v6 }
  0x13   :  { %555 = vmatpush3.bf16.msra.mxu0 %v598_v6  ;;  %590 = vmatpush3.bf16.msra.mxu1 %v598_v6 }
  0x14   :  { %556 = vmatprep.subr.bf16.mxu0 %v599_v7  ;;  %583 = vmatprep.subr.bf16.mxu1 %v599_v7 }
  0x17   :  { %557 = vmatpush3.bf16.msra.mxu0 %v599_v7  ;;  %591 = vmatpush3.bf16.msra.mxu1 %v599_v7 }
  0x18   :  { %558 = vmatprep.subr.bf16.mxu0 %v600_v8  ;;  %584 = vmatprep.subr.bf16.mxu1 %v600_v8 }
  0x1b   :  { %559 = vmatpush3.bf16.msra.mxu0 %v600_v8  ;;  %592 = vmatpush3.bf16.msra.mxu1 %v600_v8 }
  0x1c   :  { %560 = vmatprep.subr.bf16.mxu0 %v601_v9  ;;  %585 = vmatprep.subr.bf16.mxu1 %v601_v9 }
  0x1f   :  { %561 = vmatpush3.bf16.msra.mxu0 %v601_v9  ;;  %593 = vmatpush3.bf16.msra.mxu1 %v601_v9 }
  0x22   :  { %563 = vmatmul.mubr.bf16.vlgmr.msra.gmra.mrb[0].mxu0 %v604_v10  ;;  %571 = vmatmul.mubr.bf16.vlgmr.msra.gmra.mrb[0].mxu1 %v605_v11 }
  0x23   :  { %566 = vmatprep.mubr.bf16.mxu0 %v606_v12  ;;  %574 = vmatprep.mubr.bf16.mxu1 %v607_v13 }
  0x2a   :  { %567 = vmatmul.mubr.bf16.gmra.mrb[4].mxu0 %v608_v14  ;;  %575 = vmatmul.mubr.bf16.gmra.mrb[4].mxu1 %v609_v15 }
  0xf5   :  { %v564_v16 = vpop.f32.mrb[0].mxu0  ;;  %v572_v18 = vpop.f32.mrb[0].mxu1 }
  0xf6   :  { %v213_v19 = vpop.f32.mrb[1].mxu0  ;;  %v245_v20 = vpop.f32.mrb[1].mxu1  ;;  %v336_v23 = vadd.f32 %v564_v16, %v450_v17  ;;  %v344_v24 = vadd.f32 %v572_v18, %v450_v17 }
  0xf7   :  { %v565_v21 = vpop.f32.mrb[2].mxu0  ;;  %v573_v22 = vpop.f32.mrb[2].mxu1  ;;  %v334_v29 = vadd.f32 %v450_v17, %v213_v19  ;;  %v342_v30 = vadd.f32 %v450_v17, %v245_v20 }
  0xf8   :  { %v337_v25 = vadd.f32 %v565_v21, %v450_v17  ;;  %v345_v26 = vadd.f32 %v573_v22, %v450_v17  ;;  %v216_v27 = vpop.f32.mrb[3].mxu0  ;;  %v248_v28 = vpop.f32.mrb[3].mxu1 }
  0xf9   :  { %v335_v31 = vadd.f32 %v450_v17, %v216_v27  ;;  %v343_v32 = vadd.f32 %v450_v17, %v248_v28 }
  0xfa   :  { %v491_v33 = vpack.c.bf16 %v337_v25, %v336_v23  ;;  %v511_v34 = vpack.c.bf16 %v345_v26, %v344_v24 }
  0xfb   :  { %v486_v35 = vpack.c.bf16 %v335_v31, %v334_v29  ;;  %v506_v36 = vpack.c.bf16 %v343_v32, %v342_v30 }
  0xfc   :  { %523 = vst [vmem:[%s708_s3 + $0x8] sm:$0xff] %v491_v33   ;;  %527 = vst [vmem:[%s708_s3 + $0x28] sm:$0xff] %v511_v34  }
  0xfd   :  { %487 = vst [vmem:[%s708_s3] sm:$0xff] %v486_v35   ;;  %526 = vst [vmem:[%s708_s3 + $0x20] sm:$0xff] %v506_v36   ;;  %v568_v37 = vpop.f32.mrb[4].mxu0  ;;  %v576_v38 = vpop.f32.mrb[4].mxu1 }
  0xfe   :  { %v229_v39 = vpop.f32.mrb[5].mxu0  ;;  %v261_v40 = vpop.f32.mrb[5].mxu1  ;;  %v340_v43 = vadd.f32 %v568_v37, %v450_v17  ;;  %v348_v44 = vadd.f32 %v576_v38, %v450_v17 }
  0xff   :  { %v569_v41 = vpop.f32.mrb[6].mxu0  ;;  %v577_v42 = vpop.f32.mrb[6].mxu1  ;;  %v338_v49 = vadd.f32 %v450_v17, %v229_v39  ;;  %v346_v50 = vadd.f32 %v450_v17, %v261_v40 }
 0x100   :  { %v341_v45 = vadd.f32 %v569_v41, %v450_v17  ;;  %v349_v46 = vadd.f32 %v577_v42, %v450_v17  ;;  %v232_v47 = vpop.f32.mrb[7].mxu0  ;;  %v264_v48 = vpop.f32.mrb[7].mxu1 }
 0x101   :  { %v339_v51 = vadd.f32 %v450_v17, %v232_v47  ;;  %v347_v52 = vadd.f32 %v450_v17, %v264_v48 }
 0x102   :  { %v501_v53 = vpack.c.bf16 %v341_v45, %v340_v43  ;;  %v521_v54 = vpack.c.bf16 %v349_v46, %v348_v44 }
 0x103   :  { %v496_v55 = vpack.c.bf16 %v339_v51, %v338_v49  ;;  %v516_v56 = vpack.c.bf16 %v347_v52, %v346_v50 }
 0x104   :  { %525 = vst [vmem:[%s708_s3 + $0x18] sm:$0xff] %v501_v53   ;;  %529 = vst [vmem:[%s708_s3 + $0x38] sm:$0xff] %v521_v54  }
 0x105   :  { %524 = vst [vmem:[%s708_s3 + $0x10] sm:$0xff] %v496_v55   ;;  %528 = vst [vmem:[%s708_s3 + $0x30] sm:$0xff] %v516_v56  }

// kernel: _lambda_.27
= control target key start
LH: loop header
LB: loop body
LE: loop exit
PB: predicated region body
PF: predicated region fallthrough
CT: control target
= control target key end

     0   :  { %s477_s1 = inlined_call_operand.vmem [shape: bf16[256,128], index: 1, kind: input, shape index: {}]   ;;  %s478_s0 = inlined_call_operand.vmem [shape: bf16[32,256], index: 0, kind: input, shape index: {}]   ;;  %s479_s2 = inlined_call_operand.vmem [shape: f32[1,128], index: 2, kind: input, shape index: {}]   ;;  %s480_s3 = inlined_call_operand.vmem [shape: bf16[32,128], index: 3, kind: output, shape index: {}]  }
   0x1   :  { %v366_v0 = vld [vmem:[%s477_s1 + $0x40] sm:$0xff]   ;;  %v368_v2 = vld [vmem:[%s477_s1 + $0x48] sm:$0xff]   ;;  %v370_v4 = vld [vmem:[%s477_s1 + $0x50] sm:$0xff]  }
   0x2   :  { %v367_v1 = vld [vmem:[%s477_s1] sm:$0xff]   ;;  %322 = vmatprep.subr.bf16.mxu0 %v366_v0  ;;  %350 = vmatprep.subr.bf16.mxu1 %v366_v0  ;;  %v369_v3 = vld [vmem:[%s477_s1 + $0x8] sm:$0xff]   ;;  %v371_v5 = vld [vmem:[%s477_s1 + $0x10] sm:$0xff]  }
   0x3   :  { %323 = vmatpush3.bf16.msra.mxu0 %v367_v1  ;;  %358 = vmatpush3.bf16.msra.mxu1 %v367_v1  ;;  %v372_v6 = vld [vmem:[%s477_s1 + $0x58] sm:$0xff]   ;;  %v374_v8 = vld [vmem:[%s477_s1 + $0x60] sm:$0xff]   ;;  %v376_v10 = vld [vmem:[%s477_s1 + $0x68] sm:$0xff]  }
   0x4   :  { %324 = vmatprep.subr.bf16.mxu0 %v368_v2  ;;  %351 = vmatprep.subr.bf16.mxu1 %v368_v2  ;;  %v373_v7 = vld [vmem:[%s477_s1 + $0x18] sm:$0xff]   ;;  %v375_v9 = vld [vmem:[%s477_s1 + $0x20] sm:$0xff]   ;;  %v377_v13 = vld [vmem:[%s477_s1 + $0x28] sm:$0xff]  }
   0x5   :  { %v384_v11 = vld [vmem:[%s478_s0 + $0x4] ss:$8 sps:$4 sm:$0xff]   ;;  %v387_v12 = vld [vmem:[%s478_s0 + $0x14] ss:$8 sps:$4 sm:$0xff]   ;;  %v382_v18 = vld [vmem:[%s478_s0] ss:$8 sps:$4 sm:$0xff]  }
   0x6   :  { %v378_v14 = vld [vmem:[%s477_s1 + $0x70] sm:$0xff]   ;;  %211 = vmatprep.mubr.bf16.mxu0 %v384_v11  ;;  %219 = vmatprep.mubr.bf16.mxu1 %v387_v12  ;;  %v380_v16 = vld [vmem:[%s477_s1 + $0x78] sm:$0xff]   ;;  %v302_v23 = vld [vmem:[%s479_s2] ss:$0 sm:$0xff] }
   0x7   :  { %325 = vmatpush3.bf16.msra.mxu0 %v369_v3  ;;  %359 = vmatpush3.bf16.msra.mxu1 %v369_v3  ;;  %v379_v15 = vld [vmem:[%s477_s1 + $0x30] sm:$0xff]   ;;  %v381_v17 = vld [vmem:[%s477_s1 + $0x38] sm:$0xff]  }
   0x8   :  { %326 = vmatprep.subr.bf16.mxu0 %v370_v4  ;;  %352 = vmatprep.subr.bf16.mxu1 %v370_v4  ;;  %v385_v19 = vld [vmem:[%s478_s0 + $0x10] ss:$8 sps:$4 sm:$0xff]  }
   0xb   :  { %327 = vmatpush3.bf16.msra.mxu0 %v371_v5  ;;  %360 = vmatpush3.bf16.msra.mxu1 %v371_v5 }
   0xc   :  { %328 = vmatprep.subr.bf16.mxu0 %v372_v6  ;;  %353 = vmatprep.subr.bf16.mxu1 %v372_v6 }
   0xf   :  { %329 = vmatpush3.bf16.msra.mxu0 %v373_v7  ;;  %361 = vmatpush3.bf16.msra.mxu1 %v373_v7 }
  0x10   :  { %330 = vmatprep.subr.bf16.mxu0 %v374_v8  ;;  %354 = vmatprep.subr.bf16.mxu1 %v374_v8 }
  0x13   :  { %331 = vmatpush3.bf16.msra.mxu0 %v375_v9  ;;  %362 = vmatpush3.bf16.msra.mxu1 %v375_v9 }
  0x14   :  { %332 = vmatprep.subr.bf16.mxu0 %v376_v10  ;;  %355 = vmatprep.subr.bf16.mxu1 %v376_v10 }
  0x17   :  { %333 = vmatpush3.bf16.msra.mxu0 %v377_v13  ;;  %363 = vmatpush3.bf16.msra.mxu1 %v377_v13 }
  0x18   :  { %334 = vmatprep.subr.bf16.mxu0 %v378_v14  ;;  %356 = vmatprep.subr.bf16.mxu1 %v378_v14 }
  0x1b   :  { %335 = vmatpush3.bf16.msra.mxu0 %v379_v15  ;;  %364 = vmatpush3.bf16.msra.mxu1 %v379_v15 }
  0x1c   :  { %336 = vmatprep.subr.bf16.mxu0 %v380_v16  ;;  %357 = vmatprep.subr.bf16.mxu1 %v380_v16 }
  0x1f   :  { %337 = vmatpush3.bf16.msra.mxu0 %v381_v17  ;;  %365 = vmatpush3.bf16.msra.mxu1 %v381_v17 }
  0x22   :  { %212 = vmatmul.mubr.bf16.vlgmr.msra.gmra.mrb[0].mxu0 %v382_v18  ;;  %220 = vmatmul.mubr.bf16.vlgmr.msra.gmra.mrb[0].mxu1 %v385_v19 }
  0xf5   :  { %v338_v20 = vpop.f32.mrb[0].mxu0  ;;  %v344_v21 = vpop.f32.mrb[0].mxu1 }
  0xf6   :  { %v339_v22 = vpop.f32.mrb[1].mxu0  ;;  %v345_v24 = vpop.f32.mrb[1].mxu1 }
  0xf7   :  { %v340_v25 = vadd.f32 %v339_v22, %v338_v20  ;;  %v346_v26 = vadd.f32 %v345_v24, %v344_v21  ;;  %v341_v27 = vpop.f32.mrb[2].mxu0  ;;  %v347_v28 = vpop.f32.mrb[2].mxu1 }
  0xf8   :  { %v342_v29 = vpop.f32.mrb[3].mxu0  ;;  %v348_v30 = vpop.f32.mrb[3].mxu1 }
  0xf9   :  { %v250_v31 = vadd.f32 %v340_v25, %v302_v23  ;;  %v252_v32 = vadd.f32 %v346_v26, %v302_v23  ;;  %v343_v33 = vadd.f32 %v342_v29, %v341_v27  ;;  %v349_v34 = vadd.f32 %v348_v30, %v347_v28 }
  0xfb   :  { %v251_v35 = vadd.f32 %v343_v33, %v302_v23  ;;  %v253_v36 = vadd.f32 %v349_v34, %v302_v23  ;;  %v254_v37 = vmax.f32 %v250_v31, 0.0  ;;  %v256_v38 = vmax.f32 %v252_v32, 0.0 }
  0xfd   :  { %v255_v39 = vmax.f32 %v251_v35, 0.0  ;;  %v257_v40 = vmax.f32 %v253_v36, 0.0 }
  0xff   :  { %v314_v41 = vpack.c.bf16 %v255_v39, %v254_v37  ;;  %v319_v42 = vpack.c.bf16 %v257_v40, %v256_v38 }
 0x101   :  { %315 = vst [vmem:[%s480_s3] sm:$0xff] %v314_v41   ;;  %321 = vst [vmem:[%s480_s3 + $0x8] sm:$0xff] %v319_v42  }

// kernel: _lambda_.29
= control target key start
LH: loop header
LB: loop body
LE: loop exit
PB: predicated region body
PF: predicated region fallthrough
CT: control target
= control target key end

     0   :  { %s374_s1 = inlined_call_operand.vmem [shape: bf16[128,128], index: 1, kind: input, shape index: {}]   ;;  %s375_s0 = inlined_call_operand.vmem [shape: bf16[32,128], index: 0, kind: input, shape index: {}]   ;;  %s376_s3 = inlined_call_operand.vmem [shape: bf16[32,128], index: 3, kind: input, shape index: {}]   ;;  %s377_s2 = inlined_call_operand.vmem [shape: f32[1,128], index: 2, kind: input, shape index: {}]   ;;  %s378_s4 = inlined_call_operand.vmem [shape: bf16[32,128], index: 4, kind: output, shape index: {}]  }
   0x1   :  { %v294_v0 = vld [vmem:[%s374_s1] sm:$0xff]   ;;  %v295_v1 = vld [vmem:[%s374_s1 + $0x8] sm:$0xff]   ;;  %v296_v2 = vld [vmem:[%s374_s1 + $0x10] sm:$0xff]  }
   0x2   :  { %274 = vmatprep.subr.bf16.mxu0 %v294_v0  ;;  %v297_v3 = vld [vmem:[%s374_s1 + $0x18] sm:$0xff]   ;;  %v302_v4 = vld [vmem:[%s375_s0] sm:$0xff]   ;;  %v299_v6 = vld [vmem:[%s374_s1 + $0x28] sm:$0xff]  }
   0x3   :  { %275 = vmatpush3.bf16.msra.mxu0 %v294_v0  ;;  %290 = vmatprep.mubr.bf16.mxu0 %v302_v4  ;;  %v298_v5 = vld [vmem:[%s374_s1 + $0x20] sm:$0xff]   ;;  %v300_v7 = vld [vmem:[%s374_s1 + $0x30] sm:$0xff]   ;;  %v301_v8 = vld [vmem:[%s374_s1 + $0x38] sm:$0xff]  }
   0x4   :  { %276 = vmatprep.subr.bf16.mxu0 %v295_v1  ;;  %v303_v9 = vld [vmem:[%s375_s0 + $0x8] sm:$0xff]   ;;  %v245_v11 = vld [vmem:[%s376_s3] sm:$0xff]  }
   0x5   :  { %v262_v10 = vld [vmem:[%s376_s3 + $0x8] sm:$0xff]   ;;  %v235_v12 = vld [vmem:[%s377_s2] ss:$0 sm:$0xff]  ;;  %v246_v15 = vunpack.c.l.bf16 %v245_v11  ;;  %v247_v21 = vunpack.c.h.bf16 %v245_v11 }
   0x6   :  { %v250_v13 = vunpack.c.l.bf16 %v262_v10  ;;  %v251_v18 = vunpack.c.h.bf16 %v262_v10 }
   0x7   :  { %277 = vmatpush3.bf16.msra.mxu0 %v295_v1 }
   0x8   :  { %278 = vmatprep.subr.bf16.mxu0 %v296_v2 }
   0xb   :  { %279 = vmatpush3.bf16.msra.mxu0 %v296_v2 }
   0xc   :  { %280 = vmatprep.subr.bf16.mxu0 %v297_v3 }
   0xf   :  { %281 = vmatpush3.bf16.msra.mxu0 %v297_v3 }
  0x10   :  { %282 = vmatprep.subr.bf16.mxu0 %v298_v5 }
  0x13   :  { %283 = vmatpush3.bf16.msra.mxu0 %v298_v5 }
  0x14   :  { %284 = vmatprep.subr.bf16.mxu0 %v299_v6 }
  0x17   :  { %285 = vmatpush3.bf16.msra.mxu0 %v299_v6 }
  0x18   :  { %286 = vmatprep.subr.bf16.mxu0 %v300_v7 }
  0x1b   :  { %287 = vmatpush3.bf16.msra.mxu0 %v300_v7 }
  0x1c   :  { %288 = vmatprep.subr.bf16.mxu0 %v301_v8 }
  0x1f   :  { %289 = vmatpush3.bf16.msra.mxu0 %v301_v8 }
  0x22   :  { %291 = vmatmul.mubr.bf16.vlgmr.msra.gmra.mrb[0].mxu0 %v303_v9 }
  0xf5   :  { %v292_v14 = vpop.f32.mrb[0].mxu0 }
  0xf6   :  { %v183_v16 = vadd.f32 %v292_v14, %v235_v12  ;;  %v144_v17 = vpop.f32.mrb[1].mxu0 }
  0xf7   :  { %v181_v19 = vadd.f32 %v235_v12, %v144_v17  ;;  %v293_v20 = vpop.f32.mrb[2].mxu0 }
  0xf8   :  { %v195_v22 = vadd.f32 %v250_v13, %v183_v16  ;;  %v184_v23 = vadd.f32 %v293_v20, %v235_v12  ;;  %v147_v24 = vpop.f32.mrb[3].mxu0 }
  0xf9   :  { %v193_v25 = vadd.f32 %v246_v15, %v181_v19  ;;  %v182_v26 = vadd.f32 %v235_v12, %v147_v24 }
  0xfa   :  { %v196_v27 = vadd.f32 %v251_v18, %v184_v23  ;;  %v199_v29 = vmax.f32 %v195_v22, 0.0 }
  0xfb   :  { %v194_v28 = vadd.f32 %v247_v21, %v182_v26  ;;  %v197_v31 = vmax.f32 %v193_v25, 0.0 }
  0xfc   :  { %v200_v30 = vmax.f32 %v196_v27, 0.0 }
  0xfd   :  { %v198_v32 = vmax.f32 %v194_v28, 0.0 }
  0xfe   :  { %v260_v33 = vpack.c.bf16 %v200_v30, %v199_v29 }
  0xff   :  { %v255_v34 = vpack.c.bf16 %v198_v32, %v197_v31 }
 0x100   :  { %263 = vst [vmem:[%s378_s4 + $0x8] sm:$0xff] %v260_v33  }
 0x101   :  { %256 = vst [vmem:[%s378_s4] sm:$0xff] %v255_v34  }

// kernel: _lambda_.30
= control target key start
LH: loop header
LB: loop body
LE: loop exit
PB: predicated region body
PF: predicated region fallthrough
CT: control target
= control target key end

     0   :  { %s339_s1 = inlined_call_operand.vmem [shape: bf16[128,128], index: 1, kind: input, shape index: {}]   ;;  %s340_s0 = inlined_call_operand.vmem [shape: bf16[32,128], index: 0, kind: input, shape index: {}]   ;;  %s341_s2 = inlined_call_operand.vmem [shape: f32[1,128], index: 2, kind: input, shape index: {}]   ;;  %s342_s3 = inlined_call_operand.vmem [shape: bf16[32,128], index: 3, kind: output, shape index: {}]  }
   0x1   :  { %v270_v0 = vld [vmem:[%s339_s1] sm:$0xff]   ;;  %v271_v1 = vld [vmem:[%s339_s1 + $0x8] sm:$0xff]   ;;  %v272_v2 = vld [vmem:[%s339_s1 + $0x10] sm:$0xff]  }
   0x2   :  { %250 = vmatprep.subr.bf16.mxu0 %v270_v0  ;;  %v273_v3 = vld [vmem:[%s339_s1 + $0x18] sm:$0xff]   ;;  %v278_v4 = vld [vmem:[%s340_s0] sm:$0xff]   ;;  %v275_v6 = vld [vmem:[%s339_s1 + $0x28] sm:$0xff]  }
   0x3   :  { %251 = vmatpush3.bf16.msra.mxu0 %v270_v0  ;;  %266 = vmatprep.mubr.bf16.mxu0 %v278_v4  ;;  %v274_v5 = vld [vmem:[%s339_s1 + $0x20] sm:$0xff]   ;;  %v276_v7 = vld [vmem:[%s339_s1 + $0x30] sm:$0xff]   ;;  %v277_v8 = vld [vmem:[%s339_s1 + $0x38] sm:$0xff]  }
   0x4   :  { %252 = vmatprep.subr.bf16.mxu0 %v271_v1  ;;  %v279_v9 = vld [vmem:[%s340_s0 + $0x8] sm:$0xff]   ;;  %v220_v10 = vld [vmem:[%s341_s2] ss:$0 sm:$0xff] }
   0x7   :  { %253 = vmatpush3.bf16.msra.mxu0 %v271_v1 }
   0x8   :  { %254 = vmatprep.subr.bf16.mxu0 %v272_v2 }
   0xb   :  { %255 = vmatpush3.bf16.msra.mxu0 %v272_v2 }
   0xc   :  { %256 = vmatprep.subr.bf16.mxu0 %v273_v3 }
   0xf   :  { %257 = vmatpush3.bf16.msra.mxu0 %v273_v3 }
  0x10   :  { %258 = vmatprep.subr.bf16.mxu0 %v274_v5 }
  0x13   :  { %259 = vmatpush3.bf16.msra.mxu0 %v274_v5 }
  0x14   :  { %260 = vmatprep.subr.bf16.mxu0 %v275_v6 }
  0x17   :  { %261 = vmatpush3.bf16.msra.mxu0 %v275_v6 }
  0x18   :  { %262 = vmatprep.subr.bf16.mxu0 %v276_v7 }
  0x1b   :  { %263 = vmatpush3.bf16.msra.mxu0 %v276_v7 }
  0x1c   :  { %264 = vmatprep.subr.bf16.mxu0 %v277_v8 }
  0x1f   :  { %265 = vmatpush3.bf16.msra.mxu0 %v277_v8 }
  0x22   :  { %267 = vmatmul.mubr.bf16.vlgmr.msra.gmra.mrb[0].mxu0 %v279_v9 }
  0xf5   :  { %v268_v11 = vpop.f32.mrb[0].mxu0 }
  0xf6   :  { %v180_v12 = vadd.f32 %v268_v11, %v220_v10  ;;  %v141_v13 = vpop.f32.mrb[1].mxu0 }
  0xf7   :  { %v178_v14 = vadd.f32 %v220_v10, %v141_v13  ;;  %v269_v15 = vpop.f32.mrb[2].mxu0 }
  0xf8   :  { %v181_v16 = vadd.f32 %v269_v15, %v220_v10  ;;  %v144_v17 = vpop.f32.mrb[3].mxu0  ;;  %v184_v19 = vmax.f32 %v180_v12, 0.0 }
  0xf9   :  { %v179_v18 = vadd.f32 %v220_v10, %v144_v17  ;;  %v182_v21 = vmax.f32 %v178_v14, 0.0 }
  0xfa   :  { %v185_v20 = vmax.f32 %v181_v16, 0.0 }
  0xfb   :  { %v183_v22 = vmax.f32 %v179_v18, 0.0 }
  0xfc   :  { %v237_v23 = vpack.c.bf16 %v185_v20, %v184_v19 }
  0xfd   :  { %v232_v24 = vpack.c.bf16 %v183_v22, %v182_v21 }
  0xfe   :  { %239 = vst [vmem:[%s342_s3 + $0x8] sm:$0xff] %v237_v23  }
  0xff   :  { %233 = vst [vmem:[%s342_s3] sm:$0xff] %v232_v24  }

// kernel: _lambda_.28
= control target key start
LH: loop header
LB: loop body
LE: loop exit
PB: predicated region body
PF: predicated region fallthrough
CT: control target
= control target key end

     0   :  { %s335_s1 = inlined_call_operand.vmem [shape: bf16[128,128], index: 1, kind: input, shape index: {}]   ;;  %s336_s0 = inlined_call_operand.vmem [shape: bf16[32,128], index: 0, kind: input, shape index: {}]   ;;  %s337_s2 = inlined_call_operand.vmem [shape: f32[1,128], index: 2, kind: input, shape index: {}]   ;;  %s338_s3 = inlined_call_operand.vmem [shape: bf16[32,128], index: 3, kind: output, shape index: {}]  }
   0x1   :  { %v266_v0 = vld [vmem:[%s335_s1] sm:$0xff]   ;;  %v267_v1 = vld [vmem:[%s335_s1 + $0x8] sm:$0xff]   ;;  %v268_v2 = vld [vmem:[%s335_s1 + $0x10] sm:$0xff]  }
   0x2   :  { %246 = vmatprep.subr.bf16.mxu0 %v266_v0  ;;  %v269_v3 = vld [vmem:[%s335_s1 + $0x18] sm:$0xff]   ;;  %v274_v4 = vld [vmem:[%s336_s0] sm:$0xff]   ;;  %v271_v6 = vld [vmem:[%s335_s1 + $0x28] sm:$0xff]  }
   0x3   :  { %247 = vmatpush3.bf16.msra.mxu0 %v266_v0  ;;  %262 = vmatprep.mubr.bf16.mxu0 %v274_v4  ;;  %v270_v5 = vld [vmem:[%s335_s1 + $0x20] sm:$0xff]   ;;  %v272_v7 = vld [vmem:[%s335_s1 + $0x30] sm:$0xff]   ;;  %v273_v8 = vld [vmem:[%s335_s1 + $0x38] sm:$0xff]  }
   0x4   :  { %248 = vmatprep.subr.bf16.mxu0 %v267_v1  ;;  %v275_v9 = vld [vmem:[%s336_s0 + $0x8] sm:$0xff]   ;;  %v216_v11 = vld [vmem:[%s337_s2] ss:$0 sm:$0xff] }
   0x7   :  { %249 = vmatpush3.bf16.msra.mxu0 %v267_v1 }
   0x8   :  { %250 = vmatprep.subr.bf16.mxu0 %v268_v2 }
   0xb   :  { %251 = vmatpush3.bf16.msra.mxu0 %v268_v2 }
   0xc   :  { %252 = vmatprep.subr.bf16.mxu0 %v269_v3 }
   0xf   :  { %253 = vmatpush3.bf16.msra.mxu0 %v269_v3 }
  0x10   :  { %254 = vmatprep.subr.bf16.mxu0 %v270_v5 }
  0x13   :  { %255 = vmatpush3.bf16.msra.mxu0 %v270_v5 }
  0x14   :  { %256 = vmatprep.subr.bf16.mxu0 %v271_v6 }
  0x17   :  { %257 = vmatpush3.bf16.msra.mxu0 %v271_v6 }
  0x18   :  { %258 = vmatprep.subr.bf16.mxu0 %v272_v7 }
  0x1b   :  { %259 = vmatpush3.bf16.msra.mxu0 %v272_v7 }
  0x1c   :  { %260 = vmatprep.subr.bf16.mxu0 %v273_v8 }
  0x1f   :  { %261 = vmatpush3.bf16.msra.mxu0 %v273_v8 }
  0x22   :  { %263 = vmatmul.mubr.bf16.vlgmr.msra.gmra.mrb[0].mxu0 %v275_v9 }
  0xf5   :  { %v264_v10 = vpop.f32.mrb[0].mxu0 }
  0xf6   :  { %v141_v12 = vpop.f32.mrb[1].mxu0  ;;  %v180_v14 = vadd.f32 %v264_v10, %v216_v11 }
  0xf7   :  { %v265_v13 = vpop.f32.mrb[2].mxu0  ;;  %v178_v17 = vadd.f32 %v216_v11, %v141_v12 }
  0xf8   :  { %v181_v15 = vadd.f32 %v265_v13, %v216_v11  ;;  %v144_v16 = vpop.f32.mrb[3].mxu0 }
  0xf9   :  { %v179_v18 = vadd.f32 %v216_v11, %v144_v16 }
  0xfa   :  { %v233_v19 = vpack.c.bf16 %v181_v15, %v180_v14 }
  0xfb   :  { %v228_v20 = vpack.c.bf16 %v179_v18, %v178_v17 }
  0xfc   :  { %235 = vst [vmem:[%s338_s3 + $0x8] sm:$0xff] %v233_v19  }
  0xfd   :  { %229 = vst [vmem:[%s338_s3] sm:$0xff] %v228_v20  }

// kernel: _lambda_.31
= control target key start
LH: loop header
LB: loop body
LE: loop exit
PB: predicated region body
PF: predicated region fallthrough
CT: control target
= control target key end

     0   :  { %v435_v1 = vmov 0.0   ;;  %vm436_vm0 = vmmov 0   ;;  %s541_s1 = inlined_call_operand.vmem [shape: bf16[384,128], index: 1, kind: input, shape index: {}]   ;;  %s542_s0 = inlined_call_operand.vmem [shape: bf16[8,384], index: 0, kind: input, shape index: {}]   ;;  %s543_s2 = inlined_call_operand.vmem [shape: f32[1,128], index: 2, kind: input, shape index: {}]   ;;  %s544_s3 = inlined_call_operand.vmem [shape: bf16[8,128], index: 3, kind: output, shape index: {}]  }
   0x1   :  { %v408_v0 = vld [vmem:[%s541_s1 + $0x40] sm:$0xff]   ;;  %386 = vmatprep.subr.bf16.mxu1 %v435_v1  ;;  %402 = vmatprep.mubr.msk.bf16.mxu1 %vm436_vm0, %v435_v1  ;;  %v411_v4 = vld [vmem:[%s541_s1 + $0x48] sm:$0xff]   ;;  %v414_v7 = vld [vmem:[%s541_s1 + $0x50] sm:$0xff]  }
   0x2   :  { %v409_v2 = vld [vmem:[%s541_s1] sm:$0xff]   ;;  %355 = vmatprep.subr.bf16.mxu0 %v408_v0  ;;  %v412_v5 = vld [vmem:[%s541_s1 + $0x8] sm:$0xff]   ;;  %v415_v8 = vld [vmem:[%s541_s1 + $0x10] sm:$0xff]  }
   0x3   :  { %v410_v3 = vld [vmem:[%s541_s1 + $0x80] sm:$0xff]   ;;  %356 = vmatpush3.bf16.msra.mxu0 %v409_v2  ;;  %v413_v6 = vld [vmem:[%s541_s1 + $0x88] sm:$0xff]   ;;  %v416_v9 = vld [vmem:[%s541_s1 + $0x90] sm:$0xff]  }
   0x4   :  { %387 = vmatpush3.bf16.msra.mxu1 %v410_v3  ;;  %357 = vmatprep.subr.bf16.mxu0 %v411_v4  ;;  %v417_v10 = vld [vmem:[%s541_s1 + $0x58] sm:$0xff]   ;;  %v420_v13 = vld [vmem:[%s541_s1 + $0x60] sm:$0xff]   ;;  %v423_v16 = vld [vmem:[%s541_s1 + $0x68] sm:$0xff]  }
   0x5   :  { %388 = vmatprep.subr.bf16.mxu1 %v435_v1  ;;  %v418_v11 = vld [vmem:[%s541_s1 + $0x18] sm:$0xff]   ;;  %v421_v14 = vld [vmem:[%s541_s1 + $0x20] sm:$0xff]   ;;  %v424_v17 = vld [vmem:[%s541_s1 + $0x28] sm:$0xff]  }
   0x6   :  { %v419_v12 = vld [vmem:[%s541_s1 + $0x98] sm:$0xff]   ;;  %v422_v15 = vld [vmem:[%s541_s1 + $0xa0] sm:$0xff]   ;;  %v425_v18 = vld [vmem:[%s541_s1 + $0xa8] sm:$0xff]  }
   0x7   :  { %358 = vmatpush3.bf16.msra.mxu0 %v412_v5  ;;  %v426_v19 = vld [vmem:[%s541_s1 + $0x70] sm:$0xff]   ;;  %v429_v22 = vld [vmem:[%s541_s1 + $0x78] sm:$0xff]   ;;  %v21_v23 = vld [vmem:[%s542_s0] sm:$0xff] }
   0x8   :  { %389 = vmatpush3.bf16.msra.mxu1 %v413_v6  ;;  %359 = vmatprep.subr.bf16.mxu0 %v414_v7  ;;  %v427_v20 = vld [vmem:[%s541_s1 + $0x30] sm:$0xff]   ;;  %v328_v24 = vcombine.high %v21_v23, %v21_v23  ;;  %v430_v25 = vld [vmem:[%s541_s1 + $0x38] sm:$0xff]   ;;  %v327_v27 = vcombine.low %v21_v23, %v21_v23  ;;  %v434_v28 = vld [vmem:[%s542_s0 + $0x8] ss:$0 sps:$4 sm:$0xff]  }
   0x9   :  { %390 = vmatprep.subr.bf16.mxu1 %v435_v1  ;;  %v428_v21 = vld [vmem:[%s541_s1 + $0xb0] sm:$0xff]   ;;  %v431_v26 = vld [vmem:[%s541_s1 + $0xb8] sm:$0xff]   ;;  %v354_v35 = vld [vmem:[%s543_s2] ss:$0 sm:$0xff] }
   0xa   :  { %258 = vmatprep.mubr.bf16.mxu0 %v328_v24 }
   0xb   :  { %360 = vmatpush3.bf16.msra.mxu0 %v415_v8 }
   0xc   :  { %391 = vmatpush3.bf16.msra.mxu1 %v416_v9  ;;  %361 = vmatprep.subr.bf16.mxu0 %v417_v10 }
   0xd   :  { %392 = vmatprep.subr.bf16.mxu1 %v435_v1 }
   0xf   :  { %362 = vmatpush3.bf16.msra.mxu0 %v418_v11 }
  0x10   :  { %393 = vmatpush3.bf16.msra.mxu1 %v419_v12  ;;  %363 = vmatprep.subr.bf16.mxu0 %v420_v13 }
  0x11   :  { %394 = vmatprep.subr.bf16.mxu1 %v435_v1 }
  0x13   :  { %364 = vmatpush3.bf16.msra.mxu0 %v421_v14 }
  0x14   :  { %395 = vmatpush3.bf16.msra.mxu1 %v422_v15  ;;  %365 = vmatprep.subr.bf16.mxu0 %v423_v16 }
  0x15   :  { %396 = vmatprep.subr.bf16.mxu1 %v435_v1 }
  0x17   :  { %366 = vmatpush3.bf16.msra.mxu0 %v424_v17 }
  0x18   :  { %397 = vmatpush3.bf16.msra.mxu1 %v425_v18  ;;  %367 = vmatprep.subr.bf16.mxu0 %v426_v19 }
  0x19   :  { %398 = vmatprep.subr.bf16.mxu1 %v435_v1 }
  0x1b   :  { %368 = vmatpush3.bf16.msra.mxu0 %v427_v20 }
  0x1c   :  { %399 = vmatpush3.bf16.msra.mxu1 %v428_v21  ;;  %369 = vmatprep.subr.bf16.mxu0 %v429_v22 }
  0x1d   :  { %400 = vmatprep.subr.bf16.mxu1 %v435_v1 }
  0x1f   :  { %370 = vmatpush3.bf16.msra.mxu0 %v430_v25 }
  0x20   :  { %401 = vmatpush3.bf16.msra.mxu1 %v431_v26 }
  0x22   :  { %259 = vmatmul.mubr.bf16.vlgmr.msra.gmra.mrb[0].mxu0 %v327_v27 }
  0x23   :  { %403 = vmatmul.mubr.bf16.vlgmr.msra.gmra.mrb[0].mxu1 %v434_v28 }
  0xf5   :  { %v371_v29 = vpop.f32.mrb[0].mxu0 }
  0xf6   :  { %v300_v30 = vpop.f32.mrb[0].mxu1  ;;  %v372_v31 = vpop.f32.mrb[1].mxu0 }
  0xf7   :  { %v373_v32 = vadd.f32 %v372_v31, %v371_v29  ;;  %v404_v33 = vpop.f32.mrb[1].mxu1  ;;  %v374_v34 = vpop.f32.mrb[2].mxu0 }
  0xf8   :  { %v303_v36 = vpop.f32.mrb[2].mxu1  ;;  %v375_v37 = vpop.f32.mrb[3].mxu0 }
  0xf9   :  { %v301_v38 = vadd.f32 %v373_v32, %v300_v30  ;;  %v405_v39 = vpop.f32.mrb[3].mxu1 }
  0xfb   :  { %v319_v40 = vadd.f32 %v354_v35, %v301_v38 }
  0xfd   :  { %v320_v41 = vmax.f32 %v319_v40, 0.0 }
  0xff   :  { %v321_v42 = vpack.c.bf16 %v320_v41, %v320_v41 }
 0x101   :  { %322 = vst [vmem:[%s544_s3] sm:$0xf] %v321_v42 }

// kernel: _lambda_.32
= control target key start
LH: loop header
LB: loop body
LE: loop exit
PB: predicated region body
PF: predicated region fallthrough
CT: control target
= control target key end

     0   :  { %v194_v0 = vmov 0.0   ;;  %vm195_vm0 = vmmov 0   ;;  %s249_s1 = inlined_call_operand.vmem [shape: bf16[128,128], index: 1, kind: input, shape index: {}]   ;;  %s250_s0 = inlined_call_operand.vmem [shape: bf16[8,128], index: 0, kind: input, shape index: {}]   ;;  %s251_s2 = inlined_call_operand.vmem [shape: f32[1,128], index: 2, kind: input, shape index: {}]   ;;  %s252_s3 = inlined_call_operand.vmem [shape: bf16[8,128], index: 3, kind: output, shape index: {}]  }
   0x1   :  { %164 = vmatprep.subr.bf16.mxu0 %v194_v0  ;;  %v186_v1 = vld [vmem:[%s249_s1] sm:$0xff]   ;;  %180 = vmatprep.mubr.msk.bf16.mxu0 %vm195_vm0, %v194_v0  ;;  %v187_v2 = vld [vmem:[%s249_s1 + $0x8] sm:$0xff]   ;;  %v188_v3 = vld [vmem:[%s249_s1 + $0x10] sm:$0xff]  }
   0x2   :  { %165 = vmatpush3.bf16.msra.mxu0 %v186_v1  ;;  %v189_v4 = vld [vmem:[%s249_s1 + $0x18] sm:$0xff]   ;;  %v190_v5 = vld [vmem:[%s249_s1 + $0x20] sm:$0xff]   ;;  %v191_v6 = vld [vmem:[%s249_s1 + $0x28] sm:$0xff]  }
   0x3   :  { %166 = vmatprep.subr.bf16.mxu0 %v194_v0  ;;  %v192_v7 = vld [vmem:[%s249_s1 + $0x30] sm:$0xff]   ;;  %v193_v8 = vld [vmem:[%s249_s1 + $0x38] sm:$0xff]   ;;  %v21_v9 = vld [vmem:[%s250_s0] sm:$0xf] }
   0x4   :  { %v154_v10 = vld [vmem:[%s251_s2] ss:$0 sm:$0xff] }
   0x6   :  { %167 = vmatpush3.bf16.msra.mxu0 %v187_v2 }
   0x7   :  { %168 = vmatprep.subr.bf16.mxu0 %v194_v0 }
   0xa   :  { %169 = vmatpush3.bf16.msra.mxu0 %v188_v3 }
   0xb   :  { %170 = vmatprep.subr.bf16.mxu0 %v194_v0 }
   0xe   :  { %171 = vmatpush3.bf16.msra.mxu0 %v189_v4 }
   0xf   :  { %172 = vmatprep.subr.bf16.mxu0 %v194_v0 }
  0x12   :  { %173 = vmatpush3.bf16.msra.mxu0 %v190_v5 }
  0x13   :  { %174 = vmatprep.subr.bf16.mxu0 %v194_v0 }
  0x16   :  { %175 = vmatpush3.bf16.msra.mxu0 %v191_v6 }
  0x17   :  { %176 = vmatprep.subr.bf16.mxu0 %v194_v0 }
  0x1a   :  { %177 = vmatpush3.bf16.msra.mxu0 %v192_v7 }
  0x1b   :  { %178 = vmatprep.subr.bf16.mxu0 %v194_v0 }
  0x1e   :  { %179 = vmatpush3.bf16.msra.mxu0 %v193_v8 }
  0x21   :  { %181 = vmatmul.mubr.bf16.vlgmr.msra.gmra.mrb[0].mxu0 %v21_v9 }
  0xf4   :  { %v120_v11 = vpop.f32.mrb[0].mxu0 }
  0xf5   :  { %v139_v12 = vadd.f32 %v154_v10, %v120_v11  ;;  %v182_v13 = vpop.f32.mrb[1].mxu0 }
  0xf6   :  { %v123_v14 = vpop.f32.mrb[2].mxu0 }
  0xf7   :  { %v140_v15 = vpack.c.bf16 %v139_v12, %v139_v12  ;;  %v183_v16 = vpop.f32.mrb[3].mxu0 }
  0xf9   :  { %141 = vst [vmem:[%s252_s3] sm:$0xf] %v140_v15 }

// kernel: _lambda_.36
= control target key start
LH: loop header
LB: loop body
LE: loop exit
PB: predicated region body
PF: predicated region fallthrough
CT: control target
= control target key end

     0   :  { %v240_v1 = vmov 0   ;;  %v172_v18 = vlaneseq  ;;  %s318_s1 = inlined_call_operand.vmem [shape: bf16[128,256], index: 1, kind: input, shape index: {}]   ;;  %s319_s0 = inlined_call_operand.vmem [shape: bf16[8,128], index: 0, kind: input, shape index: {}]   ;;  %s320_s2 = inlined_call_operand.vmem [shape: f32[1,256], index: 2, kind: input, shape index: {}]   ;;  %s321_s3 = inlined_call_operand.vmem [shape: bf16[8,256], index: 3, kind: output, shape index: {}]  }
   0x1   :  { %v216_v0 = vld [vmem:[%s318_s1 + $0x4] ss:$8 sps:$4 sm:$0xff]   ;;  %152 = vmatprep.mubr.bf16.mxu0 %v240_v1  ;;  %v218_v2 = vld [vmem:[%s318_s1] ss:$8 sps:$4 sm:$0xff]   ;;  %v219_v3 = vld [vmem:[%s318_s1 + $0x14] ss:$8 sps:$4 sm:$0xff]  }
   0x2   :  { %120 = vmatprep.subr.bf16.mxu0 %v216_v0  ;;  %v221_v4 = vld [vmem:[%s318_s1 + $0x10] ss:$8 sps:$4 sm:$0xff]   ;;  %v222_v5 = vld [vmem:[%s318_s1 + $0x24] ss:$8 sps:$4 sm:$0xff]   ;;  %v224_v6 = vld [vmem:[%s318_s1 + $0x20] ss:$8 sps:$4 sm:$0xff]  }
   0x3   :  { %121 = vmatpush1.bf16.msra.mxu0 %v218_v2  ;;  %v225_v7 = vld [vmem:[%s318_s1 + $0x34] ss:$8 sps:$4 sm:$0xff]   ;;  %v227_v8 = vld [vmem:[%s318_s1 + $0x30] ss:$8 sps:$4 sm:$0xff]   ;;  %v228_v9 = vld [vmem:[%s318_s1 + $0x44] ss:$8 sps:$4 sm:$0xff]  }
   0x4   :  { %122 = vmatprep.subr.bf16.mxu0 %v219_v3  ;;  %v230_v10 = vld [vmem:[%s318_s1 + $0x40] ss:$8 sps:$4 sm:$0xff]   ;;  %v231_v11 = vld [vmem:[%s318_s1 + $0x54] ss:$8 sps:$4 sm:$0xff]   ;;  %v233_v12 = vld [vmem:[%s318_s1 + $0x50] ss:$8 sps:$4 sm:$0xff]  }
   0x5   :  { %v234_v13 = vld [vmem:[%s318_s1 + $0x64] ss:$8 sps:$4 sm:$0xff]   ;;  %v236_v14 = vld [vmem:[%s318_s1 + $0x60] ss:$8 sps:$4 sm:$0xff]   ;;  %v237_v15 = vld [vmem:[%s318_s1 + $0x74] ss:$8 sps:$4 sm:$0xff]  }
   0x6   :  { %v239_v16 = vld [vmem:[%s318_s1 + $0x70] ss:$8 sps:$4 sm:$0xff]   ;;  %v23_v17 = vld [vmem:[%s319_s0] sm:$0xf]  ;;  %v173_v19 = vshrl.u32 %v172_v18, 7 }
   0x7   :  { %123 = vmatpush1.bf16.msra.mxu0 %v221_v4  ;;  %v170_v21 = vld [vmem:[%s320_s2] sm:$0x3] }
   0x8   :  { %124 = vmatprep.subr.bf16.mxu0 %v222_v5  ;;  %v174_v20 = vsub.s32 0, %v173_v19  ;;  %v178_v22 = vsub.s32 1, %v173_v19 }
   0xa   :  { %v175_v23 = vrot.slane %v170_v21, %v174_v20  ;;  %v179_v24 = vrot.slane %v170_v21, %v178_v22 }
   0xb   :  { %125 = vmatpush1.bf16.msra.mxu0 %v224_v6 }
   0xc   :  { %126 = vmatprep.subr.bf16.mxu0 %v225_v7 }
   0xf   :  { %127 = vmatpush1.bf16.msra.mxu0 %v227_v8 }
  0x10   :  { %128 = vmatprep.subr.bf16.mxu0 %v228_v9 }
  0x13   :  { %129 = vmatpush1.bf16.msra.mxu0 %v230_v10 }
  0x14   :  { %130 = vmatprep.subr.bf16.mxu0 %v231_v11 }
  0x17   :  { %131 = vmatpush1.bf16.msra.mxu0 %v233_v12 }
  0x18   :  { %132 = vmatprep.subr.bf16.mxu0 %v234_v13 }
  0x1b   :  { %133 = vmatpush1.bf16.msra.mxu0 %v236_v14 }
  0x1c   :  { %134 = vmatprep.subr.bf16.mxu0 %v237_v15 }
  0x1f   :  { %135 = vmatpush1.bf16.msra.mxu0 %v239_v16 }
  0x22   :  { %153 = vmatmul.mubr.bf16.vlgmr.msra.gmra.mrb[0].mxu0 %v23_v17 }
  0xf5   :  { %v154_v25 = vpop.f32.mrb[0].mxu0 }
  0xf6   :  { %v182_v26 = vadd.f32 %v175_v23, %v154_v25  ;;  %v156_v27 = vpop.f32.mrb[1].mxu0 }
  0xf7   :  { %v183_v28 = vadd.f32 %v179_v24, %v156_v27  ;;  %v158_v29 = vpop.f32.mrb[2].mxu0 }
  0xf8   :  { %v159_v30 = vpop.f32.mrb[3].mxu0 }
  0xf9   :  { %v214_v31 = vpack.c.bf16 %v183_v28, %v182_v26 }
  0xfb   :  { %192 = vst [vmem:[%s321_s3] sm:$0xff] %v214_v31 }

// kernel: _lambda_.33
= control target key start
LH: loop header
LB: loop body
LE: loop exit
PB: predicated region body
PF: predicated region fallthrough
CT: control target
= control target key end

     0   :  { %v201_v0 = vmov 0.0   ;;  %vm202_vm0 = vmmov 0   ;;  %s264_s1 = inlined_call_operand.vmem [shape: bf16[128,128], index: 1, kind: input, shape index: {}]   ;;  %s265_s0 = inlined_call_operand.vmem [shape: bf16[8,128], index: 0, kind: input, shape index: {}]   ;;  %s266_s3 = inlined_call_operand.vmem [shape: bf16[8,128], index: 3, kind: input, shape index: {}]   ;;  %s267_s2 = inlined_call_operand.vmem [shape: f32[1,128], index: 2, kind: input, shape index: {}]   ;;  %s268_s4 = inlined_call_operand.vmem [shape: bf16[8,128], index: 4, kind: output, shape index: {}]  }
   0x1   :  { %171 = vmatprep.subr.bf16.mxu0 %v201_v0  ;;  %v193_v1 = vld [vmem:[%s264_s1] sm:$0xff]   ;;  %187 = vmatprep.mubr.msk.bf16.mxu0 %vm202_vm0, %v201_v0  ;;  %v194_v2 = vld [vmem:[%s264_s1 + $0x8] sm:$0xff]   ;;  %v195_v3 = vld [vmem:[%s264_s1 + $0x10] sm:$0xff]  }
   0x2   :  { %172 = vmatpush3.bf16.msra.mxu0 %v193_v1  ;;  %v196_v4 = vld [vmem:[%s264_s1 + $0x18] sm:$0xff]   ;;  %v197_v5 = vld [vmem:[%s264_s1 + $0x20] sm:$0xff]   ;;  %v198_v6 = vld [vmem:[%s264_s1 + $0x28] sm:$0xff]  }
   0x3   :  { %173 = vmatprep.subr.bf16.mxu0 %v201_v0  ;;  %v199_v7 = vld [vmem:[%s264_s1 + $0x30] sm:$0xff]   ;;  %v200_v8 = vld [vmem:[%s264_s1 + $0x38] sm:$0xff]   ;;  %v24_v9 = vld [vmem:[%s265_s0] sm:$0xf] }
   0x4   :  { %v143_v10 = vld [vmem:[%s266_s3] sm:$0xf] }
   0x5   :  { %v161_v11 = vld [vmem:[%s267_s2] ss:$0 sm:$0xff]  ;;  %v144_v12 = vunpack.c.l.bf16 %v143_v10 }
   0x6   :  { %174 = vmatpush3.bf16.msra.mxu0 %v194_v2 }
   0x7   :  { %175 = vmatprep.subr.bf16.mxu0 %v201_v0 }
   0xa   :  { %176 = vmatpush3.bf16.msra.mxu0 %v195_v3 }
   0xb   :  { %177 = vmatprep.subr.bf16.mxu0 %v201_v0 }
   0xe   :  { %178 = vmatpush3.bf16.msra.mxu0 %v196_v4 }
   0xf   :  { %179 = vmatprep.subr.bf16.mxu0 %v201_v0 }
  0x12   :  { %180 = vmatpush3.bf16.msra.mxu0 %v197_v5 }
  0x13   :  { %181 = vmatprep.subr.bf16.mxu0 %v201_v0 }
  0x16   :  { %182 = vmatpush3.bf16.msra.mxu0 %v198_v6 }
  0x17   :  { %183 = vmatprep.subr.bf16.mxu0 %v201_v0 }
  0x1a   :  { %184 = vmatpush3.bf16.msra.mxu0 %v199_v7 }
  0x1b   :  { %185 = vmatprep.subr.bf16.mxu0 %v201_v0 }
  0x1e   :  { %186 = vmatpush3.bf16.msra.mxu0 %v200_v8 }
  0x21   :  { %188 = vmatmul.mubr.bf16.vlgmr.msra.gmra.mrb[0].mxu0 %v24_v9 }
  0xf4   :  { %v123_v13 = vpop.f32.mrb[0].mxu0 }
  0xf5   :  { %v142_v14 = vadd.f32 %v161_v11, %v123_v13  ;;  %v189_v15 = vpop.f32.mrb[1].mxu0 }
  0xf6   :  { %v126_v16 = vpop.f32.mrb[2].mxu0 }
  0xf7   :  { %v145_v17 = vadd.f32 %v144_v12, %v142_v14  ;;  %v190_v18 = vpop.f32.mrb[3].mxu0 }
  0xf9   :  { %v146_v19 = vmax.f32 %v145_v17, 0.0 }
  0xfb   :  { %v147_v20 = vpack.c.bf16 %v146_v19, %v146_v19 }
  0xfd   :  { %148 = vst [vmem:[%s268_s4] sm:$0xf] %v147_v20 }

// kernel: _lambda_.34
= control target key start
LH: loop header
LB: loop body
LE: loop exit
PB: predicated region body
PF: predicated region fallthrough
CT: control target
= control target key end

     0   :  { %v195_v0 = vmov 0.0   ;;  %vm196_vm0 = vmmov 0   ;;  %s250_s1 = inlined_call_operand.vmem [shape: bf16[128,128], index: 1, kind: input, shape index: {}]   ;;  %s251_s0 = inlined_call_operand.vmem [shape: bf16[8,128], index: 0, kind: input, shape index: {}]   ;;  %s252_s2 = inlined_call_operand.vmem [shape: f32[1,128], index: 2, kind: input, shape index: {}]   ;;  %s253_s3 = inlined_call_operand.vmem [shape: bf16[8,128], index: 3, kind: output, shape index: {}]  }
   0x1   :  { %165 = vmatprep.subr.bf16.mxu0 %v195_v0  ;;  %v187_v1 = vld [vmem:[%s250_s1] sm:$0xff]   ;;  %181 = vmatprep.mubr.msk.bf16.mxu0 %vm196_vm0, %v195_v0  ;;  %v188_v2 = vld [vmem:[%s250_s1 + $0x8] sm:$0xff]   ;;  %v189_v3 = vld [vmem:[%s250_s1 + $0x10] sm:$0xff]  }
   0x2   :  { %166 = vmatpush3.bf16.msra.mxu0 %v187_v1  ;;  %v190_v4 = vld [vmem:[%s250_s1 + $0x18] sm:$0xff]   ;;  %v191_v5 = vld [vmem:[%s250_s1 + $0x20] sm:$0xff]   ;;  %v192_v6 = vld [vmem:[%s250_s1 + $0x28] sm:$0xff]  }
   0x3   :  { %167 = vmatprep.subr.bf16.mxu0 %v195_v0  ;;  %v193_v7 = vld [vmem:[%s250_s1 + $0x30] sm:$0xff]   ;;  %v194_v8 = vld [vmem:[%s250_s1 + $0x38] sm:$0xff]   ;;  %v21_v9 = vld [vmem:[%s251_s0] sm:$0xf] }
   0x4   :  { %v155_v10 = vld [vmem:[%s252_s2] ss:$0 sm:$0xff] }
   0x6   :  { %168 = vmatpush3.bf16.msra.mxu0 %v188_v2 }
   0x7   :  { %169 = vmatprep.subr.bf16.mxu0 %v195_v0 }
   0xa   :  { %170 = vmatpush3.bf16.msra.mxu0 %v189_v3 }
   0xb   :  { %171 = vmatprep.subr.bf16.mxu0 %v195_v0 }
   0xe   :  { %172 = vmatpush3.bf16.msra.mxu0 %v190_v4 }
   0xf   :  { %173 = vmatprep.subr.bf16.mxu0 %v195_v0 }
  0x12   :  { %174 = vmatpush3.bf16.msra.mxu0 %v191_v5 }
  0x13   :  { %175 = vmatprep.subr.bf16.mxu0 %v195_v0 }
  0x16   :  { %176 = vmatpush3.bf16.msra.mxu0 %v192_v6 }
  0x17   :  { %177 = vmatprep.subr.bf16.mxu0 %v195_v0 }
  0x1a   :  { %178 = vmatpush3.bf16.msra.mxu0 %v193_v7 }
  0x1b   :  { %179 = vmatprep.subr.bf16.mxu0 %v195_v0 }
  0x1e   :  { %180 = vmatpush3.bf16.msra.mxu0 %v194_v8 }
  0x21   :  { %182 = vmatmul.mubr.bf16.vlgmr.msra.gmra.mrb[0].mxu0 %v21_v9 }
  0xf4   :  { %v120_v11 = vpop.f32.mrb[0].mxu0 }
  0xf5   :  { %v139_v12 = vadd.f32 %v155_v10, %v120_v11  ;;  %v183_v13 = vpop.f32.mrb[1].mxu0 }
  0xf6   :  { %v123_v14 = vpop.f32.mrb[2].mxu0 }
  0xf7   :  { %v140_v15 = vmax.f32 %v139_v12, 0.0  ;;  %v184_v16 = vpop.f32.mrb[3].mxu0 }
  0xf9   :  { %v141_v17 = vpack.c.bf16 %v140_v15, %v140_v15 }
  0xfb   :  { %142 = vst [vmem:[%s253_s3] sm:$0xf] %v141_v17 }

// kernel: _lambda_.35
= control target key start
LH: loop header
LB: loop body
LE: loop exit
PB: predicated region body
PF: predicated region fallthrough
CT: control target
= control target key end

     0   :  { %s622_s12 = smov 0   ;;  %s624_s13 = smov 0   ;;  %s671_s0 = inlined_call_operand.vmem [shape: bf16[8,640], index: 0, kind: input, shape index: {}]   ;;  %s672_s1 = inlined_call_operand.vmem [shape: bf16[640,128], index: 1, kind: input, shape index: {}]   ;;  %s673_s2 = inlined_call_operand.vmem [shape: f32[1,128], index: 2, kind: input, shape index: {}]   ;;  %s674_s3 = inlined_call_operand.vmem [shape: bf16[8,128], index: 3, kind: output, shape index: {}]  }
   0x1   :  { %s626_s14 = smov 0  }
   0x2 LB: > { %s25_s15 = sadd.s32 1, %s593_s13  ;;  %p493_p0 = scmp.ge.s32.totalorder %s597_s14, 1  ;;  %s597_s14 = sphi %s626_s14, %s13_s14   ;;  %s593_s13 = sphi %s624_s13, %s676_s13   ;;  %s589_s12 = sphi %s622_s12, %s675_s12  }
   0x3   : > { %p26_p1 = scmp.ge.s32.totalorder %s25_s15, 5  ;;  %p187_p2 = scmp.lt.s32.totalorder %s597_s14, 6 }
   0x5   : > { %s678_s15 = smov (%p26_p1, %s25_s15), 0  ;;  %p188_p3 = pnand %p493_p0, %p187_p2 }
   0x6   : > { %p229_p4 = scmp.lt.s32.totalorder (!%p188_p3), %s589_s12, 4  ;;  %s495_s16 = sshll.u32 (!%p188_p3), %s589_s12, 4 }
   0x7   : > { %191 = sbr.rel (%p188_p3) target bundleno = 284 (0x11c), region = 32  ;;  %p236_p5 = scmp.lt.s32.totalorder (!%p188_p3), %s495_s16, 79 }
   0x8   : > { %p497_p6 = scmp.ne.s32.totalorder (!%p188_p3), %s589_s12, 0 }
   0xe   : > { %s230_s17 = scalar_select %p229_p4, %s589_s12, 4 }
   0xf   : > { %s680_s16 = smov (!%p236_p5, %s495_s16), 79  ;;  %258 = sbr.rel (%p497_p6) target bundleno = 22 (0x16), region = 36 }
  0x10   : > { %s494_s18 = sshll.u32 %s230_s17, 2  ;;  %s496_s22 = sshll.u32 %s680_s16, 2  ;;  %v599_v0 = vmov (!%p497_p6), 0.0  }
  0x11   : > { %s648_s21 = scalar_lea.vmem %s671_s0, %s494_s18  ;;  %s242_s25 = scalar_lea.vmem %s672_s1, %s496_s22  ;;  %259 = vst [vmem:[#allocation2] sm:$0xff] (!%p497_p6), %v599_v0 }
  0x16 PF: > { %v567_v1 = vld [vmem:[%s242_s25] sm:$0xff]   ;;  %v600_v2 = vmov 0.0   ;;  %v568_v3 = vld [vmem:[%s242_s25 + $0x8] sm:$0xff]   ;;  %vm601_vm0 = vmmov 0   ;;  %v569_v4 = vld [vmem:[%s242_s25 + $0x10] sm:$0xff]   ;;  %p506_p7 = scmp.ne.s32.totalorder %s589_s12, 4 }
  0x17   : > { %520 = vmatprep.subr.bf16.mxu0 %v600_v2  ;;  %536 = vmatprep.mubr.msk.bf16.mxu0 %vm601_vm0, %v600_v2  ;;  %v570_v5 = vld [vmem:[%s242_s25 + $0x18] sm:$0xff]   ;;  %v571_v6 = vld [vmem:[%s242_s25 + $0x20] sm:$0xff]   ;;  %v572_v7 = vld [vmem:[%s242_s25 + $0x28] sm:$0xff]  }
  0x18   : > { %521 = vmatpush3.bf16.msra.mxu0 %v567_v1  ;;  %v573_v8 = vld [vmem:[%s242_s25 + $0x30] sm:$0xff]   ;;  %v574_v9 = vld [vmem:[%s242_s25 + $0x38] sm:$0xff]   ;;  %v261_v10 = vld [vmem:[%s648_s21] sm:$0xf] }
  0x19   : > { %522 = vmatprep.subr.bf16.mxu0 %v600_v2  ;;  %v260_v11 = vld [vmem:[#allocation2] sm:$0xff] }
  0x1a   : > { %v507_v18 = vld [vmem:[%s673_s2] ss:$0 sm:$0xff] (!%p506_p7) }
  0x1c   : > { %523 = vmatpush3.bf16.msra.mxu0 %v568_v3 }
  0x1d   : > { %524 = vmatprep.subr.bf16.mxu0 %v600_v2 }
  0x20   : > { %525 = vmatpush3.bf16.msra.mxu0 %v569_v4 }
  0x21   : > { %526 = vmatprep.subr.bf16.mxu0 %v600_v2 }
  0x24   : > { %527 = vmatpush3.bf16.msra.mxu0 %v570_v5 }
  0x25   : > { %528 = vmatprep.subr.bf16.mxu0 %v600_v2 }
  0x28   : > { %529 = vmatpush3.bf16.msra.mxu0 %v571_v6 }
  0x29   : > { %530 = vmatprep.subr.bf16.mxu0 %v600_v2 }
  0x2c   : > { %531 = vmatpush3.bf16.msra.mxu0 %v572_v7 }
  0x2d   : > { %532 = vmatprep.subr.bf16.mxu0 %v600_v2 }
  0x30   : > { %533 = vmatpush3.bf16.msra.mxu0 %v573_v8 }
  0x31   : > { %534 = vmatprep.subr.bf16.mxu0 %v600_v2 }
  0x34   : > { %535 = vmatpush3.bf16.msra.mxu0 %v574_v9 }
  0x37   : > { %537 = vmatmul.mubr.bf16.vlgmr.msra.gmra.mrb[0].mxu0 %v261_v10 }
 0x107   : > { %371 = sbr.rel (%p506_p7) target bundleno = 284 (0x11c), region = 40 }
 0x10a   : > { %v360_v12 = vpop.f32.mrb[0].mxu0 }
 0x10b   : > { %v366_v13 = vadd.f32 %v360_v12, %v260_v11  ;;  %v538_v14 = vpop.f32.mrb[1].mxu0 }
 0x10c   : > { %v363_v15 = vpop.f32.mrb[2].mxu0 }
 0x10d   : > { %367 = vst [vmem:[#allocation2] sm:$0xff] %v366_v13  ;;  %v539_v16 = vpop.f32.mrb[3].mxu0 }
 0x114   : > { %v372_v17 = vld [vmem:[#allocation2] sm:$0xff] }
 0x115   : > { %v380_v19 = vadd.f32 %v507_v18, %v372_v17 }
 0x117   : > { %v381_v20 = vmax.f32 %v380_v19, 0.0 }
 0x119   : > { %v382_v21 = vpack.c.bf16 %v381_v20, %v381_v20 }
 0x11b   : > { %383 = vst [vmem:[%s674_s3] sm:$0xf] %v382_v21 }
 0x11c PF: > { %s13_s14 = sadd.s32 1, %s597_s14   ;;  %s675_s12 = smov %s593_s13 }
 0x11d   : > { %p10_p8 = scmp.ge.s32.totalorder %s13_s14, 7   ;;  %s676_s13 = smov %s678_s15 }
 0x11f   :  { %12 = sbr.rel (!%p10_p8) target bundleno = 2 (0x2), region = 76 }

// kernel: _lambda_.38
= control target key start
LH: loop header
LB: loop body
LE: loop exit
PB: predicated region body
PF: predicated region fallthrough
CT: control target
= control target key end

     0   :  { %s55_s0 = inlined_call_operand.vmem [shape: bf16[1,8,256], index: 0, kind: input, shape index: {}]   ;;  %s56_s1 = inlined_call_operand.vmem [shape: f32[8,256], index: 1, kind: output, shape index: {}]  }
   0x1   :  { %v16_v0 = vld [vmem:[%s55_s0] sm:$0xff] }
   0x2   :  { %v17_v1 = vunpack.c.l.bf16 %v16_v0  ;;  %v18_v2 = vunpack.c.h.bf16 %v16_v0 }
   0x4   :  { %30 = vst [vmem:[%s56_s1] sm:$0xff] %v17_v1  ;;  %31 = vst [vmem:[%s56_s1 + $0x8] sm:$0xff] %v18_v2 }

// kernel: _lambda_.39
= control target key start
LH: loop header
LB: loop body
LE: loop exit
PB: predicated region body
PF: predicated region fallthrough
CT: control target
= control target key end

     0   :  { %s352_s1 = inlined_call_operand.vmem [shape: bf16[256,128], index: 1, kind: input, shape index: {}]   ;;  %s353_s0 = inlined_call_operand.vmem [shape: bf16[8,256], index: 0, kind: input, shape index: {}]   ;;  %s354_s2 = inlined_call_operand.vmem [shape: f32[1,128], index: 2, kind: input, shape index: {}]   ;;  %s355_s3 = inlined_call_operand.vmem [shape: f32[8,128], index: 3, kind: output, shape index: {}]  }
   0x1   :  { %v257_v0 = vld [vmem:[%s352_s1 + $0x40] sm:$0xff]   ;;  %v259_v2 = vld [vmem:[%s352_s1 + $0x48] sm:$0xff]   ;;  %v261_v4 = vld [vmem:[%s352_s1 + $0x50] sm:$0xff]  }
   0x2   :  { %v258_v1 = vld [vmem:[%s352_s1] sm:$0xff]   ;;  %235 = vmatprep.subr.bf16.mxu0 %v257_v0  ;;  %v260_v3 = vld [vmem:[%s352_s1 + $0x8] sm:$0xff]   ;;  %v262_v5 = vld [vmem:[%s352_s1 + $0x10] sm:$0xff]  }
   0x3   :  { %236 = vmatpush3.bf16.msra.mxu0 %v258_v1  ;;  %v263_v6 = vld [vmem:[%s352_s1 + $0x58] sm:$0xff]   ;;  %v265_v8 = vld [vmem:[%s352_s1 + $0x60] sm:$0xff]   ;;  %v267_v10 = vld [vmem:[%s352_s1 + $0x68] sm:$0xff]  }
   0x4   :  { %237 = vmatprep.subr.bf16.mxu0 %v259_v2  ;;  %v264_v7 = vld [vmem:[%s352_s1 + $0x18] sm:$0xff]   ;;  %v266_v9 = vld [vmem:[%s352_s1 + $0x20] sm:$0xff]   ;;  %v268_v13 = vld [vmem:[%s352_s1 + $0x28] sm:$0xff]  }
   0x5   :  { %v21_v11 = vld [vmem:[%s353_s0] sm:$0xff]  ;;  %v269_v14 = vld [vmem:[%s352_s1 + $0x70] sm:$0xff]   ;;  %v271_v16 = vld [vmem:[%s352_s1 + $0x78] sm:$0xff]  }
   0x6   :  { %v217_v12 = vcombine.high %v21_v11, %v21_v11  ;;  %v270_v15 = vld [vmem:[%s352_s1 + $0x30] sm:$0xff]   ;;  %v272_v17 = vld [vmem:[%s352_s1 + $0x38] sm:$0xff]   ;;  %v216_v18 = vcombine.low %v21_v11, %v21_v11  ;;  %v234_v21 = vld [vmem:[%s354_s2] ss:$0 sm:$0xff] }
   0x7   :  { %238 = vmatpush3.bf16.msra.mxu0 %v260_v3 }
   0x8   :  { %239 = vmatprep.subr.bf16.mxu0 %v261_v4  ;;  %189 = vmatprep.mubr.bf16.mxu0 %v217_v12 }
   0xb   :  { %240 = vmatpush3.bf16.msra.mxu0 %v262_v5 }
   0xc   :  { %241 = vmatprep.subr.bf16.mxu0 %v263_v6 }
   0xf   :  { %242 = vmatpush3.bf16.msra.mxu0 %v264_v7 }
  0x10   :  { %243 = vmatprep.subr.bf16.mxu0 %v265_v8 }
  0x13   :  { %244 = vmatpush3.bf16.msra.mxu0 %v266_v9 }
  0x14   :  { %245 = vmatprep.subr.bf16.mxu0 %v267_v10 }
  0x17   :  { %246 = vmatpush3.bf16.msra.mxu0 %v268_v13 }
  0x18   :  { %247 = vmatprep.subr.bf16.mxu0 %v269_v14 }
  0x1b   :  { %248 = vmatpush3.bf16.msra.mxu0 %v270_v15 }
  0x1c   :  { %249 = vmatprep.subr.bf16.mxu0 %v271_v16 }
  0x1f   :  { %250 = vmatpush3.bf16.msra.mxu0 %v272_v17 }
  0x22   :  { %190 = vmatmul.mubr.bf16.vlgmr.msra.gmra.mrb[0].mxu0 %v216_v18 }
  0xf5   :  { %v251_v19 = vpop.f32.mrb[0].mxu0 }
  0xf6   :  { %v252_v20 = vpop.f32.mrb[1].mxu0 }
  0xf7   :  { %v253_v22 = vadd.f32 %v252_v20, %v251_v19  ;;  %v254_v23 = vpop.f32.mrb[2].mxu0 }
  0xf8   :  { %v255_v24 = vpop.f32.mrb[3].mxu0 }
  0xf9   :  { %v210_v25 = vadd.f32 %v253_v22, %v234_v21 }
  0xfb   :  { %211 = vst [vmem:[%s355_s3] sm:$0xff] %v210_v25 }

// kernel: _lambda_.37
= control target key start
LH: loop header
LB: loop body
LE: loop exit
PB: predicated region body
PF: predicated region fallthrough
CT: control target
= control target key end

     0   :  { %v250_v1 = vmov 0   ;;  %v175_v18 = vlaneseq  ;;  %s336_s1 = inlined_call_operand.vmem [shape: bf16[128,256], index: 1, kind: input, shape index: {}]   ;;  %s337_s0 = inlined_call_operand.vmem [shape: bf16[8,128], index: 0, kind: input, shape index: {}]   ;;  %s338_s2 = inlined_call_operand.vmem [shape: f32[1,256], index: 2, kind: input, shape index: {}]   ;;  %s339_s3 = inlined_call_operand.vmem [shape: bf16[8,256], index: 3, kind: input, shape index: {}]   ;;  %s340_s4 = inlined_call_operand.vmem [shape: bf16[8,256], index: 4, kind: output, shape index: {}]  }
   0x1   :  { %v226_v0 = vld [vmem:[%s336_s1 + $0x4] ss:$8 sps:$4 sm:$0xff]   ;;  %155 = vmatprep.mubr.bf16.mxu0 %v250_v1  ;;  %v228_v2 = vld [vmem:[%s336_s1] ss:$8 sps:$4 sm:$0xff]   ;;  %v229_v3 = vld [vmem:[%s336_s1 + $0x14] ss:$8 sps:$4 sm:$0xff]  }
   0x2   :  { %123 = vmatprep.subr.bf16.mxu0 %v226_v0  ;;  %v231_v4 = vld [vmem:[%s336_s1 + $0x10] ss:$8 sps:$4 sm:$0xff]   ;;  %v232_v5 = vld [vmem:[%s336_s1 + $0x24] ss:$8 sps:$4 sm:$0xff]   ;;  %v234_v6 = vld [vmem:[%s336_s1 + $0x20] ss:$8 sps:$4 sm:$0xff]  }
   0x3   :  { %124 = vmatpush1.bf16.msra.mxu0 %v228_v2  ;;  %v235_v7 = vld [vmem:[%s336_s1 + $0x34] ss:$8 sps:$4 sm:$0xff]   ;;  %v237_v8 = vld [vmem:[%s336_s1 + $0x30] ss:$8 sps:$4 sm:$0xff]   ;;  %v238_v9 = vld [vmem:[%s336_s1 + $0x44] ss:$8 sps:$4 sm:$0xff]  }
   0x4   :  { %125 = vmatprep.subr.bf16.mxu0 %v229_v3  ;;  %v240_v10 = vld [vmem:[%s336_s1 + $0x40] ss:$8 sps:$4 sm:$0xff]   ;;  %v241_v11 = vld [vmem:[%s336_s1 + $0x54] ss:$8 sps:$4 sm:$0xff]   ;;  %v243_v12 = vld [vmem:[%s336_s1 + $0x50] ss:$8 sps:$4 sm:$0xff]  }
   0x5   :  { %v244_v13 = vld [vmem:[%s336_s1 + $0x64] ss:$8 sps:$4 sm:$0xff]   ;;  %v246_v14 = vld [vmem:[%s336_s1 + $0x60] ss:$8 sps:$4 sm:$0xff]   ;;  %v247_v15 = vld [vmem:[%s336_s1 + $0x74] ss:$8 sps:$4 sm:$0xff]  }
   0x6   :  { %v249_v16 = vld [vmem:[%s336_s1 + $0x70] ss:$8 sps:$4 sm:$0xff]   ;;  %v26_v17 = vld [vmem:[%s337_s0] sm:$0xf]  ;;  %v176_v19 = vshrl.u32 %v175_v18, 7 }
   0x7   :  { %126 = vmatpush1.bf16.msra.mxu0 %v231_v4  ;;  %v173_v21 = vld [vmem:[%s338_s2] sm:$0x3] }
   0x8   :  { %127 = vmatprep.subr.bf16.mxu0 %v232_v5  ;;  %v177_v20 = vsub.s32 0, %v176_v19  ;;  %v181_v22 = vsub.s32 1, %v176_v19  ;;  %v187_v23 = vld [vmem:[%s339_s3] sm:$0xff] }
   0x9   :  { %v188_v26 = vunpack.c.l.bf16 %v187_v23  ;;  %v189_v28 = vunpack.c.h.bf16 %v187_v23 }
   0xa   :  { %v178_v24 = vrot.slane %v173_v21, %v177_v20  ;;  %v182_v25 = vrot.slane %v173_v21, %v181_v22 }
   0xb   :  { %128 = vmatpush1.bf16.msra.mxu0 %v234_v6 }
   0xc   :  { %129 = vmatprep.subr.bf16.mxu0 %v235_v7 }
   0xf   :  { %130 = vmatpush1.bf16.msra.mxu0 %v237_v8 }
  0x10   :  { %131 = vmatprep.subr.bf16.mxu0 %v238_v9 }
  0x13   :  { %132 = vmatpush1.bf16.msra.mxu0 %v240_v10 }
  0x14   :  { %133 = vmatprep.subr.bf16.mxu0 %v241_v11 }
  0x17   :  { %134 = vmatpush1.bf16.msra.mxu0 %v243_v12 }
  0x18   :  { %135 = vmatprep.subr.bf16.mxu0 %v244_v13 }
  0x1b   :  { %136 = vmatpush1.bf16.msra.mxu0 %v246_v14 }
  0x1c   :  { %137 = vmatprep.subr.bf16.mxu0 %v247_v15 }
  0x1f   :  { %138 = vmatpush1.bf16.msra.mxu0 %v249_v16 }
  0x22   :  { %156 = vmatmul.mubr.bf16.vlgmr.msra.gmra.mrb[0].mxu0 %v26_v17 }
  0xf5   :  { %v157_v27 = vpop.f32.mrb[0].mxu0 }
  0xf6   :  { %v185_v29 = vadd.f32 %v178_v24, %v157_v27  ;;  %v159_v30 = vpop.f32.mrb[1].mxu0 }
  0xf7   :  { %v186_v31 = vadd.f32 %v182_v25, %v159_v30  ;;  %v161_v32 = vpop.f32.mrb[2].mxu0 }
  0xf8   :  { %v190_v33 = vadd.f32 %v188_v26, %v185_v29  ;;  %v162_v34 = vpop.f32.mrb[3].mxu0 }
  0xf9   :  { %v191_v35 = vadd.f32 %v189_v28, %v186_v31 }
  0xfa   :  { %v192_v36 = vmax.f32 %v190_v33, 0.0 }
  0xfb   :  { %v193_v37 = vmax.f32 %v191_v35, 0.0 }
  0xfd   :  { %v224_v38 = vpack.c.bf16 %v193_v37, %v192_v36 }
  0xff   :  { %202 = vst [vmem:[%s340_s4] sm:$0xff] %v224_v38 }

</bundles_post_ra>
